<compile_context>
chip_gen: v6e
topology: v6e:2x2x1
jax: 0.10.0
libtpu: 0.0.40
codegen_flags: <defaults>
</compile_context>

<pallas_src>
import numpy as np
import jax
import jax.numpy as jnp
from jax import lax
from jax.experimental import pallas as pl
from jax.experimental.pallas import tpu as pltpu

GUIDANCE_W = 2.0  # w in the PyTorch module


def _reverse_diffusion_kernel(coef_ref, x_ref, bias_c_ref, bias_u_ref,
                              w1t_ref, w2t_ref, noise_ref, out_ref):
    """Runs ALL reverse-diffusion steps in one invocation.

    coef_ref : SMEM (n_steps, 3)  [coeff1, coeff2, sqrt(var)] per step
    x_ref    : VMEM (C, N)        x_T with N = B*HW pixels on lanes
    bias_*   : VMEM (n_steps, HID, N)  precomputed cond/uncond biases
    w1t_ref  : VMEM (HID, C)      W1ᵀ
    w2t_ref  : VMEM (C, HID)      W2ᵀ
    noise_ref: VMEM (n_steps, C, N)  per-step Gaussian noise (last = 0)
    out_ref  : VMEM (C, N)        x_0 clipped/rescaled
    """
    n_steps = coef_ref.shape[0]                 # static trip count
    w1t = w1t_ref[...]                          # (HID, C) resident in vregs
    w2t = w2t_ref[...]                          # (C, HID)

    def silu(z):
        return z * jax.nn.sigmoid(z)

    def step(s, x):
        # Per-pixel MLP hidden: h = W1ᵀ @ x  -> (HID, N), single 2-D matmul.
        h = jnp.dot(w1t, x, preferred_element_type=jnp.float32)
        # Guidance folded before the (linear) W2 projection:
        #   (1+w)*silu(h+b_c) - w*silu(h+b_u)   -> one W2 matmul.
        act = ((1.0 + GUIDANCE_W) * silu(h + bias_c_ref[s])
               - GUIDANCE_W * silu(h + bias_u_ref[s]))
        eps = jnp.dot(w2t, act, preferred_element_type=jnp.float32)   # (C, N)

        c1 = coef_ref[s, 0]
        c2 = coef_ref[s, 1]
        sv = coef_ref[s, 2]                     # sqrt(var[t]); 0 at last step
        mean = c1 * x - c2 * eps
        return mean + sv * noise_ref[s]         # x_{t-1}

    x0 = lax.fori_loop(0, n_steps, step, x_ref[...], unroll=True)
    # t == 0 reached: clip to [-1, 1] and rescale to [0, 1] (lane-dense store).
    out_ref[...] = jnp.clip(x0, -1.0, 1.0) * 0.5 + 0.5


def reverse_diffusion(coeffs, x, bias_c, bias_u, w1t, w2t, noise):
    """Single fused pallas_call (grid=()) over the whole problem."""
    C, N = x.shape
    vmem = pltpu.MemorySpace.VMEM
    return pl.pallas_call(
        _reverse_diffusion_kernel,
        out_shape=jax.ShapeDtypeStruct((C, N), jnp.float32),
        in_specs=[
            pl.BlockSpec(memory_space=pltpu.MemorySpace.SMEM),   # coeffs
            pl.BlockSpec(memory_space=vmem),                     # x_T
            pl.BlockSpec(memory_space=vmem),                     # bias_c
            pl.BlockSpec(memory_space=vmem),                     # bias_u
            pl.BlockSpec(memory_space=vmem),                     # W1ᵀ
            pl.BlockSpec(memory_space=vmem),                     # W2ᵀ
            pl.BlockSpec(memory_space=vmem),                     # noise
        ],
        out_specs=pl.BlockSpec(memory_space=vmem),
        input_output_aliases={1: 0},            # reuse x_T's HBM buffer
    )(coeffs, x, bias_c, bias_u, w1t, w2t, noise)


if __name__ == "__main__":
    B, C, H, W = 2, 4, 16, 16
    HW = H * W
    HID = 32
    T = 100
    NUM_CLASSES = 10
    n_upto = 5
    beta_1, beta_T = 1e-4, 0.02

    # ---- diffusion schedule (float64 buffers like torch, used as f32) ----
    betas = np.linspace(beta_1, beta_T, T, dtype=np.float64)
    alphas = 1.0 - betas
    alphas_bar = np.cumprod(alphas)
    alphas_bar_prev = np.concatenate([[1.0], alphas_bar])[:T]   # F.pad(...,[1,0],1)[:T]
    coeff1 = np.sqrt(1.0 / alphas)
    coeff2 = coeff1 * (1.0 - alphas) / np.sqrt(1.0 - alphas_bar)
    posterior_var = betas * (1.0 - alphas_bar_prev) / (1.0 - alphas_bar)
    var = np.concatenate([posterior_var[1:2], betas[1:]])       # cat([pv[1:2], betas[1:]])

    # ---- deterministic synthetic eps-model parameters ----
    # TODO(synk): the original module takes an arbitrary UNet `model`; it is
    # replaced here by a deterministic 1x1-conv MLP eps-predictor.
    key = jax.random.PRNGKey(0)
    k_x, k_w1, k_w2, k_t, k_l, k_n = jax.random.split(key, 6)
    w1 = jax.random.normal(k_w1, (C, HID), jnp.float32) / np.sqrt(C)
    w2 = jax.random.normal(k_w2, (HID, C), jnp.float32) / np.sqrt(HID)
    temb = jax.random.normal(k_t, (T, HID), jnp.float32) * 0.1
    lemb = jax.random.normal(k_l, (NUM_CLASSES + 1, HID), jnp.float32) * 0.1  # row 0 = null

    # ---- inputs ----
    x_T = jax.random.normal(k_x, (B, C, H, W), jnp.float32)     # NCHW, like torch
    labels = jnp.array([3, 7], dtype=jnp.int32)

    # ---- per-step tables: step s corresponds to time_step = n_upto - s ----
    n_steps = n_upto + 1
    tsteps = np.arange(n_upto, -1, -1)
    c1 = coeff1[tsteps].astype(np.float32)
    c2 = coeff2[tsteps].astype(np.float32)
    sv = np.where(tsteps > 0, np.sqrt(var[tsteps]), 0.0).astype(np.float32)
    coeffs = jnp.asarray(np.stack([c1, c2, sv], axis=1))        # (n_steps, 3) -> SMEM

    # ---- layout: pixels AND batch on the lane axis: (C, B*HW) ----
    def to_lane_layout(a):                                      # (B,C,...) -> (C, B*HW)
        return a.reshape(B, C, HW).transpose(1, 0, 2).reshape(C, B * HW)

    x = to_lane_layout(x_T)

    # ---- lane-expanded per-step bias tables (n_steps, HID, B*HW) ----
    temb_s = temb[jnp.asarray(tsteps)]                          # (n_steps, HID)
    bias_c = temb_s[:, :, None, None] + lemb[labels].T[None, :, :, None]   # (S,HID,B,1)
    bias_c = jnp.broadcast_to(bias_c, (n_steps, HID, B, HW)).reshape(n_steps, HID, B * HW)
    bias_u = jnp.broadcast_to((temb_s + lemb[0][None, :])[:, :, None],
                              (n_steps, HID, B * HW))

    # ---- precomputed Gaussian noise (torch.randn_like equivalent) ----
    # TODO(synk): torch.randn_like's RNG stream is not reproducible in JAX;
    # noise is drawn host-side with jax.random from PRNGKey(0) instead.
    noise_bc = jax.random.normal(k_n, (n_steps, B, C, HW), jnp.float32)
    noise = jnp.stack([to_lane_layout(noise_bc[s]) for s in range(n_steps)])
    noise = noise.at[-1].set(0.0)                               # no noise at t == 0

    w1t = w1.T                                                  # (HID, C)
    w2t = w2.T                                                  # (C, HID)

    # ---- Algorithm 2: full reverse diffusion in one fused kernel ----
    x0 = reverse_diffusion(coeffs, x, bias_c, bias_u, w1t, w2t, noise)
    x0 = jax.block_until_ready(x0)
    x0 = x0.reshape(C, B, HW).transpose(1, 0, 2).reshape(B, C, H, W)   # back to NCHW

    assert not bool(jnp.isnan(x0).any()), "nan in tensor."
    assert x0.shape == (B, C, H, W)
    assert float(x0.min()) >= 0.0 and float(x0.max()) <= 1.0
    print("KERNEL_OK")
</pallas_src>

<mosaic_0001>
module attributes {stable_mosaic.version = 11 : i64} {
  func.func @_reverse_diffusion_kernel(%arg0: memref<6x3xf32, #tpu.memory_space<smem>>, %arg1: memref<4x512xf32, #tpu.memory_space<vmem>>, %arg2: memref<6x32x512xf32, #tpu.memory_space<vmem>>, %arg3: memref<6x32x512xf32, #tpu.memory_space<vmem>>, %arg4: memref<32x4xf32, #tpu.memory_space<vmem>>, %arg5: memref<4x32xf32, #tpu.memory_space<vmem>>, %arg6: memref<6x4x512xf32, #tpu.memory_space<vmem>>, %arg7: memref<4x512xf32, #tpu.memory_space<vmem>>) attributes {dimension_semantics = [], scalar_prefetch = 0 : i64, scratch_operands = 0 : i64, tpu.core_type = #tpu.core_type<tc>} {
    %c0 = arith.constant 0 : index
    %c0_0 = arith.constant 0 : index
    %0 = vector.load %arg4[%c0, %c0_0] : memref<32x4xf32, #tpu.memory_space<vmem>>, vector<32x4xf32>
    %c0_1 = arith.constant 0 : index
    %c0_2 = arith.constant 0 : index
    %1 = vector.load %arg5[%c0_1, %c0_2] : memref<4x32xf32, #tpu.memory_space<vmem>>, vector<4x32xf32>
    %c0_3 = arith.constant 0 : index
    %c0_4 = arith.constant 0 : index
    %2 = vector.load %arg1[%c0_3, %c0_4] : memref<4x512xf32, #tpu.memory_space<vmem>>, vector<4x512xf32>
    %c0_i32 = arith.constant 0 : i32
    %cst = arith.constant dense<0.000000e+00> : vector<32x512xf32>
    %3 = tpu.matmul %0, %2, %cst {dimension_numbers = #tpu.dot_dimension_numbers<[1], [0], [0], [1], [0, 0, 1, 1], [], []>} : vector<32x4xf32>, vector<4x512xf32>, vector<32x512xf32> -> vector<32x512xf32>
    %4 = arith.index_cast %c0_i32 : i32 to index
    %c0_5 = arith.constant 0 : index
    %c0_6 = arith.constant 0 : index
    %5 = vector.load %arg2[%4, %c0_5, %c0_6] : memref<6x32x512xf32, #tpu.memory_space<vmem>>, vector<1x32x512xf32>
    %6 = vector.shape_cast %5 : vector<1x32x512xf32> to vector<32x512xf32>
    %7 = arith.addf %3, %6 : vector<32x512xf32>
    %8 = arith.negf %7 : vector<32x512xf32>
    %9 = math.exp %8 : vector<32x512xf32>
    %cst_7 = arith.constant 1.000000e+00 : f32
    %10 = vector.broadcast %cst_7 : f32 to vector<32x512xf32>
    %11 = arith.addf %10, %9 : vector<32x512xf32>
    %12 = arith.divf %10, %11 : vector<32x512xf32>
    %13 = arith.mulf %7, %12 : vector<32x512xf32>
    %cst_8 = arith.constant 3.000000e+00 : f32
    %14 = vector.broadcast %cst_8 : f32 to vector<32x512xf32>
    %15 = arith.mulf %14, %13 : vector<32x512xf32>
    %16 = arith.index_cast %c0_i32 : i32 to index
    %c0_9 = arith.constant 0 : index
    %c0_10 = arith.constant 0 : index
    %17 = vector.load %arg3[%16, %c0_9, %c0_10] : memref<6x32x512xf32, #tpu.memory_space<vmem>>, vector<1x32x512xf32>
    %18 = vector.shape_cast %17 : vector<1x32x512xf32> to vector<32x512xf32>
    %19 = arith.addf %3, %18 : vector<32x512xf32>
    %20 = arith.negf %19 : vector<32x512xf32>
    %21 = math.exp %20 : vector<32x512xf32>
    %cst_11 = arith.constant 1.000000e+00 : f32
    %22 = vector.broadcast %cst_11 : f32 to vector<32x512xf32>
    %23 = arith.addf %22, %21 : vector<32x512xf32>
    %24 = arith.divf %22, %23 : vector<32x512xf32>
    %25 = arith.mulf %19, %24 : vector<32x512xf32>
    %cst_12 = arith.constant 2.000000e+00 : f32
    %26 = vector.broadcast %cst_12 : f32 to vector<32x512xf32>
    %27 = arith.mulf %26, %25 : vector<32x512xf32>
    %28 = arith.subf %15, %27 : vector<32x512xf32>
    %cst_13 = arith.constant dense<0.000000e+00> : vector<4x512xf32>
    %29 = tpu.matmul %1, %28, %cst_13 {dimension_numbers = #tpu.dot_dimension_numbers<[1], [0], [0], [1], [0, 0, 1, 1], [], []>} : vector<4x32xf32>, vector<32x512xf32>, vector<4x512xf32> -> vector<4x512xf32>
    %30 = arith.index_cast %c0_i32 : i32 to index
    %c0_14 = arith.constant 0 : index
    %31 = memref.load %arg0[%30, %c0_14] : memref<6x3xf32, #tpu.memory_space<smem>>
    %32 = arith.index_cast %c0_i32 : i32 to index
    %c1 = arith.constant 1 : index
    %33 = memref.load %arg0[%32, %c1] : memref<6x3xf32, #tpu.memory_space<smem>>
    %34 = arith.index_cast %c0_i32 : i32 to index
    %c2 = arith.constant 2 : index
    %35 = memref.load %arg0[%34, %c2] : memref<6x3xf32, #tpu.memory_space<smem>>
    %36 = vector.broadcast %31 : f32 to vector<4x512xf32>
    %37 = arith.mulf %36, %2 : vector<4x512xf32>
    %38 = vector.broadcast %33 : f32 to vector<4x512xf32>
    %39 = arith.mulf %38, %29 : vector<4x512xf32>
    %40 = arith.subf %37, %39 : vector<4x512xf32>
    %41 = arith.index_cast %c0_i32 : i32 to index
    %c0_15 = arith.constant 0 : index
    %c0_16 = arith.constant 0 : index
    %42 = vector.load %arg6[%41, %c0_15, %c0_16] : memref<6x4x512xf32, #tpu.memory_space<vmem>>, vector<1x4x512xf32>
    %43 = vector.shape_cast %42 : vector<1x4x512xf32> to vector<4x512xf32>
    %44 = vector.broadcast %35 : f32 to vector<4x512xf32>
    %45 = arith.mulf %44, %43 : vector<4x512xf32>
    %46 = arith.addf %40, %45 : vector<4x512xf32>
    %c1_i32 = arith.constant 1 : i32
    %cst_17 = arith.constant dense<0.000000e+00> : vector<32x512xf32>
    %47 = tpu.matmul %0, %46, %cst_17 {dimension_numbers = #tpu.dot_dimension_numbers<[1], [0], [0], [1], [0, 0, 1, 1], [], []>} : vector<32x4xf32>, vector<4x512xf32>, vector<32x512xf32> -> vector<32x512xf32>
    %48 = arith.index_cast %c1_i32 : i32 to index
    %c0_18 = arith.constant 0 : index
    %c0_19 = arith.constant 0 : index
    %49 = vector.load %arg2[%48, %c0_18, %c0_19] : memref<6x32x512xf32, #tpu.memory_space<vmem>>, vector<1x32x512xf32>
    %50 = vector.shape_cast %49 : vector<1x32x512xf32> to vector<32x512xf32>
    %51 = arith.addf %47, %50 : vector<32x512xf32>
    %52 = arith.negf %51 : vector<32x512xf32>
    %53 = math.exp %52 : vector<32x512xf32>
    %cst_20 = arith.constant 1.000000e+00 : f32
    %54 = vector.broadcast %cst_20 : f32 to vector<32x512xf32>
    %55 = arith.addf %54, %53 : vector<32x512xf32>
    %56 = arith.divf %54, %55 : vector<32x512xf32>
    %57 = arith.mulf %51, %56 : vector<32x512xf32>
    %cst_21 = arith.constant 3.000000e+00 : f32
    %58 = vector.broadcast %cst_21 : f32 to vector<32x512xf32>
    %59 = arith.mulf %58, %57 : vector<32x512xf32>
    %60 = arith.index_cast %c1_i32 : i32 to index
    %c0_22 = arith.constant 0 : index
    %c0_23 = arith.constant 0 : index
    %61 = vector.load %arg3[%60, %c0_22, %c0_23] : memref<6x32x512xf32, #tpu.memory_space<vmem>>, vector<1x32x512xf32>
    %62 = vector.shape_cast %61 : vector<1x32x512xf32> to vector<32x512xf32>
    %63 = arith.addf %47, %62 : vector<32x512xf32>
    %64 = arith.negf %63 : vector<32x512xf32>
    %65 = math.exp %64 : vector<32x512xf32>
    %cst_24 = arith.constant 1.000000e+00 : f32
    %66 = vector.broadcast %cst_24 : f32 to vector<32x512xf32>
    %67 = arith.addf %66, %65 : vector<32x512xf32>
    %68 = arith.divf %66, %67 : vector<32x512xf32>
    %69 = arith.mulf %63, %68 : vector<32x512xf32>
    %cst_25 = arith.constant 2.000000e+00 : f32
    %70 = vector.broadcast %cst_25 : f32 to vector<32x512xf32>
    %71 = arith.mulf %70, %69 : vector<32x512xf32>
    %72 = arith.subf %59, %71 : vector<32x512xf32>
    %cst_26 = arith.constant dense<0.000000e+00> : vector<4x512xf32>
    %73 = tpu.matmul %1, %72, %cst_26 {dimension_numbers = #tpu.dot_dimension_numbers<[1], [0], [0], [1], [0, 0, 1, 1], [], []>} : vector<4x32xf32>, vector<32x512xf32>, vector<4x512xf32> -> vector<4x512xf32>
    %74 = arith.index_cast %c1_i32 : i32 to index
    %c0_27 = arith.constant 0 : index
    %75 = memref.load %arg0[%74, %c0_27] : memref<6x3xf32, #tpu.memory_space<smem>>
    %76 = arith.index_cast %c1_i32 : i32 to index
    %c1_28 = arith.constant 1 : index
    %77 = memref.load %arg0[%76, %c1_28] : memref<6x3xf32, #tpu.memory_space<smem>>
    %78 = arith.index_cast %c1_i32 : i32 to index
    %c2_29 = arith.constant 2 : index
    %79 = memref.load %arg0[%78, %c2_29] : memref<6x3xf32, #tpu.memory_space<smem>>
    %80 = vector.broadcast %75 : f32 to vector<4x512xf32>
    %81 = arith.mulf %80, %46 : vector<4x512xf32>
    %82 = vector.broadcast %77 : f32 to vector<4x512xf32>
    %83 = arith.mulf %82, %73 : vector<4x512xf32>
    %84 = arith.subf %81, %83 : vector<4x512xf32>
    %85 = arith.index_cast %c1_i32 : i32 to index
    %c0_30 = arith.constant 0 : index
    %c0_31 = arith.constant 0 : index
    %86 = vector.load %arg6[%85, %c0_30, %c0_31] : memref<6x4x512xf32, #tpu.memory_space<vmem>>, vector<1x4x512xf32>
    %87 = vector.shape_cast %86 : vector<1x4x512xf32> to vector<4x512xf32>
    %88 = vector.broadcast %79 : f32 to vector<4x512xf32>
    %89 = arith.mulf %88, %87 : vector<4x512xf32>
    %90 = arith.addf %84, %89 : vector<4x512xf32>
    %c2_i32 = arith.constant 2 : i32
    %cst_32 = arith.constant dense<0.000000e+00> : vector<32x512xf32>
    %91 = tpu.matmul %0, %90, %cst_32 {dimension_numbers = #tpu.dot_dimension_numbers<[1], [0], [0], [1], [0, 0, 1, 1], [], []>} : vector<32x4xf32>, vector<4x512xf32>, vector<32x512xf32> -> vector<32x512xf32>
    %92 = arith.index_cast %c2_i32 : i32 to index
    %c0_33 = arith.constant 0 : index
    %c0_34 = arith.constant 0 : index
    %93 = vector.load %arg2[%92, %c0_33, %c0_34] : memref<6x32x512xf32, #tpu.memory_space<vmem>>, vector<1x32x512xf32>
    %94 = vector.shape_cast %93 : vector<1x32x512xf32> to vector<32x512xf32>
    %95 = arith.addf %91, %94 : vector<32x512xf32>
    %96 = arith.negf %95 : vector<32x512xf32>
    %97 = math.exp %96 : vector<32x512xf32>
    %cst_35 = arith.constant 1.000000e+00 : f32
    %98 = vector.broadcast %cst_35 : f32 to vector<32x512xf32>
    %99 = arith.addf %98, %97 : vector<32x512xf32>
    %100 = arith.divf %98, %99 : vector<32x512xf32>
    %101 = arith.mulf %95, %100 : vector<32x512xf32>
    %cst_36 = arith.constant 3.000000e+00 : f32
    %102 = vector.broadcast %cst_36 : f32 to vector<32x512xf32>
    %103 = arith.mulf %102, %101 : vector<32x512xf32>
    %104 = arith.index_cast %c2_i32 : i32 to index
    %c0_37 = arith.constant 0 : index
    %c0_38 = arith.constant 0 : index
    %105 = vector.load %arg3[%104, %c0_37, %c0_38] : memref<6x32x512xf32, #tpu.memory_space<vmem>>, vector<1x32x512xf32>
    %106 = vector.shape_cast %105 : vector<1x32x512xf32> to vector<32x512xf32>
    %107 = arith.addf %91, %106 : vector<32x512xf32>
    %108 = arith.negf %107 : vector<32x512xf32>
    %109 = math.exp %108 : vector<32x512xf32>
    %cst_39 = arith.constant 1.000000e+00 : f32
    %110 = vector.broadcast %cst_39 : f32 to vector<32x512xf32>
    %111 = arith.addf %110, %109 : vector<32x512xf32>
    %112 = arith.divf %110, %111 : vector<32x512xf32>
    %113 = arith.mulf %107, %112 : vector<32x512xf32>
    %cst_40 = arith.constant 2.000000e+00 : f32
    %114 = vector.broadcast %cst_40 : f32 to vector<32x512xf32>
    %115 = arith.mulf %114, %113 : vector<32x512xf32>
    %116 = arith.subf %103, %115 : vector<32x512xf32>
    %cst_41 = arith.constant dense<0.000000e+00> : vector<4x512xf32>
    %117 = tpu.matmul %1, %116, %cst_41 {dimension_numbers = #tpu.dot_dimension_numbers<[1], [0], [0], [1], [0, 0, 1, 1], [], []>} : vector<4x32xf32>, vector<32x512xf32>, vector<4x512xf32> -> vector<4x512xf32>
    %118 = arith.index_cast %c2_i32 : i32 to index
    %c0_42 = arith.constant 0 : index
    %119 = memref.load %arg0[%118, %c0_42] : memref<6x3xf32, #tpu.memory_space<smem>>
    %120 = arith.index_cast %c2_i32 : i32 to index
    %c1_43 = arith.constant 1 : index
    %121 = memref.load %arg0[%120, %c1_43] : memref<6x3xf32, #tpu.memory_space<smem>>
    %122 = arith.index_cast %c2_i32 : i32 to index
    %c2_44 = arith.constant 2 : index
    %123 = memref.load %arg0[%122, %c2_44] : memref<6x3xf32, #tpu.memory_space<smem>>
    %124 = vector.broadcast %119 : f32 to vector<4x512xf32>
    %125 = arith.mulf %124, %90 : vector<4x512xf32>
    %126 = vector.broadcast %121 : f32 to vector<4x512xf32>
    %127 = arith.mulf %126, %117 : vector<4x512xf32>
    %128 = arith.subf %125, %127 : vector<4x512xf32>
    %129 = arith.index_cast %c2_i32 : i32 to index
    %c0_45 = arith.constant 0 : index
    %c0_46 = arith.constant 0 : index
    %130 = vector.load %arg6[%129, %c0_45, %c0_46] : memref<6x4x512xf32, #tpu.memory_space<vmem>>, vector<1x4x512xf32>
    %131 = vector.shape_cast %130 : vector<1x4x512xf32> to vector<4x512xf32>
    %132 = vector.broadcast %123 : f32 to vector<4x512xf32>
    %133 = arith.mulf %132, %131 : vector<4x512xf32>
    %134 = arith.addf %128, %133 : vector<4x512xf32>
    %c3_i32 = arith.constant 3 : i32
    %cst_47 = arith.constant dense<0.000000e+00> : vector<32x512xf32>
    %135 = tpu.matmul %0, %134, %cst_47 {dimension_numbers = #tpu.dot_dimension_numbers<[1], [0], [0], [1], [0, 0, 1, 1], [], []>} : vector<32x4xf32>, vector<4x512xf32>, vector<32x512xf32> -> vector<32x512xf32>
    %136 = arith.index_cast %c3_i32 : i32 to index
    %c0_48 = arith.constant 0 : index
    %c0_49 = arith.constant 0 : index
    %137 = vector.load %arg2[%136, %c0_48, %c0_49] : memref<6x32x512xf32, #tpu.memory_space<vmem>>, vector<1x32x512xf32>
    %138 = vector.shape_cast %137 : vector<1x32x512xf32> to vector<32x512xf32>
    %139 = arith.addf %135, %138 : vector<32x512xf32>
    %140 = arith.negf %139 : vector<32x512xf32>
    %141 = math.exp %140 : vector<32x512xf32>
    %cst_50 = arith.constant 1.000000e+00 : f32
    %142 = vector.broadcast %cst_50 : f32 to vector<32x512xf32>
    %143 = arith.addf %142, %141 : vector<32x512xf32>
    %144 = arith.divf %142, %143 : vector<32x512xf32>
    %145 = arith.mulf %139, %144 : vector<32x512xf32>
    %cst_51 = arith.constant 3.000000e+00 : f32
    %146 = vector.broadcast %cst_51 : f32 to vector<32x512xf32>
    %147 = arith.mulf %146, %145 : vector<32x512xf32>
    %148 = arith.index_cast %c3_i32 : i32 to index
    %c0_52 = arith.constant 0 : index
    %c0_53 = arith.constant 0 : index
    %149 = vector.load %arg3[%148, %c0_52, %c0_53] : memref<6x32x512xf32, #tpu.memory_space<vmem>>, vector<1x32x512xf32>
    %150 = vector.shape_cast %149 : vector<1x32x512xf32> to vector<32x512xf32>
    %151 = arith.addf %135, %150 : vector<32x512xf32>
    %152 = arith.negf %151 : vector<32x512xf32>
    %153 = math.exp %152 : vector<32x512xf32>
    %cst_54 = arith.constant 1.000000e+00 : f32
    %154 = vector.broadcast %cst_54 : f32 to vector<32x512xf32>
    %155 = arith.addf %154, %153 : vector<32x512xf32>
    %156 = arith.divf %154, %155 : vector<32x512xf32>
    %157 = arith.mulf %151, %156 : vector<32x512xf32>
    %cst_55 = arith.constant 2.000000e+00 : f32
    %158 = vector.broadcast %cst_55 : f32 to vector<32x512xf32>
    %159 = arith.mulf %158, %157 : vector<32x512xf32>
    %160 = arith.subf %147, %159 : vector<32x512xf32>
    %cst_56 = arith.constant dense<0.000000e+00> : vector<4x512xf32>
    %161 = tpu.matmul %1, %160, %cst_56 {dimension_numbers = #tpu.dot_dimension_numbers<[1], [0], [0], [1], [0, 0, 1, 1], [], []>} : vector<4x32xf32>, vector<32x512xf32>, vector<4x512xf32> -> vector<4x512xf32>
    %162 = arith.index_cast %c3_i32 : i32 to index
    %c0_57 = arith.constant 0 : index
    %163 = memref.load %arg0[%162, %c0_57] : memref<6x3xf32, #tpu.memory_space<smem>>
    %164 = arith.index_cast %c3_i32 : i32 to index
    %c1_58 = arith.constant 1 : index
    %165 = memref.load %arg0[%164, %c1_58] : memref<6x3xf32, #tpu.memory_space<smem>>
    %166 = arith.index_cast %c3_i32 : i32 to index
    %c2_59 = arith.constant 2 : index
    %167 = memref.load %arg0[%166, %c2_59] : memref<6x3xf32, #tpu.memory_space<smem>>
    %168 = vector.broadcast %163 : f32 to vector<4x512xf32>
    %169 = arith.mulf %168, %134 : vector<4x512xf32>
    %170 = vector.broadcast %165 : f32 to vector<4x512xf32>
    %171 = arith.mulf %170, %161 : vector<4x512xf32>
    %172 = arith.subf %169, %171 : vector<4x512xf32>
    %173 = arith.index_cast %c3_i32 : i32 to index
    %c0_60 = arith.constant 0 : index
    %c0_61 = arith.constant 0 : index
    %174 = vector.load %arg6[%173, %c0_60, %c0_61] : memref<6x4x512xf32, #tpu.memory_space<vmem>>, vector<1x4x512xf32>
    %175 = vector.shape_cast %174 : vector<1x4x512xf32> to vector<4x512xf32>
    %176 = vector.broadcast %167 : f32 to vector<4x512xf32>
    %177 = arith.mulf %176, %175 : vector<4x512xf32>
    %178 = arith.addf %172, %177 : vector<4x512xf32>
    %c4_i32 = arith.constant 4 : i32
    %cst_62 = arith.constant dense<0.000000e+00> : vector<32x512xf32>
    %179 = tpu.matmul %0, %178, %cst_62 {dimension_numbers = #tpu.dot_dimension_numbers<[1], [0], [0], [1], [0, 0, 1, 1], [], []>} : vector<32x4xf32>, vector<4x512xf32>, vector<32x512xf32> -> vector<32x512xf32>
    %180 = arith.index_cast %c4_i32 : i32 to index
    %c0_63 = arith.constant 0 : index
    %c0_64 = arith.constant 0 : index
    %181 = vector.load %arg2[%180, %c0_63, %c0_64] : memref<6x32x512xf32, #tpu.memory_space<vmem>>, vector<1x32x512xf32>
    %182 = vector.shape_cast %181 : vector<1x32x512xf32> to vector<32x512xf32>
    %183 = arith.addf %179, %182 : vector<32x512xf32>
    %184 = arith.negf %183 : vector<32x512xf32>
    %185 = math.exp %184 : vector<32x512xf32>
    %cst_65 = arith.constant 1.000000e+00 : f32
    %186 = vector.broadcast %cst_65 : f32 to vector<32x512xf32>
    %187 = arith.addf %186, %185 : vector<32x512xf32>
    %188 = arith.divf %186, %187 : vector<32x512xf32>
    %189 = arith.mulf %183, %188 : vector<32x512xf32>
    %cst_66 = arith.constant 3.000000e+00 : f32
    %190 = vector.broadcast %cst_66 : f32 to vector<32x512xf32>
    %191 = arith.mulf %190, %189 : vector<32x512xf32>
    %192 = arith.index_cast %c4_i32 : i32 to index
    %c0_67 = arith.constant 0 : index
    %c0_68 = arith.constant 0 : index
    %193 = vector.load %arg3[%192, %c0_67, %c0_68] : memref<6x32x512xf32, #tpu.memory_space<vmem>>, vector<1x32x512xf32>
    %194 = vector.shape_cast %193 : vector<1x32x512xf32> to vector<32x512xf32>
    %195 = arith.addf %179, %194 : vector<32x512xf32>
    %196 = arith.negf %195 : vector<32x512xf32>
    %197 = math.exp %196 : vector<32x512xf32>
    %cst_69 = arith.constant 1.000000e+00 : f32
    %198 = vector.broadcast %cst_69 : f32 to vector<32x512xf32>
    %199 = arith.addf %198, %197 : vector<32x512xf32>
    %200 = arith.divf %198, %199 : vector<32x512xf32>
    %201 = arith.mulf %195, %200 : vector<32x512xf32>
    %cst_70 = arith.constant 2.000000e+00 : f32
    %202 = vector.broadcast %cst_70 : f32 to vector<32x512xf32>
    %203 = arith.mulf %202, %201 : vector<32x512xf32>
    %204 = arith.subf %191, %203 : vector<32x512xf32>
    %cst_71 = arith.constant dense<0.000000e+00> : vector<4x512xf32>
    %205 = tpu.matmul %1, %204, %cst_71 {dimension_numbers = #tpu.dot_dimension_numbers<[1], [0], [0], [1], [0, 0, 1, 1], [], []>} : vector<4x32xf32>, vector<32x512xf32>, vector<4x512xf32> -> vector<4x512xf32>
    %206 = arith.index_cast %c4_i32 : i32 to index
    %c0_72 = arith.constant 0 : index
    %207 = memref.load %arg0[%206, %c0_72] : memref<6x3xf32, #tpu.memory_space<smem>>
    %208 = arith.index_cast %c4_i32 : i32 to index
    %c1_73 = arith.constant 1 : index
    %209 = memref.load %arg0[%208, %c1_73] : memref<6x3xf32, #tpu.memory_space<smem>>
    %210 = arith.index_cast %c4_i32 : i32 to index
    %c2_74 = arith.constant 2 : index
    %211 = memref.load %arg0[%210, %c2_74] : memref<6x3xf32, #tpu.memory_space<smem>>
    %212 = vector.broadcast %207 : f32 to vector<4x512xf32>
    %213 = arith.mulf %212, %178 : vector<4x512xf32>
    %214 = vector.broadcast %209 : f32 to vector<4x512xf32>
    %215 = arith.mulf %214, %205 : vector<4x512xf32>
    %216 = arith.subf %213, %215 : vector<4x512xf32>
    %217 = arith.index_cast %c4_i32 : i32 to index
    %c0_75 = arith.constant 0 : index
    %c0_76 = arith.constant 0 : index
    %218 = vector.load %arg6[%217, %c0_75, %c0_76] : memref<6x4x512xf32, #tpu.memory_space<vmem>>, vector<1x4x512xf32>
    %219 = vector.shape_cast %218 : vector<1x4x512xf32> to vector<4x512xf32>
    %220 = vector.broadcast %211 : f32 to vector<4x512xf32>
    %221 = arith.mulf %220, %219 : vector<4x512xf32>
    %222 = arith.addf %216, %221 : vector<4x512xf32>
    %c5_i32 = arith.constant 5 : i32
    %cst_77 = arith.constant dense<0.000000e+00> : vector<32x512xf32>
    %223 = tpu.matmul %0, %222, %cst_77 {dimension_numbers = #tpu.dot_dimension_numbers<[1], [0], [0], [1], [0, 0, 1, 1], [], []>} : vector<32x4xf32>, vector<4x512xf32>, vector<32x512xf32> -> vector<32x512xf32>
    %224 = arith.index_cast %c5_i32 : i32 to index
    %c0_78 = arith.constant 0 : index
    %c0_79 = arith.constant 0 : index
    %225 = vector.load %arg2[%224, %c0_78, %c0_79] : memref<6x32x512xf32, #tpu.memory_space<vmem>>, vector<1x32x512xf32>
    %226 = vector.shape_cast %225 : vector<1x32x512xf32> to vector<32x512xf32>
    %227 = arith.addf %223, %226 : vector<32x512xf32>
    %228 = arith.negf %227 : vector<32x512xf32>
    %229 = math.exp %228 : vector<32x512xf32>
    %cst_80 = arith.constant 1.000000e+00 : f32
    %230 = vector.broadcast %cst_80 : f32 to vector<32x512xf32>
    %231 = arith.addf %230, %229 : vector<32x512xf32>
    %232 = arith.divf %230, %231 : vector<32x512xf32>
    %233 = arith.mulf %227, %232 : vector<32x512xf32>
    %cst_81 = arith.constant 3.000000e+00 : f32
    %234 = vector.broadcast %cst_81 : f32 to vector<32x512xf32>
    %235 = arith.mulf %234, %233 : vector<32x512xf32>
    %236 = arith.index_cast %c5_i32 : i32 to index
    %c0_82 = arith.constant 0 : index
    %c0_83 = arith.constant 0 : index
    %237 = vector.load %arg3[%236, %c0_82, %c0_83] : memref<6x32x512xf32, #tpu.memory_space<vmem>>, vector<1x32x512xf32>
    %238 = vector.shape_cast %237 : vector<1x32x512xf32> to vector<32x512xf32>
    %239 = arith.addf %223, %238 : vector<32x512xf32>
    %240 = arith.negf %239 : vector<32x512xf32>
    %241 = math.exp %240 : vector<32x512xf32>
    %cst_84 = arith.constant 1.000000e+00 : f32
    %242 = vector.broadcast %cst_84 : f32 to vector<32x512xf32>
    %243 = arith.addf %242, %241 : vector<32x512xf32>
    %244 = arith.divf %242, %243 : vector<32x512xf32>
    %245 = arith.mulf %239, %244 : vector<32x512xf32>
    %cst_85 = arith.constant 2.000000e+00 : f32
    %246 = vector.broadcast %cst_85 : f32 to vector<32x512xf32>
    %247 = arith.mulf %246, %245 : vector<32x512xf32>
    %248 = arith.subf %235, %247 : vector<32x512xf32>
    %cst_86 = arith.constant dense<0.000000e+00> : vector<4x512xf32>
    %249 = tpu.matmul %1, %248, %cst_86 {dimension_numbers = #tpu.dot_dimension_numbers<[1], [0], [0], [1], [0, 0, 1, 1], [], []>} : vector<4x32xf32>, vector<32x512xf32>, vector<4x512xf32> -> vector<4x512xf32>
    %250 = arith.index_cast %c5_i32 : i32 to index
    %c0_87 = arith.constant 0 : index
    %251 = memref.load %arg0[%250, %c0_87] : memref<6x3xf32, #tpu.memory_space<smem>>
    %252 = arith.index_cast %c5_i32 : i32 to index
    %c1_88 = arith.constant 1 : index
    %253 = memref.load %arg0[%252, %c1_88] : memref<6x3xf32, #tpu.memory_space<smem>>
    %254 = arith.index_cast %c5_i32 : i32 to index
    %c2_89 = arith.constant 2 : index
    %255 = memref.load %arg0[%254, %c2_89] : memref<6x3xf32, #tpu.memory_space<smem>>
    %256 = vector.broadcast %251 : f32 to vector<4x512xf32>
    %257 = arith.mulf %256, %222 : vector<4x512xf32>
    %258 = vector.broadcast %253 : f32 to vector<4x512xf32>
    %259 = arith.mulf %258, %249 : vector<4x512xf32>
    %260 = arith.subf %257, %259 : vector<4x512xf32>
    %261 = arith.index_cast %c5_i32 : i32 to index
    %c0_90 = arith.constant 0 : index
    %c0_91 = arith.constant 0 : index
    %262 = vector.load %arg6[%261, %c0_90, %c0_91] : memref<6x4x512xf32, #tpu.memory_space<vmem>>, vector<1x4x512xf32>
    %263 = vector.shape_cast %262 : vector<1x4x512xf32> to vector<4x512xf32>
    %264 = vector.broadcast %255 : f32 to vector<4x512xf32>
    %265 = arith.mulf %264, %263 : vector<4x512xf32>
    %266 = arith.addf %260, %265 : vector<4x512xf32>
    %c6_i32 = arith.constant 6 : i32
    %cst_92 = arith.constant -1.000000e+00 : f32
    %cst_93 = arith.constant 1.000000e+00 : f32
    %267 = vector.broadcast %cst_92 : f32 to vector<4x512xf32>
    %268 = arith.maximumf %267, %266 : vector<4x512xf32>
    %269 = vector.broadcast %cst_93 : f32 to vector<4x512xf32>
    %270 = arith.minimumf %269, %268 : vector<4x512xf32>
    %cst_94 = arith.constant 5.000000e-01 : f32
    %271 = vector.broadcast %cst_94 : f32 to vector<4x512xf32>
    %272 = arith.mulf %270, %271 : vector<4x512xf32>
    %cst_95 = arith.constant 5.000000e-01 : f32
    %273 = vector.broadcast %cst_95 : f32 to vector<4x512xf32>
    %274 = arith.addf %272, %273 : vector<4x512xf32>
    %c0_96 = arith.constant 0 : index
    %c0_97 = arith.constant 0 : index
    %275 = vector.load %arg7[%c0_96, %c0_97] : memref<4x512xf32, #tpu.memory_space<vmem>>, vector<4x512xf32>
    tpu.vector_store %arg7[%c0_96, %c0_97], %274 {strides = array<i32>} : memref<4x512xf32, #tpu.memory_space<vmem>>, vector<4x512xf32>,
    return
  }
}

</mosaic_0001>

<bundles_post_ra>
// kernel: tpu_custom_call.1
= control target key start
LH: loop header
LB: loop body
LE: loop exit
PB: predicated region body
PF: predicated region fallthrough
CT: control target
= control target key end

     0   :  { %12 = vsyncpa [#allocation5], 0  ;;  %s7189_s0 = inlined_call_operand.vmem [shape: f32[6,3], index: 0, kind: input, shape index: {}]   ;;  %s7190_s1 = inlined_call_operand.hbm [shape: f32[4,512], index: 1, kind: input, shape index: {}, may-alias: {1,7}]   ;;  %s7191_s2 = inlined_call_operand.hbm [shape: f32[6,32,512], index: 2, kind: input, shape index: {}]   ;;  %s7192_s3 = inlined_call_operand.hbm [shape: f32[6,32,512], index: 3, kind: input, shape index: {}]   ;;  %s7193_s4 = inlined_call_operand.vmem [shape: f32[32,4], index: 4, kind: input, shape index: {}]   ;;  %s7194_s5 = inlined_call_operand.vmem [shape: f32[4,32], index: 5, kind: input, shape index: {}]   ;;  %s7195_s6 = inlined_call_operand.hbm [shape: f32[6,4,512], index: 6, kind: input, shape index: {}]   ;;  %s7196_s7 = inlined_call_operand.hbm [shape: f32[4,512], index: 7, kind: output, shape index: {}, may-alias: {1,7}]  }
   0x1   :  { %13 = vsyncpa [#allocation3], 0 }
   0x2   :  { %14 = vsyncpa [#allocation8], 0 }
   0x3   :  { %15 = vsyncpa [#allocation11], 0 }
   0x4   :  { %16 = vsyncpa [#allocation4], 0  ;;  %s5545_s24 = smov [#allocation7]   ;;  %s23_s28 = sshll.u32 %s7189_s0, 4  ;;  %s24_s28 = int_to_ptr.vmem [resolvable:$true] %s23_s28 }
   0x5   :  { %s42_s25 = sshll.u32 %s5545_s24, 4  ;;  %s43_s25 = int_to_ptr.vmem [resolvable:$true] %s42_s25 }
   0x6   :  { %s5431_s29 = scalar_lea.vmem %s43_s25, 12288  ;;  %p5436_p1 = scmp.lt.s32.totalorder %s43_s25, %s43_s25 }
   0x7   :  { %p5432_p0 = scmp.ne.s32.totalorder %s43_s25, %s5431_s29  ;;  %p5437_p2 = scmp.lt.s32.totalorder %s5431_s29, %s5431_s29 }
   0x9   :  { %p5438_p3 = por %p5437_p2, %p5436_p1 }
   0xb   :  { %p5439_p4 = pnand %p5438_p3, %p5432_p0 }
   0xd   :  { %5442 = shalt.err (!%p5439_p4)
}
   0xe   :  { %s5546_s30 = smov 512   ;;  %s5547_s8 = smov 32  }
   0xf   :  { %48 = dma.hbm_to_vmem [thread:$0]  %s7191_s2, 12288, %s43_s25, [#allocation8], %s5546_s30, %s5546_s30, %s5547_s8  }
  0x10   :  { %s5443_s11 = scalar_lea.vmem %s24_s28, 128  ;;  %p5448_p6 = scmp.lt.s32.totalorder %s24_s28, %s24_s28 }
  0x11   :  { %p5444_p5 = scmp.ne.s32.totalorder %s24_s28, %s5443_s11  ;;  %p5449_p7 = scmp.lt.s32.totalorder %s5443_s11, %s5443_s11 }
  0x13   :  { %p5450_p8 = por %p5449_p7, %p5448_p6 }
  0x15   :  { %p5451_p9 = pnand %p5450_p8, %p5444_p5 }
  0x17   :  { %5454 = shalt.err (!%p5451_p9)
}
  0x18   :  { %s5548_s0 = smov [#allocation2]   ;;  %s5549_s12 = smov [#allocation6]  }
  0x19   :  { %26 = dma.vmem_to_smem %s24_s28, 128, %s5548_s0, [#allocation5]  }
  0x1a   :  { %s33_s13 = sshll.u32 %s5549_s12, 4  ;;  %s5550_s14 = smov [#allocation9]   ;;  %s34_s13 = int_to_ptr.vmem [resolvable:$true] %s33_s13 }
  0x1b   :  { %s54_s15 = sshll.u32 %s5550_s14, 4  ;;  %s5463_s16 = scalar_lea.vmem %s34_s13, 256  ;;  %s55_s15 = int_to_ptr.vmem [resolvable:$true] %s54_s15 }
  0x1c   :  { %p5464_p10 = scmp.ne.s32.totalorder %s34_s13, %s5463_s16  ;;  %p5468_p11 = scmp.lt.s32.totalorder %s34_s13, %s34_s13 }
  0x1d   :  { %p5469_p12 = scmp.lt.s32.totalorder %s5463_s16, %s5463_s16 }
  0x1f   :  { %p5470_p13 = por %p5469_p12, %p5468_p11 }
  0x21   :  { %p5471_p0 = pnand %p5470_p13, %p5464_p10 }
  0x23   :  { %5474 = shalt.err (!%p5471_p0)
}
  0x24   :  { %36 = dma.hbm_to_vmem [thread:$0]  %s7190_s1, 256, %s34_s13, [#allocation3]  }
  0x25   :  { %s5483_s18 = scalar_lea.vmem %s55_s15, 12288  ;;  %p5488_p2 = scmp.lt.s32.totalorder %s55_s15, %s55_s15 }
  0x26   :  { %p5484_p1 = scmp.ne.s32.totalorder %s55_s15, %s5483_s18  ;;  %p5489_p3 = scmp.lt.s32.totalorder %s5483_s18, %s5483_s18 }
  0x28   :  { %p5490_p4 = por %p5489_p3, %p5488_p2 }
  0x2a   :  { %p5491_p5 = pnand %p5490_p4, %p5484_p1 }
  0x2c   :  { %5494 = shalt.err (!%p5491_p5)
}
  0x2d   :  { %60 = dma.hbm_to_vmem [thread:$0]  %s7192_s3, 12288, %s55_s15, [#allocation8], %s5546_s30, %s5546_s30, %s5547_s8  }
  0x2e   :  { %s5551_s21 = smov [#allocation10]  }
  0x2f   :  { %s70_s22 = sshll.u32 %s5551_s21, 4  ;;  %s71_s22 = int_to_ptr.vmem [resolvable:$true] %s70_s22 }
  0x30   :  { %s5503_s23 = scalar_lea.vmem %s71_s22, 1536  ;;  %p5508_p7 = scmp.lt.s32.totalorder %s71_s22, %s71_s22 }
  0x31   :  { %p5504_p6 = scmp.ne.s32.totalorder %s71_s22, %s5503_s23  ;;  %p5509_p8 = scmp.lt.s32.totalorder %s5503_s23, %s5503_s23 }
  0x33   :  { %p5510_p9 = por %p5509_p8, %p5508_p7 }
  0x35   :  { %p5511_p10 = pnand %p5510_p9, %p5504_p6 }
  0x37   :  { %5514 = shalt.err (!%p5511_p10)
}
  0x38   :  { %s5552_s1 = smov 256   ;;  %s5553_s24 = smov 16  }
  0x39   :  { %76 = dma.hbm_to_vmem [thread:$0]  %s7195_s6, 1536, %s71_s22, [#allocation11], %s5552_s1, %s5552_s1, %s5553_s24  }
  0x3a   :  { %5535 = dma.done.wait [#allocation5], 128  }
  0x3b   :  { %5536 = vsyncadd [#allocation5], 4294967168 }
  0x3c   :  { %5537 = dma.done.wait [#allocation3], 256  }
  0x3d   :  { %5538 = vsyncadd [#allocation3], 4294967040 }
  0x3e   :  { %5539 = dma.done.wait [#allocation8], 24576  }
  0x3f   :  { %5540 = vsyncadd [#allocation8], 4294942720 }
  0x40   :  { %5541 = dma.done.wait [#allocation11], 1536  }
  0x41   :  { %5542 = vsyncadd [#allocation11], 4294965760 }
  0x42   :  { %92 = sfence }
  0x43   :  { %v5617_v0 = vld [vmem:[#allocation6] sm:$0xff]  ;;  %vm117_vm0 = vcmask 1043456   ;;  %v5619_v1 = vld [vmem:[#allocation6 + $0x8] sm:$0xff]  ;;  %v7197_v4 = vmov 0.0   ;;  %vm104_vm1 = vcmask 31744   ;;  %v5658_v7 = vld [vmem:[%s7193_s4 + $0x10] sm:$0xff] }
  0x44   :  { %7251 = vst [vmem:[#allocation18_spill] sm:$0xff] %v5617_v0  ;;  %7252 = vst [vmem:[#allocation19_spill] sm:$0xff] %v5619_v1  ;;  %v102_v2 = vcombine.high %v5617_v0, %v5617_v0  ;;  %v103_v3 = vcombine.high %v5619_v1, %v5619_v1  ;;  %190 = vmatprep.mubr.f32.mxu0 %v7197_v4  ;;  %279 = vmatprep.mubr.f32.mxu1 %v7197_v4  ;;  %v5630_v5 = vld [vmem:[%s7193_s4] sm:$0xff]  ;;  %v5647_v6 = vld [vmem:[%s7193_s4 + $0x8] sm:$0xff]  ;;  %vm640_vm2 = vcmask 261120   ;;  %s786_s0 = sld [smem:[#allocation2]] }
  0x45   :  { %7253 = vst [vmem:[#allocation20_spill] sm:$0xff] %v5630_v5  ;;  %7254 = vst [vmem:[#allocation21_spill] sm:$0xff] %v5647_v6  ;;  %v5669_v8 = vld [vmem:[%s7193_s4 + $0x18] sm:$0xff]  ;;  %v304_v9 = vld [vmem:[#allocation7] sm:$0xff]  ;;  %s4383_s12 = sld [smem:[#allocation2 + $0x1]]  ;;  %s5555_s18 = smov [#allocation12]  }
  0x46   :  { %4337 = vmatprep.subr.msk.mxu0 %vm117_vm0, %v102_v2  ;;  %4343 = vmatprep.subr.msk.mxu1 %vm117_vm0, %v103_v3  ;;  %7255 = vst [vmem:[#allocation22_spill] sm:$0xff] %v5658_v7  ;;  %7256 = vst [vmem:[#allocation23_spill] sm:$0xff] %v5669_v8  ;;  %v464_v10 = vld [vmem:[#allocation9] sm:$0xff]  ;;  %v306_v11 = vld [vmem:[#allocation7 + $0x10] sm:$0xff]  ;;  %s4384_s13 = sld [smem:[#allocation2 + $0x2]]  ;;  %s4325_s19 = sshll.u32 %s5555_s18, 4  ;;  %s4326_s19 = int_to_ptr.vmem [resolvable:$true] %s4325_s19 }
  0x47   :  { %4338 = vmatpush1.msk.msra.mxu0 %vm117_vm0, %v5617_v0  ;;  %4344 = vmatpush1.msk.msra.mxu1 %vm117_vm0, %v5619_v1  ;;  %v466_v12 = vld [vmem:[#allocation9 + $0x10] sm:$0xff]  ;;  %v305_v15 = vld [vmem:[#allocation7 + $0x8] sm:$0xff]  ;;  %v307_v21 = vld [vmem:[#allocation7 + $0x18] sm:$0xff]  ;;  %s4432_s14 = sld [smem:[#allocation2 + $0x81]]  ;;  %s5515_s20 = scalar_lea.vmem %s4326_s19, 256 }
  0x48   :  { %4339 = vmatmul.mubr.msk.f32.vlgmr.msra.gmra.mxu0 %vm104_vm1, %v5630_v5  ;;  %4345 = vmatmul.mubr.msk.f32.vlgmr.msra.gmra.mxu1 %vm104_vm1, %v5630_v5  ;;  %v465_v20 = vld [vmem:[#allocation9 + $0x8] sm:$0xff]  ;;  %v467_v22 = vld [vmem:[#allocation9 + $0x18] sm:$0xff]  ;;  %v308_v25 = vld [vmem:[#allocation7 + $0x20] sm:$0xff]  ;;  %s4431_s15 = sld [smem:[#allocation2 + $0x80]]  ;;  %p5516_p11 = scmp.ne.s32.totalorder %s4326_s19, %s5515_s20 }
  0x49   :  { %196 = vmatprep.mubr.f32.mxu0 %v7197_v4  ;;  %285 = vmatprep.mubr.f32.mxu1 %v7197_v4  ;;  %v468_v26 = vld [vmem:[#allocation9 + $0x20] sm:$0xff]  ;;  %v310_v37 = vld [vmem:[#allocation7 + $0x30] sm:$0xff]  ;;  %v309_v44 = vld [vmem:[#allocation7 + $0x28] sm:$0xff]  ;;  %s4433_s16 = sld [smem:[#allocation2 + $0x82]]  ;;  %p5520_p12 = scmp.lt.s32.totalorder %s4326_s19, %s4326_s19 }
  0x4a   :  { %v470_v40 = vld [vmem:[#allocation9 + $0x30] sm:$0xff]  ;;  %v469_v47 = vld [vmem:[#allocation9 + $0x28] sm:$0xff]  ;;  %v311_v51 = vld [vmem:[#allocation7 + $0x38] sm:$0xff]  ;;  %s4481_s25 = sld [smem:[#allocation2 + $0x101]]  ;;  %p5521_p13 = scmp.lt.s32.totalorder %s5515_s20, %s5515_s20 }
  0x4b   :  { %v471_v54 = vld [vmem:[#allocation9 + $0x38] sm:$0xff]  ;;  %s4480_s26 = sld [smem:[#allocation2 + $0x100]] }
  0x4c   :  { %4340 = vmatmul.mubr.msk.f32.gmra.mxu0 %vm104_vm1, %v5647_v6  ;;  %4346 = vmatmul.mubr.msk.f32.gmra.mxu1 %vm104_vm1, %v5647_v6  ;;  %s4482_s3 = sld [smem:[#allocation2 + $0x102]]  ;;  %p5522_p0 = por %p5521_p13, %p5520_p12 }
  0x4d   :  { %202 = vmatprep.mubr.f32.mxu0 %v7197_v4  ;;  %291 = vmatprep.mubr.f32.mxu1 %v7197_v4  ;;  %s4530_s6 = sld [smem:[#allocation2 + $0x181]] }
  0x4e   :  { %s4529_s27 = sld [smem:[#allocation2 + $0x180]]  ;;  %p5523_p1 = pnand %p5522_p0, %p5516_p11 }
  0x4f   :  { %s4531_s28 = sld [smem:[#allocation2 + $0x182]] }
  0x50   :  { %4341 = vmatmul.mubr.msk.f32.gmra.mxu0 %vm104_vm1, %v5658_v7  ;;  %4347 = vmatmul.mubr.msk.f32.gmra.mxu1 %vm104_vm1, %v5658_v7  ;;  %s4627_s2 = sld [smem:[#allocation2 + $0x280]] }
  0x51   :  { %208 = vmatprep.mubr.f32.mxu0 %v7197_v4  ;;  %297 = vmatprep.mubr.f32.mxu1 %v7197_v4  ;;  %s4629_s17 = sld [smem:[#allocation2 + $0x282]] }
  0x54   :  { %4342 = vmatmul.mubr.msk.f32.gmra.mxu0 %vm104_vm1, %v5669_v8  ;;  %4348 = vmatmul.mubr.msk.f32.gmra.mxu1 %vm104_vm1, %v5669_v8 }
  0x55   :  { %708 = vmatprep.mubr.f32.mxu0 %v7197_v4  ;;  %779 = vmatprep.mubr.f32.mxu1 %v7197_v4 }
 0x108   :  { %v192_v13 = vpop.f32.mrf.mxu0  ;;  %v281_v14 = vpop.f32.mrf.mxu1 }
 0x109   :  { %v5677_v16 = vadd.f32 %v304_v9, %v192_v13  ;;  %v5679_v17 = vadd.f32 %v464_v10, %v192_v13  ;;  %v5681_v18 = vadd.f32 %v306_v11, %v281_v14  ;;  %v5683_v19 = vadd.f32 %v466_v12, %v281_v14 }
 0x10a   :  { %v194_v23 = vpop.f32.mrf.mxu0  ;;  %v283_v24 = vpop.f32.mrf.mxu1 }
 0x10b   :  { %v4349_v27 = vmul.f32 -1.442695, %v5677_v16  ;;  %v4365_v28 = vmul.f32 -1.442695, %v5679_v17  ;;  %v4351_v29 = vmul.f32 -1.442695, %v5681_v18  ;;  %v5688_v30 = vadd.f32 %v305_v15, %v194_v23 }
 0x10c   :  { %v4367_v31 = vmul.f32 -1.442695, %v5683_v19  ;;  %v5691_v32 = vadd.f32 %v465_v20, %v194_v23  ;;  %v5693_v33 = vadd.f32 %v307_v21, %v283_v24  ;;  %v5695_v34 = vadd.f32 %v467_v22, %v283_v24  ;;  %v198_v35 = vpop.f32.mrf.mxu0  ;;  %v287_v36 = vpop.f32.mrf.mxu1 }
 0x10d   :  { %4645 = vpow2.f32 %v4349_v27  ;;  %v4350_v38 = vmul.f32 -1.442695, %v5688_v30  ;;  %v5698_v39 = vadd.f32 %v308_v25, %v198_v35  ;;  %v5701_v42 = vadd.f32 %v468_v26, %v198_v35 }
 0x10e   :  { %4647 = vpow2.f32 %v4365_v28  ;;  %v4366_v41 = vmul.f32 -1.442695, %v5691_v32  ;;  %v200_v43 = vpop.f32.mrf.mxu0  ;;  %v4352_v45 = vmul.f32 -1.442695, %v5693_v33  ;;  %v5704_v46 = vadd.f32 %v310_v37, %v287_v36  ;;  %v289_v50 = vpop.f32.mrf.mxu1  ;;  %v472_v37 = vld [vmem:[#allocation9 + $0x40] sm:$0xff] }
 0x10f   :  { %4649 = vpow2.f32 %v4351_v29  ;;  %v4368_v48 = vmul.f32 -1.442695, %v5695_v34  ;;  %v5707_v49 = vadd.f32 %v470_v40, %v287_v36  ;;  %v4353_v52 = vmul.f32 -1.442695, %v5698_v39 }
 0x110   :  { %4651 = vpow2.f32 %v4367_v31  ;;  %v5710_v53 = vadd.f32 %v309_v44, %v200_v43  ;;  %v4369_v55 = vmul.f32 -1.442695, %v5701_v42  ;;  %v5713_v56 = vadd.f32 %v469_v47, %v200_v43  ;;  %v204_v29 = vpop.f32.mrf.mxu0  ;;  %v312_v31 = vld [vmem:[#allocation7 + $0x40] sm:$0xff]  ;;  %v314_v43 = vld [vmem:[#allocation7 + $0x50] sm:$0xff] }
 0x111   :  { %4653 = vpow2.f32 %v4350_v38  ;;  %v4355_v57 = vmul.f32 -1.442695, %v5704_v46  ;;  %v5716_v58 = vadd.f32 %v311_v51, %v289_v50  ;;  %v4371_v59 = vmul.f32 -1.442695, %v5707_v49 }
 0x112   :  { %4655 = vpow2.f32 %v4366_v41  ;;  %v5719_v60 = vadd.f32 %v471_v54, %v289_v50  ;;  %v4354_v61 = vmul.f32 -1.442695, %v5710_v53  ;;  %v4370_v62 = vmul.f32 -1.442695, %v5713_v56  ;;  %v293_v41 = vpop.f32.mrf.mxu1  ;;  %v206_v54 = vpop.f32.mrf.mxu0 }
 0x113   :  { %4657 = vpow2.f32 %v4352_v45  ;;  %v4356_v63 = vmul.f32 -1.442695, %v5716_v58  ;;  %v5725_v47 = vadd.f32 %v312_v31, %v204_v29 }
 0x114   :  { %4659 = vpow2.f32 %v4368_v48  ;;  %v4372_v2 = vmul.f32 -1.442695, %v5719_v60  ;;  %v474_v48 = vld [vmem:[#allocation9 + $0x50] sm:$0xff] }
 0x115   :  { %4661 = vpow2.f32 %v4353_v52  ;;  %v5727_v52 = vadd.f32 %v472_v37, %v204_v29  ;;  %v476_v29 = vld [vmem:[#allocation9 + $0x60] sm:$0xff] }
 0x116   :  { %4663 = vpow2.f32 %v4369_v55  ;;  %v313_v55 = vld [vmem:[#allocation7 + $0x48] sm:$0xff] }
 0x117   :  { %4665 = vpow2.f32 %v4355_v57 }
 0x118   :  { %4667 = vpow2.f32 %v4371_v59 }
 0x119   :  { %4669 = vpow2.f32 %v4354_v61  ;;  %v5729_v61 = vadd.f32 %v314_v43, %v293_v41 }
 0x11a   :  { %v4646_v3 = vpop.eup %4645  ;;  %4671 = vpow2.f32 %v4370_v62  ;;  %v473_v62 = vld [vmem:[#allocation9 + $0x48] sm:$0xff] }
 0x11b   :  { %v4648_v9 = vpop.eup %4647  ;;  %v384_v10 = vadd.f32 1.0, %v4646_v3  ;;  %4673 = vpow2.f32 %v4356_v63  ;;  %v5731_v3 = vadd.f32 %v474_v48, %v293_v41 }
 0x11c   :  { %v4650_v11 = vpop.eup %4649  ;;  %v544_v12 = vadd.f32 1.0, %v4648_v9  ;;  %4675 = vpow2.f32 %v4372_v2  ;;  %v295_v9 = vpop.f32.mrf.mxu1 }
 0x11d   :  { %v4652_v13 = vpop.eup %4651  ;;  %4677 = vrcp.f32 %v384_v10  ;;  %v386_v14 = vadd.f32 1.0, %v4650_v11  ;;  %v315_v10 = vld [vmem:[#allocation7 + $0x58] sm:$0xff] }
 0x11e   :  { %v4654_v15 = vpop.eup %4653  ;;  %4679 = vrcp.f32 %v544_v12  ;;  %v546_v20 = vadd.f32 1.0, %v4652_v13  ;;  %v4357_v13 = vmul.f32 -1.442695, %v5725_v47  ;;  %v299_v37 = vpop.f32.mrf.mxu1 }
 0x11f   :  { %v4656_v21 = vpop.eup %4655  ;;  %4681 = vrcp.f32 %v386_v14  ;;  %v385_v22 = vadd.f32 1.0, %v4654_v15  ;;  %v5734_v14 = vadd.f32 %v313_v55, %v206_v54  ;;  %v475_v15 = vld [vmem:[#allocation9 + $0x58] sm:$0xff] }
 0x120   :  { %v4658_v23 = vpop.eup %4657  ;;  %4683 = vrcp.f32 %v546_v20  ;;  %v545_v24 = vadd.f32 1.0, %v4656_v21 }
 0x121   :  { %v4660_v25 = vpop.eup %4659  ;;  %4685 = vrcp.f32 %v385_v22  ;;  %v387_v26 = vadd.f32 1.0, %v4658_v23  ;;  %v4373_v22 = vmul.f32 -1.442695, %v5727_v52  ;;  %v5739_v23 = vadd.f32 %v473_v62, %v206_v54  ;;  %v317_v54 = vld [vmem:[#allocation7 + $0x68] sm:$0xff] }
 0x122   :  { %v4662_v27 = vpop.eup %4661  ;;  %4687 = vrcp.f32 %v545_v24  ;;  %v547_v28 = vadd.f32 1.0, %v4660_v25  ;;  %v210_v24 = vpop.f32.mrf.mxu0  ;;  %v316_v25 = vld [vmem:[#allocation7 + $0x60] sm:$0xff]  ;;  %v4358_v41 = vmul.f32 -1.442695, %v5734_v14  ;;  %v477_v62 = vld [vmem:[#allocation9 + $0x68] sm:$0xff] }
 0x123   :  { %v4664_v35 = vpop.eup %4663  ;;  %4689 = vrcp.f32 %v387_v26  ;;  %v388_v36 = vadd.f32 1.0, %v4662_v27  ;;  %v4359_v27 = vmul.f32 -1.442695, %v5729_v61  ;;  %v5754_v43 = vadd.f32 %v316_v25, %v210_v24 }
 0x124   :  { %v4666_v38 = vpop.eup %4665  ;;  %4691 = vrcp.f32 %v547_v28  ;;  %v548_v40 = vadd.f32 1.0, %v4664_v35  ;;  %v5744_v28 = vadd.f32 %v315_v10, %v295_v9  ;;  %v4375_v35 = vmul.f32 -1.442695, %v5731_v3  ;;  %v301_v10 = vpop.f32.mrf.mxu1 }
 0x125   :  { %v4668_v44 = vpop.eup %4667  ;;  %4693 = vrcp.f32 %v388_v36  ;;  %v390_v45 = vadd.f32 1.0, %v4666_v38  ;;  %v5749_v36 = vadd.f32 %v475_v15, %v295_v9  ;;  %v318_v38 = vld [vmem:[#allocation7 + $0x70] sm:$0xff]  ;;  %v4374_v48 = vmul.f32 -1.442695, %v5739_v23 }
 0x126   :  { %v4670_v50 = vpop.eup %4669  ;;  %4695 = vrcp.f32 %v548_v40  ;;  %v550_v51 = vadd.f32 1.0, %v4668_v44  ;;  %v478_v44 = vld [vmem:[#allocation9 + $0x70] sm:$0xff] }
 0x127   :  { %v4672_v57 = vpop.eup %4671  ;;  %4697 = vrcp.f32 %v390_v45  ;;  %v389_v59 = vadd.f32 1.0, %v4670_v50  ;;  %v5759_v50 = vadd.f32 %v476_v29, %v210_v24  ;;  %v5769_v9 = vadd.f32 %v478_v44, %v299_v37 }
 0x128   :  { %v4674_v63 = vpop.eup %4673  ;;  %4699 = vrcp.f32 %v550_v51  ;;  %v549_v2 = vadd.f32 1.0, %v4672_v57  ;;  %v212_v51 = vpop.f32.mrf.mxu0  ;;  %v4360_v57 = vmul.f32 -1.442695, %v5744_v28 }
 0x129   :  { %v4676_v11 = vpop.eup %4675  ;;  %4701 = vrcp.f32 %v389_v59  ;;  %v391_v12 = vadd.f32 1.0, %v4674_v63  ;;  %v5764_v59 = vadd.f32 %v318_v38, %v299_v37  ;;  %v5774_v15 = vadd.f32 %v317_v54, %v212_v51 }
 0x12a   :  { %v5736_v20 = vpop.eup %4677  ;;  %4703 = vrcp.f32 %v549_v2  ;;  %v551_v21 = vadd.f32 1.0, %v4676_v11  ;;  %v4376_v2 = vmul.f32 -1.442695, %v5749_v36  ;;  %v319_v11 = vld [vmem:[#allocation7 + $0x78] sm:$0xff]  ;;  %v4377_v24 = vmul.f32 -1.442695, %v5759_v50 }
 0x12b   :  { %v5741_v26 = vpop.eup %4679  ;;  %4705 = vrcp.f32 %v391_v12  ;;  %v5779_v25 = vadd.f32 %v477_v62, %v212_v51  ;;  %v4363_v29 = vmul.f32 -1.442695, %v5764_v59  ;;  %v4379_v38 = vmul.f32 -1.442695, %v5769_v9 }
 0x12c   :  { %v5746_v31 = vpop.eup %4681  ;;  %4707 = vrcp.f32 %v551_v21  ;;  %v479_v21 = vld [vmem:[#allocation9 + $0x78] sm:$0xff] }
 0x12d   :  { %v5751_v40 = vpop.eup %4683  ;;  %4709 = vpow2.f32 %v4357_v13  ;;  %v4361_v13 = vmul.f32 -1.442695, %v5754_v43  ;;  %v4378_v54 = vmul.f32 -1.442695, %v5779_v25 }
 0x12e   :  { %v5756_v45 = vpop.eup %4685  ;;  %4711 = vpow2.f32 %v4373_v22 }
 0x12f   :  { %v5761_v55 = vpop.eup %4687  ;;  %4713 = vpow2.f32 %v4359_v27 }
 0x130   :  { %v5766_v63 = vpop.eup %4689  ;;  %4715 = vpow2.f32 %v4375_v35  ;;  %v5784_v35 = vadd.f32 %v319_v11, %v301_v10 }
 0x131   :  { %v5771_v12 = vpop.eup %4691  ;;  %4717 = vpow2.f32 %v4358_v41  ;;  %v5789_v41 = vadd.f32 %v479_v21, %v301_v10 }
 0x132   :  { %v5776_v22 = vpop.eup %4693  ;;  %4719 = vpow2.f32 %v4374_v48  ;;  %v4362_v48 = vmul.f32 -1.442695, %v5774_v15  ;;  %v4364_v62 = vmul.f32 -1.442695, %v5784_v35 }
 0x133   :  { %v5781_v27 = vpop.eup %4695  ;;  %4721 = vpow2.f32 %v4360_v57  ;;  %7257 = vst [vmem:[#allocation24_spill] sm:$0xff] %v5789_v41  ;;  %v4380_v10 = vmul.f32 -1.442695, %v5789_v41 }
 0x134   :  { %v5786_v37 = vpop.eup %4697  ;;  %4723 = vpow2.f32 %v4376_v2 }
 0x135   :  { %v5791_v44 = vpop.eup %4699  ;;  %4725 = vpow2.f32 %v4361_v13 }
 0x136   :  { %v5794_v51 = vpop.eup %4701  ;;  %4727 = vpow2.f32 %v4377_v24 }
 0x137   :  { %v5797_v57 = vpop.eup %4703  ;;  %4729 = vpow2.f32 %v4363_v29 }
 0x138   :  { %v5800_v2 = vpop.eup %4705  ;;  %4731 = vpow2.f32 %v4379_v38 }
 0x139   :  { %v5803_v11 = vpop.eup %4707  ;;  %4733 = vpow2.f32 %v4362_v48 }
 0x13a   :  { %v4710_v13 = vpop.eup %4709  ;;  %4735 = vpow2.f32 %v4378_v54 }
 0x13b   :  { %v4712_v21 = vpop.eup %4711  ;;  %v392_v4 = vadd.f32 1.0, %v4710_v13  ;;  %4737 = vpow2.f32 %v4364_v62 }
 0x13c   :  { %v4714_v24 = vpop.eup %4713  ;;  %v552_v8 = vadd.f32 1.0, %v4712_v21  ;;  %4739 = vpow2.f32 %v4380_v10 }
 0x13d   :  { %v4716_v7 = vpop.eup %4715  ;;  %4741 = vrcp.f32 %v392_v4  ;;  %v394_v29 = vadd.f32 1.0, %v4714_v24 }
 0x13e   :  { %v4718_v6 = vpop.eup %4717  ;;  %4743 = vrcp.f32 %v552_v8  ;;  %v554_v5 = vadd.f32 1.0, %v4716_v7 }
 0x13f   :  { %v4720_v38 = vpop.eup %4719  ;;  %4745 = vrcp.f32 %v394_v29  ;;  %v393_v1 = vadd.f32 1.0, %v4718_v6 }
 0x140   :  { %v4722_v0 = vpop.eup %4721  ;;  %4747 = vrcp.f32 %v554_v5  ;;  %v553_v48 = vadd.f32 1.0, %v4720_v38 }
 0x141   :  { %v4724_v41 = vpop.eup %4723  ;;  %4749 = vrcp.f32 %v393_v1  ;;  %v395_v54 = vadd.f32 1.0, %v4722_v0 }
 0x142   :  { %v4726_v13 = vpop.eup %4725  ;;  %4751 = vrcp.f32 %v553_v48  ;;  %v555_v62 = vadd.f32 1.0, %v4724_v41 }
 0x143   :  { %v4728_v21 = vpop.eup %4727  ;;  %4753 = vrcp.f32 %v395_v54  ;;  %v396_v10 = vadd.f32 1.0, %v4726_v13 }
 0x144   :  { %v4730_v4 = vpop.eup %4729  ;;  %4755 = vrcp.f32 %v555_v62  ;;  %v556_v24 = vadd.f32 1.0, %v4728_v21 }
 0x145   :  { %v4732_v8 = vpop.eup %4731  ;;  %4757 = vrcp.f32 %v396_v10  ;;  %v398_v7 = vadd.f32 1.0, %v4730_v4  ;;  %v432_v4 = vmul.f32 %v5736_v20, %v5677_v16 }
 0x146   :  { %v4734_v29 = vpop.eup %4733  ;;  %4759 = vrcp.f32 %v556_v24  ;;  %v558_v6 = vadd.f32 1.0, %v4732_v8  ;;  %v592_v24 = vmul.f32 %v5741_v26, %v5679_v17  ;;  %v5823_v17 = vmul.f32 %v5746_v31, %v5681_v18 }
 0x147   :  { %v4736_v5 = vpop.eup %4735  ;;  %4761 = vrcp.f32 %v398_v7  ;;  %v397_v38 = vadd.f32 1.0, %v4734_v29  ;;  %v433_v7 = vmul.f32 %v5756_v45, %v5688_v30  ;;  %v5817_v16 = vmul.f32 3.0, %v432_v4  ;;  %v7258_v4 = vld [vmem:[#allocation24_spill] sm:$0xff] }
 0x148   :  { %v4738_v1 = vpop.eup %4737  ;;  %4763 = vrcp.f32 %v558_v6  ;;  %v557_v0 = vadd.f32 1.0, %v4736_v5  ;;  %v593_v6 = vmul.f32 %v5761_v55, %v5691_v32  ;;  %v436_v5 = vmul.f32 %v5776_v22, %v5698_v39 }
 0x149   :  { %v4740_v48 = vpop.eup %4739  ;;  %4765 = vrcp.f32 %v397_v38  ;;  %v399_v41 = vadd.f32 1.0, %v4738_v1  ;;  %v437_v1 = vmul.f32 %v5794_v51, %v5710_v53  ;;  %v5819_v20 = vmul.f32 2.0, %v592_v24 }
 0x14a   :  { %v4742_v54 = vpop.eup %4741  ;;  %4767 = vrcp.f32 %v557_v0  ;;  %v559_v13 = vadd.f32 1.0, %v4740_v48  ;;  %v597_v30 = vmul.f32 %v5797_v57, %v5713_v56  ;;  %v5829_v39 = vmul.f32 %v5751_v40, %v5683_v19 }
 0x14b   :  { %v4744_v62 = vpop.eup %4743  ;;  %4769 = vrcp.f32 %v399_v41  ;;  %v5831_v26 = vmul.f32 3.0, %v433_v7  ;;  %v435_v53 = vmul.f32 %v5766_v63, %v5693_v33  ;;  %v440_v45 = vmul.f32 %v4742_v54, %v5725_v47 }
 0x14c   :  { %v4746_v21 = vpop.eup %4745  ;;  %4771 = vrcp.f32 %v559_v13  ;;  %v5836_v22 = vmul.f32 2.0, %v593_v6  ;;  %v595_v18 = vmul.f32 %v5771_v12, %v5695_v34  ;;  %v5840_v31 = vmul.f32 3.0, %v436_v5 }
 0x14d   :  { %v4748_v10 = vpop.eup %4747  ;;  %v596_v56 = vmul.f32 %v5781_v27, %v5701_v42  ;;  %v438_v40 = vmul.f32 %v5786_v37, %v5704_v46  ;;  %v598_v33 = vmul.f32 %v5791_v44, %v5707_v49  ;;  %v5848_v63 = vmul.f32 3.0, %v437_v1 }
 0x14e   :  { %v4750_v8 = vpop.eup %4749  ;;  %v439_v47 = vmul.f32 %v5800_v2, %v5716_v58  ;;  %v5852_v57 = vmul.f32 2.0, %v597_v30  ;;  %v599_v34 = vmul.f32 %v5803_v11, %v5719_v60  ;;  %v456_v46 = vmul.f32 3.0, %v440_v45 }
 0x14f   :  { %v4752_v29 = vpop.eup %4751  ;;  %v600_v37 = vmul.f32 %v4744_v62, %v5727_v52  ;;  %v441_v49 = vmul.f32 %v4750_v8, %v5734_v14  ;;  %v442_v58 = vmul.f32 %v4746_v21, %v5729_v61  ;;  %v614_v45 = vmul.f32 2.0, %v598_v33 }
 0x150   :  { %v4754_v38 = vpop.eup %4753  ;;  %v601_v44 = vmul.f32 %v4752_v29, %v5739_v23  ;;  %v455_v1 = vmul.f32 3.0, %v439_v47  ;;  %v610_v47 = vmul.f32 2.0, %v5829_v39 }
 0x151   :  { %v4756_v0 = vpop.eup %4755  ;;  %v443_v11 = vmul.f32 %v4754_v38, %v5744_v28  ;;  %v616_v24 = vmul.f32 2.0, %v600_v37  ;;  %v458_v6 = vmul.f32 3.0, %v442_v58 }
 0x152   :  { %v4758_v32 = vpop.eup %4757  ;;  %v603_v52 = vmul.f32 %v4756_v0, %v5749_v36  ;;  %v617_v21 = vmul.f32 2.0, %v601_v44  ;;  %v615_v0 = vmul.f32 2.0, %v599_v34  ;;  %v7261_v44 = vld [vmem:[#allocation18_spill] sm:$0xff] }
 0x153   :  { %v4760_v55 = vpop.eup %4759  ;;  %v444_v42 = vmul.f32 %v4758_v32, %v5754_v43  ;;  %v459_v28 = vmul.f32 3.0, %v443_v11  ;;  %v454_v32 = vmul.f32 3.0, %v438_v40 }
 0x154   :  { %v4762_v19 = vpop.eup %4761  ;;  %v604_v12 = vmul.f32 %v4760_v55, %v5759_v50  ;;  %v602_v50 = vmul.f32 %v4748_v10, %v5731_v3  ;;  %v619_v7 = vmul.f32 2.0, %v603_v52  ;;  %v632_v55 = vsub.f32 %v456_v46, %v616_v24  ;;  %v807_v46 = vld [vmem:[#allocation10] sm:$0xff]  ;;  %v7266_v24 = vld [vmem:[#allocation21_spill] sm:$0xff] }
 0x155   :  { %v4764_v51 = vpop.eup %4763  ;;  %v446_v2 = vmul.f32 %v4762_v19, %v5764_v59  ;;  %v460_v23 = vmul.f32 3.0, %v444_v42  ;;  %v457_v59 = vmul.f32 3.0, %v441_v49  ;;  %v611_v42 = vmul.f32 2.0, %v595_v18 }
 0x156   :  { %v4766_v27 = vpop.eup %4765  ;;  %v606_v41 = vmul.f32 %v4764_v51, %v5769_v9  ;;  %v620_v13 = vmul.f32 2.0, %v604_v12  ;;  %v618_v5 = vmul.f32 2.0, %v602_v50  ;;  %v451_v51 = vmul.f32 3.0, %v435_v53  ;;  %v808_v50 = vld [vmem:[#allocation10 + $0x8] sm:$0xff] }
 0x157   :  { %v4768_v48 = vpop.eup %4767  ;;  %v445_v60 = vmul.f32 %v4766_v27, %v5774_v15  ;;  %v462_v8 = vmul.f32 3.0, %v446_v2  ;;  %v633_v30 = vsub.f32 %v457_v59, %v617_v21  ;;  %v635_v12 = vsub.f32 %v459_v28, %v619_v7  ;;  %v1166_v28 = vld [vmem:[#allocation9 + $0x80] sm:$0xff] }
 0x158   :  { %v4770_v43 = vpop.eup %4769  ;;  %v605_v14 = vmul.f32 %v4768_v48, %v5779_v25  ;;  %v622_v3 = vmul.f32 2.0, %v606_v41  ;;  %v612_v25 = vmul.f32 2.0, %v596_v56  ;;  %v636_v38 = vsub.f32 %v460_v23, %v620_v13  ;;  %v7262_v41 = vld [vmem:[#allocation19_spill] sm:$0xff] }
 0x159   :  { %v4772_v54 = vpop.eup %4771  ;;  %v461_v62 = vmul.f32 3.0, %v445_v60  ;;  %v447_v61 = vmul.f32 %v4770_v43, %v5784_v35  ;;  %v629_v56 = vsub.f32 %v5848_v63, %v5852_v57  ;;  %v450_v27 = vmul.f32 3.0, %v5823_v17  ;;  %v5883_v17 = vld [vmem:[%s7194_s5] sm:$0xf] }
 0x15a   :  { %v621_v9 = vmul.f32 2.0, %v605_v14  ;;  %v607_v15 = vmul.f32 %v4772_v54, %v7258_v4  ;;  %v638_v19 = vsub.f32 %v462_v8, %v622_v3  ;;  %v628_v34 = vsub.f32 %v5840_v31, %v612_v25  ;;  %7259 = vst [vmem:[#allocation24_spill] sm:$0xff] %v5883_v17  ;;  %v7267_v8 = vld [vmem:[#allocation22_spill] sm:$0xff]  ;;  %v7268_v3 = vld [vmem:[#allocation23_spill] sm:$0xff] }
 0x15b   :  { %v463_v10 = vmul.f32 3.0, %v447_v61  ;;  %v634_v37 = vsub.f32 %v458_v6, %v618_v5  ;;  %v631_v40 = vsub.f32 %v455_v1, %v615_v0  ;;  %v625_v53 = vsub.f32 %v5831_v26, %v5836_v22  ;;  %v1006_v5 = vld [vmem:[#allocation7 + $0x88] sm:$0xff] }
 0x15c   :  { %v623_v36 = vmul.f32 2.0, %v607_v15  ;;  %v637_v29 = vsub.f32 %v461_v62, %v621_v9  ;;  %v624_v18 = vsub.f32 %v5817_v16, %v5819_v20  ;;  %v630_v33 = vsub.f32 %v454_v32, %v614_v45  ;;  %v7265_v15 = vld [vmem:[#allocation20_spill] sm:$0xff] }
 0x15d   :  { %v627_v39 = vsub.f32 %v451_v51, %v611_v42  ;;  %v626_v31 = vsub.f32 %v450_v27, %v610_v47  ;;  %v7260_v16 = vmov 0.0   ;;  %v789_v20 = vstv %s786_s0  ;;  %v1009_v27 = vld [vmem:[#allocation7 + $0xa0] sm:$0xff] }
 0x15e   :  { %668 = vmatprep.subr.mxu0 %v637_v29  ;;  %v639_v35 = vsub.f32 %v463_v10, %v623_v36  ;;  %v792_v22 = vstv %s4383_s12  ;;  %v809_v49 = vstv %s4384_s13  ;;  %v790_v48 = vmul.f32 %v789_v20, %v7261_v44  ;;  %v1005_v10 = vld [vmem:[#allocation7 + $0x80] sm:$0xff]  ;;  %v1007_v36 = vld [vmem:[#allocation7 + $0x90] sm:$0xff] }
 0x15f   :  { %669 = vmatpush1.msra.mxu0 %v636_v38  ;;  %v791_v60 = vmul.f32 %v789_v20, %v7262_v41  ;;  %v810_v14 = vmul.f32 %v809_v49, %v807_v46  ;;  %v811_v62 = vmul.f32 %v809_v49, %v808_v50  ;;  %v1168_v29 = vld [vmem:[#allocation9 + $0x90] sm:$0xff]  ;;  %v1167_v38 = vld [vmem:[#allocation9 + $0x88] sm:$0xff]  ;;  %v1170_v47 = vld [vmem:[#allocation9 + $0xa0] sm:$0xff] }
 0x160   :  { %739 = vmatprep.subr.mxu1 %v639_v35  ;;  %670 = vmatprep.subr.mxu0 %v633_v30  ;;  %v1008_v35 = vld [vmem:[#allocation7 + $0x98] sm:$0xff]  ;;  %v1171_v49 = vld [vmem:[#allocation9 + $0xa8] sm:$0xff] }
 0x161   :  { %740 = vmatpush1.msra.mxu1 %v638_v19  ;;  %671 = vmatpush1.msra.mxu0 %v632_v55  ;;  %v1169_v19 = vld [vmem:[#allocation9 + $0x98] sm:$0xff] }
 0x162   :  { %741 = vmatprep.subr.mxu1 %v635_v12  ;;  %672 = vmatprep.subr.mxu0 %v629_v56  ;;  %v1012_v41 = vld [vmem:[#allocation7 + $0xb8] sm:$0xff] }
 0x163   :  { %742 = vmatpush1.msra.mxu1 %v634_v37  ;;  %673 = vmatpush1.msra.mxu0 %v628_v34  ;;  %v1173_v50 = vld [vmem:[#allocation9 + $0xb8] sm:$0xff] }
 0x164   :  { %743 = vmatprep.subr.mxu1 %v631_v40  ;;  %674 = vmatprep.subr.mxu0 %v625_v53  ;;  %v1011_v53 = vld [vmem:[#allocation7 + $0xb0] sm:$0xff] }
 0x165   :  { %744 = vmatpush1.msra.mxu1 %v630_v33  ;;  %675 = vmatpush1.msra.mxu0 %v624_v18  ;;  %v1172_v18 = vld [vmem:[#allocation9 + $0xb0] sm:$0xff] }
 0x166   :  { %745 = vmatprep.subr.mxu1 %v627_v39  ;;  %4381 = vmatmul.mubr.msk.f32.vlgmr.msra.gmra.mxu0 %vm640_vm2, %v5883_v17 }
 0x167   :  { %746 = vmatpush1.msra.mxu1 %v626_v31  ;;  %890 = vmatprep.mubr.f32.mxu0 %v7260_v16 }
 0x168   :  { %4382 = vmatmul.mubr.msk.f32.vlgmr.msra.gmra.mxu1 %vm640_vm2, %v5883_v17 }
 0x169   :  { %979 = vmatprep.mubr.f32.mxu1 %v7260_v16 }
 0x226   :  { %v710_v26 = vpop.f32.mrf.mxu0 }
 0x227   :  { %v793_v58 = vmul.f32 %v792_v22, %v710_v26 }
 0x228   :  { %v781_v63 = vpop.f32.mrf.mxu1  ;;  %v712_v57 = vpop.f32.mrf.mxu0 }
 0x229   :  { %v794_v2 = vmul.f32 %v792_v22, %v712_v57  ;;  %v795_v11 = vmul.f32 %v792_v22, %v781_v63 }
 0x22a   :  { %v783_v43 = vpop.f32.mrf.mxu1 }
 0x22b   :  { %v801_v52 = vcombine.low %v793_v58, %v794_v2  ;;  %v796_v54 = vmul.f32 %v792_v22, %v783_v43  ;;  %v1010_v22 = vld [vmem:[#allocation7 + $0xa8] sm:$0xff] }
 0x22d   :  { %v805_v23 = vsub.f32 %v790_v48, %v801_v52  ;;  %v802_v13 = vcombine.low %v795_v11, %v796_v54 }
 0x22f   :  { %v5893_v61 = vadd.f32 %v810_v14, %v805_v23  ;;  %v806_v59 = vsub.f32 %v791_v60, %v802_v13 }
 0x231   :  { %7263 = vst [vmem:[#allocation18_spill] sm:$0xff] %v5893_v61  ;;  %v5895_v21 = vadd.f32 %v811_v62, %v806_v59  ;;  %v816_v9 = vcombine.high %v5893_v61, %v5893_v61 }
 0x233   :  { %7264 = vst [vmem:[#allocation19_spill] sm:$0xff] %v5895_v21  ;;  %4385 = vmatprep.subr.msk.mxu0 %vm117_vm0, %v816_v9  ;;  %v817_v4 = vcombine.high %v5895_v21, %v5895_v21 }
 0x234   :  { %4386 = vmatpush1.msk.msra.mxu0 %vm117_vm0, %v5893_v61 }
 0x235   :  { %4391 = vmatprep.subr.msk.mxu1 %vm117_vm0, %v817_v4  ;;  %4387 = vmatmul.mubr.msk.f32.vlgmr.msra.gmra.mxu0 %vm104_vm1, %v7265_v15 }
 0x236   :  { %4392 = vmatpush1.msk.msra.mxu1 %vm117_vm0, %v5895_v21  ;;  %896 = vmatprep.mubr.f32.mxu0 %v7260_v16 }
 0x237   :  { %4393 = vmatmul.mubr.msk.f32.vlgmr.msra.gmra.mxu1 %vm104_vm1, %v7265_v15 }
 0x238   :  { %985 = vmatprep.mubr.f32.mxu1 %v7260_v16 }
 0x239   :  { %4388 = vmatmul.mubr.msk.f32.gmra.mxu0 %vm104_vm1, %v7266_v24 }
 0x23a   :  { %902 = vmatprep.mubr.f32.mxu0 %v7260_v16 }
 0x23b   :  { %4394 = vmatmul.mubr.msk.f32.gmra.mxu1 %vm104_vm1, %v7266_v24 }
 0x23c   :  { %991 = vmatprep.mubr.f32.mxu1 %v7260_v16 }
 0x23d   :  { %4389 = vmatmul.mubr.msk.f32.gmra.mxu0 %vm104_vm1, %v7267_v8 }
 0x23e   :  { %908 = vmatprep.mubr.f32.mxu0 %v7260_v16 }
 0x23f   :  { %4395 = vmatmul.mubr.msk.f32.gmra.mxu1 %vm104_vm1, %v7267_v8 }
 0x240   :  { %997 = vmatprep.mubr.f32.mxu1 %v7260_v16 }
 0x241   :  { %4390 = vmatmul.mubr.msk.f32.gmra.mxu0 %vm104_vm1, %v7268_v3 }
 0x242   :  { %1406 = vmatprep.mubr.f32.mxu0 %v7260_v16 }
 0x243   :  { %4396 = vmatmul.mubr.msk.f32.gmra.mxu1 %vm104_vm1, %v7268_v3 }
 0x244   :  { %1477 = vmatprep.mubr.f32.mxu1 %v7260_v16 }
 0x2f5   :  { %v892_v7 = vpop.f32.mrf.mxu0 }
 0x2f6   :  { %v5931_v25 = vadd.f32 %v1005_v10, %v892_v7  ;;  %v5933_v6 = vadd.f32 %v1166_v28, %v892_v7 }
 0x2f7   :  { %v981_v1 = vpop.f32.mrf.mxu1  ;;  %v894_v0 = vpop.f32.mrf.mxu0 }
 0x2f8   :  { %v4397_v30 = vmul.f32 -1.442695, %v5931_v25  ;;  %v4413_v32 = vmul.f32 -1.442695, %v5933_v6  ;;  %v5937_v45 = vadd.f32 %v1007_v36, %v981_v1  ;;  %v5939_v55 = vadd.f32 %v1168_v29, %v981_v1 }
 0x2f9   :  { %v5941_v51 = vadd.f32 %v1006_v5, %v894_v0  ;;  %v5943_v42 = vadd.f32 %v1167_v38, %v894_v0  ;;  %v983_v12 = vpop.f32.mrf.mxu1  ;;  %v898_v56 = vpop.f32.mrf.mxu0 }
 0x2fa   :  { %4773 = vpow2.f32 %v4397_v30  ;;  %v4399_v34 = vmul.f32 -1.442695, %v5937_v45  ;;  %v4415_v37 = vmul.f32 -1.442695, %v5939_v55  ;;  %v5947_v40 = vadd.f32 %v1008_v35, %v983_v12 }
 0x2fb   :  { %4775 = vpow2.f32 %v4413_v32  ;;  %v4398_v33 = vmul.f32 -1.442695, %v5941_v51  ;;  %v4414_v39 = vmul.f32 -1.442695, %v5943_v42  ;;  %v5951_v31 = vadd.f32 %v1169_v19, %v983_v12  ;;  %v987_v20 = vpop.f32.mrf.mxu1  ;;  %v900_v26 = vpop.f32.mrf.mxu0 }
 0x2fc   :  { %4777 = vpow2.f32 %v4399_v34  ;;  %v4400_v63 = vmul.f32 -1.442695, %v5947_v40  ;;  %v5954_v57 = vadd.f32 %v1009_v27, %v898_v56  ;;  %v5956_v46 = vadd.f32 %v1170_v47, %v898_v56  ;;  %v1013_v56 = vld [vmem:[#allocation7 + $0xc0] sm:$0xff] }
 0x2fd   :  { %4779 = vpow2.f32 %v4415_v37  ;;  %v4416_v44 = vmul.f32 -1.442695, %v5951_v31  ;;  %v5959_v48 = vadd.f32 %v1011_v53, %v987_v20  ;;  %v5961_v58 = vadd.f32 %v1172_v18, %v987_v20  ;;  %v989_v2 = vpop.f32.mrf.mxu1  ;;  %v904_v12 = vpop.f32.mrf.mxu0  ;;  %v1174_v34 = vld [vmem:[#allocation9 + $0xc0] sm:$0xff] }
 0x2fe   :  { %4781 = vpow2.f32 %v4398_v33  ;;  %v4401_v60 = vmul.f32 -1.442695, %v5954_v57  ;;  %v5964_v43 = vadd.f32 %v1010_v22, %v900_v26  ;;  %v4417_v11 = vmul.f32 -1.442695, %v5956_v46  ;;  %v1015_v33 = vld [vmem:[#allocation7 + $0xd0] sm:$0xff] }
 0x2ff   :  { %4783 = vpow2.f32 %v4414_v39  ;;  %v5967_v52 = vadd.f32 %v1171_v49, %v900_v26  ;;  %v4403_v14 = vmul.f32 -1.442695, %v5959_v48  ;;  %v5970_v54 = vadd.f32 %v1012_v41, %v989_v2  ;;  %v993_v18 = vpop.f32.mrf.mxu1  ;;  %v1176_v22 = vld [vmem:[#allocation9 + $0xd0] sm:$0xff]  ;;  %v1014_v41 = vld [vmem:[#allocation7 + $0xc8] sm:$0xff] }
 0x300   :  { %4785 = vpow2.f32 %v4400_v63  ;;  %v4419_v23 = vmul.f32 -1.442695, %v5961_v58  ;;  %v5973_v13 = vadd.f32 %v1173_v50, %v989_v2  ;;  %v4402_v62 = vmul.f32 -1.442695, %v5964_v43  ;;  %v906_v2 = vpop.f32.mrf.mxu0 }
 0x301   :  { %4787 = vpow2.f32 %v4416_v44  ;;  %v4418_v59 = vmul.f32 -1.442695, %v5967_v52  ;;  %v4404_v9 = vmul.f32 -1.442695, %v5970_v54  ;;  %v5979_v26 = vadd.f32 %v1013_v56, %v904_v12 }
 0x302   :  { %4789 = vpow2.f32 %v4401_v60  ;;  %v4420_v4 = vmul.f32 -1.442695, %v5973_v13  ;;  %v5981_v44 = vadd.f32 %v1174_v34, %v904_v12 }
 0x303   :  { %4791 = vpow2.f32 %v4417_v11  ;;  %v5983_v11 = vadd.f32 %v1015_v33, %v993_v18 }
 0x304   :  { %4793 = vpow2.f32 %v4403_v14  ;;  %v1175_v14 = vld [vmem:[#allocation9 + $0xc8] sm:$0xff] }
 0x305   :  { %4795 = vpow2.f32 %v4419_v23 }
 0x306   :  { %4797 = vpow2.f32 %v4402_v62 }
 0x307   :  { %v4774_v15 = vpop.eup %4773  ;;  %4799 = vpow2.f32 %v4418_v59  ;;  %v5985_v59 = vadd.f32 %v1176_v22, %v993_v18  ;;  %v1018_v22 = vld [vmem:[#allocation7 + $0xe8] sm:$0xff] }
 0x308   :  { %v4776_v24 = vpop.eup %4775  ;;  %v1085_v8 = vadd.f32 1.0, %v4774_v15  ;;  %4801 = vpow2.f32 %v4404_v9  ;;  %v995_v9 = vpop.f32.mrf.mxu1 }
 0x309   :  { %v4778_v3 = vpop.eup %4777  ;;  %v1246_v10 = vadd.f32 1.0, %v4776_v24  ;;  %4803 = vpow2.f32 %v4420_v4  ;;  %v1016_v4 = vld [vmem:[#allocation7 + $0xd8] sm:$0xff] }
 0x30a   :  { %v4780_v28 = vpop.eup %4779  ;;  %4805 = vrcp.f32 %v1085_v8  ;;  %v1087_v7 = vadd.f32 1.0, %v4778_v3  ;;  %v4405_v8 = vmul.f32 -1.442695, %v5979_v26  ;;  %v5988_v3 = vadd.f32 %v1014_v41, %v906_v2  ;;  %v999_v56 = vpop.f32.mrf.mxu1  ;;  %v1179_v41 = vld [vmem:[#allocation9 + $0xe8] sm:$0xff] }
 0x30b   :  { %v4782_v36 = vpop.eup %4781  ;;  %4807 = vrcp.f32 %v1246_v10  ;;  %v1248_v29 = vadd.f32 1.0, %v4780_v28  ;;  %v1177_v10 = vld [vmem:[#allocation9 + $0xd8] sm:$0xff] }
 0x30c   :  { %v4784_v5 = vpop.eup %4783  ;;  %4809 = vrcp.f32 %v1087_v7  ;;  %v1086_v38 = vadd.f32 1.0, %v4782_v36  ;;  %v4421_v36 = vmul.f32 -1.442695, %v5981_v44  ;;  %v6003_v12 = vadd.f32 %v1177_v10, %v995_v9 }
 0x30d   :  { %v4786_v1 = vpop.eup %4785  ;;  %4811 = vrcp.f32 %v1248_v29  ;;  %v1247_v0 = vadd.f32 1.0, %v4784_v5  ;;  %v5993_v29 = vadd.f32 %v1175_v14, %v906_v2  ;;  %v910_v5 = vpop.f32.mrf.mxu0  ;;  %v4406_v34 = vmul.f32 -1.442695, %v5988_v3 }
 0x30e   :  { %v4788_v35 = vpop.eup %4787  ;;  %4813 = vrcp.f32 %v1086_v38  ;;  %v1088_v30 = vadd.f32 1.0, %v4786_v1  ;;  %v1017_v38 = vld [vmem:[#allocation7 + $0xe0] sm:$0xff] }
 0x30f   :  { %v4790_v32 = vpop.eup %4789  ;;  %4815 = vrcp.f32 %v1247_v0  ;;  %v1249_v19 = vadd.f32 1.0, %v4788_v35  ;;  %v4407_v0 = vmul.f32 -1.442695, %v5983_v11  ;;  %v5998_v35 = vadd.f32 %v1016_v4, %v995_v9 }
 0x310   :  { %v4792_v27 = vpop.eup %4791  ;;  %4817 = vrcp.f32 %v1088_v30  ;;  %v1089_v47 = vadd.f32 1.0, %v4790_v32  ;;  %v1178_v30 = vld [vmem:[#allocation9 + $0xe0] sm:$0xff]  ;;  %v4422_v33 = vmul.f32 -1.442695, %v5993_v29 }
 0x311   :  { %v4794_v37 = vpop.eup %4793  ;;  %4819 = vrcp.f32 %v1249_v19  ;;  %v1250_v53 = vadd.f32 1.0, %v4792_v27  ;;  %v4423_v19 = vmul.f32 -1.442695, %v5985_v59  ;;  %v1019_v27 = vld [vmem:[#allocation7 + $0xf0] sm:$0xff] }
 0x312   :  { %v4796_v39 = vpop.eup %4795  ;;  %4821 = vrcp.f32 %v1089_v47  ;;  %v1091_v20 = vadd.f32 1.0, %v4794_v37  ;;  %v6008_v37 = vadd.f32 %v1017_v38, %v910_v5  ;;  %v6018_v2 = vadd.f32 %v1019_v27, %v999_v56 }
 0x313   :  { %v4798_v63 = vpop.eup %4797  ;;  %4823 = vrcp.f32 %v1250_v53  ;;  %v1252_v49 = vadd.f32 1.0, %v4796_v39  ;;  %v1180_v53 = vld [vmem:[#allocation9 + $0xf0] sm:$0xff]  ;;  %v6013_v39 = vadd.f32 %v1178_v30, %v910_v5 }
 0x314   :  { %v4800_v60 = vpop.eup %4799  ;;  %4825 = vrcp.f32 %v1091_v20  ;;  %v1090_v50 = vadd.f32 1.0, %v4798_v63  ;;  %v912_v20 = vpop.f32.mrf.mxu0  ;;  %v6023_v14 = vadd.f32 %v1180_v53, %v999_v56  ;;  %v4409_v4 = vmul.f32 -1.442695, %v6008_v37 }
 0x315   :  { %v4802_v23 = vpop.eup %4801  ;;  %4827 = vrcp.f32 %v1252_v49  ;;  %v1251_v62 = vadd.f32 1.0, %v4800_v60  ;;  %v4408_v49 = vmul.f32 -1.442695, %v5998_v35  ;;  %v4425_v10 = vmul.f32 -1.442695, %v6013_v39 }
 0x316   :  { %v4804_v15 = vpop.eup %4803  ;;  %4829 = vrcp.f32 %v1090_v50  ;;  %v1092_v24 = vadd.f32 1.0, %v4802_v23  ;;  %v4424_v50 = vmul.f32 -1.442695, %v6003_v12  ;;  %v1001_v23 = vpop.f32.mrf.mxu1  ;;  %v4411_v5 = vmul.f32 -1.442695, %v6018_v2 }
 0x317   :  { %v5990_v28 = vpop.eup %4805  ;;  %4831 = vrcp.f32 %v1251_v62  ;;  %v1253_v7 = vadd.f32 1.0, %v4804_v15  ;;  %v1020_v62 = vld [vmem:[#allocation7 + $0xf8] sm:$0xff]  ;;  %v6028_v15 = vadd.f32 %v1018_v22, %v912_v20  ;;  %v4427_v30 = vmul.f32 -1.442695, %v6023_v14 }
 0x318   :  { %v5995_v1 = vpop.eup %4807  ;;  %4833 = vrcp.f32 %v1092_v24  ;;  %v1181_v24 = vld [vmem:[#allocation9 + $0xf8] sm:$0xff]  ;;  %v6038_v38 = vadd.f32 %v1020_v62, %v1001_v23 }
 0x319   :  { %v6000_v32 = vpop.eup %4809  ;;  %4835 = vrcp.f32 %v1253_v7  ;;  %v6033_v7 = vadd.f32 %v1179_v41, %v912_v20  ;;  %v4410_v27 = vmul.f32 -1.442695, %v6028_v15 }
 0x31a   :  { %v6005_v47 = vpop.eup %4811  ;;  %4837 = vpow2.f32 %v4405_v8  ;;  %v4412_v20 = vmul.f32 -1.442695, %v6038_v38 }
 0x31b   :  { %v6010_v18 = vpop.eup %4813  ;;  %4839 = vpow2.f32 %v4421_v36  ;;  %v4426_v53 = vmul.f32 -1.442695, %v6033_v7 }
 0x31c   :  { %v6015_v63 = vpop.eup %4815  ;;  %4841 = vpow2.f32 %v4407_v0 }
 0x31d   :  { %v6020_v60 = vpop.eup %4817  ;;  %4843 = vpow2.f32 %v4423_v19  ;;  %v6043_v19 = vadd.f32 %v1181_v24, %v1001_v23 }
 0x31e   :  { %v6025_v9 = vpop.eup %4819  ;;  %4845 = vpow2.f32 %v4406_v34 }
 0x31f   :  { %v6030_v8 = vpop.eup %4821  ;;  %4847 = vpow2.f32 %v4422_v33  ;;  %7269 = vst [vmem:[#allocation20_spill] sm:$0xff] %v6043_v19 }
 0x320   :  { %v6035_v36 = vpop.eup %4823  ;;  %4849 = vpow2.f32 %v4408_v49  ;;  %v4428_v49 = vmul.f32 -1.442695, %v6043_v19 }
 0x321   :  { %v6040_v0 = vpop.eup %4825  ;;  %4851 = vpow2.f32 %v4424_v50 }
 0x322   :  { %v6045_v56 = vpop.eup %4827  ;;  %4853 = vpow2.f32 %v4409_v4 }
 0x323   :  { %v6048_v34 = vpop.eup %4829  ;;  %4855 = vpow2.f32 %v4425_v10 }
 0x324   :  { %v6051_v33 = vpop.eup %4831  ;;  %4857 = vpow2.f32 %v4411_v5 }
 0x325   :  { %v6054_v22 = vpop.eup %4833  ;;  %4859 = vpow2.f32 %v4427_v30 }
 0x326   :  { %v6057_v41 = vpop.eup %4835  ;;  %4861 = vpow2.f32 %v4410_v27 }
 0x327   :  { %v4838_v50 = vpop.eup %4837  ;;  %4863 = vpow2.f32 %v4426_v53 }
 0x328   :  { %v4840_v23 = vpop.eup %4839  ;;  %v1093_v62 = vadd.f32 1.0, %v4838_v50  ;;  %4865 = vpow2.f32 %v4412_v20 }
 0x329   :  { %v4842_v4 = vpop.eup %4841  ;;  %v1254_v24 = vadd.f32 1.0, %v4840_v23  ;;  %4867 = vpow2.f32 %v4428_v49 }
 0x32a   :  { %v4844_v10 = vpop.eup %4843  ;;  %4869 = vrcp.f32 %v1093_v62  ;;  %v1095_v5 = vadd.f32 1.0, %v4842_v4 }
 0x32b   :  { %v4846_v21 = vpop.eup %4845  ;;  %4871 = vrcp.f32 %v1254_v24  ;;  %v1256_v61 = vadd.f32 1.0, %v4844_v10 }
 0x32c   :  { %v4848_v30 = vpop.eup %4847  ;;  %4873 = vrcp.f32 %v1095_v5  ;;  %v1094_v16 = vadd.f32 1.0, %v4846_v21 }
 0x32d   :  { %v4850_v17 = vpop.eup %4849  ;;  %4875 = vrcp.f32 %v1256_v61  ;;  %v1255_v27 = vadd.f32 1.0, %v4848_v30 }
 0x32e   :  { %v4852_v19 = vpop.eup %4851  ;;  %4877 = vrcp.f32 %v1094_v16  ;;  %v1096_v53 = vadd.f32 1.0, %v4850_v17 }
 0x32f   :  { %v4854_v50 = vpop.eup %4853  ;;  %4879 = vrcp.f32 %v1255_v27  ;;  %v1257_v20 = vadd.f32 1.0, %v4852_v19 }
 0x330   :  { %v4856_v23 = vpop.eup %4855  ;;  %4881 = vrcp.f32 %v1096_v53  ;;  %v1097_v49 = vadd.f32 1.0, %v4854_v50 }
 0x331   :  { %v4858_v62 = vpop.eup %4857  ;;  %4883 = vrcp.f32 %v1257_v20  ;;  %v1258_v4 = vadd.f32 1.0, %v4856_v23 }
 0x332   :  { %v4860_v24 = vpop.eup %4859  ;;  %4885 = vrcp.f32 %v1097_v49  ;;  %v1099_v10 = vadd.f32 1.0, %v4858_v62  ;;  %v1133_v62 = vmul.f32 %v5990_v28, %v5931_v25 }
 0x333   :  { %v4862_v5 = vpop.eup %4861  ;;  %4887 = vrcp.f32 %v1258_v4  ;;  %v1260_v21 = vadd.f32 1.0, %v4860_v24  ;;  %v1294_v4 = vmul.f32 %v5995_v1, %v5933_v6  ;;  %v6077_v6 = vmul.f32 %v6000_v32, %v5937_v45 }
 0x334   :  { %v4864_v61 = vpop.eup %4863  ;;  %4889 = vrcp.f32 %v1099_v10  ;;  %v1098_v30 = vadd.f32 1.0, %v4862_v5  ;;  %v1134_v10 = vmul.f32 %v6010_v18, %v5941_v51  ;;  %v6071_v25 = vmul.f32 3.0, %v1133_v62  ;;  %v7270_v62 = vld [vmem:[#allocation20_spill] sm:$0xff] }
 0x335   :  { %v4866_v16 = vpop.eup %4865  ;;  %4891 = vrcp.f32 %v1260_v21  ;;  %v1259_v17 = vadd.f32 1.0, %v4864_v61  ;;  %v1295_v21 = vmul.f32 %v6015_v63, %v5943_v42  ;;  %v1137_v61 = vmul.f32 %v6030_v8, %v5954_v57 }
 0x336   :  { %v4868_v27 = vpop.eup %4867  ;;  %4893 = vrcp.f32 %v1098_v30  ;;  %v1100_v19 = vadd.f32 1.0, %v4866_v16  ;;  %v1138_v16 = vmul.f32 %v6048_v34, %v5964_v43  ;;  %v6073_v28 = vmul.f32 2.0, %v1294_v4 }
 0x337   :  { %v4870_v53 = vpop.eup %4869  ;;  %4895 = vrcp.f32 %v1259_v17  ;;  %v1261_v50 = vadd.f32 1.0, %v4868_v27  ;;  %v1299_v51 = vmul.f32 %v6051_v33, %v5967_v52  ;;  %v6083_v57 = vmul.f32 %v6005_v47, %v5939_v55 }
 0x338   :  { %v4872_v20 = vpop.eup %4871  ;;  %4897 = vrcp.f32 %v1100_v19  ;;  %v6085_v1 = vmul.f32 3.0, %v1134_v10  ;;  %v1136_v43 = vmul.f32 %v6020_v60, %v5947_v40  ;;  %v1141_v18 = vmul.f32 %v4870_v53, %v5979_v26 }
 0x339   :  { %v4874_v23 = vpop.eup %4873  ;;  %4899 = vrcp.f32 %v1261_v50  ;;  %v6090_v8 = vmul.f32 2.0, %v1295_v21  ;;  %v1297_v45 = vmul.f32 %v6025_v9, %v5951_v31  ;;  %v6094_v32 = vmul.f32 3.0, %v1137_v61 }
 0x33a   :  { %v4876_v49 = vpop.eup %4875  ;;  %v1298_v52 = vmul.f32 %v6035_v36, %v5956_v46  ;;  %v1139_v47 = vmul.f32 %v6040_v0, %v5959_v48  ;;  %v1300_v40 = vmul.f32 %v6045_v56, %v5961_v58  ;;  %v6102_v60 = vmul.f32 3.0, %v1138_v16 }
 0x33b   :  { %v4878_v24 = vpop.eup %4877  ;;  %v1140_v26 = vmul.f32 %v6054_v22, %v5970_v54  ;;  %v6106_v33 = vmul.f32 2.0, %v1299_v51  ;;  %v1301_v31 = vmul.f32 %v6057_v41, %v5973_v13  ;;  %v1157_v48 = vmul.f32 3.0, %v1141_v18 }
 0x33c   :  { %v4880_v5 = vpop.eup %4879  ;;  %v1302_v0 = vmul.f32 %v4872_v20, %v5981_v44  ;;  %v1142_v58 = vmul.f32 %v4878_v24, %v5988_v3  ;;  %v1143_v54 = vmul.f32 %v4874_v23, %v5983_v11  ;;  %v1316_v18 = vmul.f32 2.0, %v1300_v40 }
 0x33d   :  { %v4882_v30 = vpop.eup %4881  ;;  %v1303_v56 = vmul.f32 %v4880_v5, %v5993_v29  ;;  %v1156_v16 = vmul.f32 3.0, %v1140_v26  ;;  %v1312_v26 = vmul.f32 2.0, %v6083_v57 }
 0x33e   :  { %v4884_v17 = vpop.eup %4883  ;;  %v1144_v41 = vmul.f32 %v4882_v30, %v5998_v35  ;;  %v1318_v4 = vmul.f32 2.0, %v1302_v0  ;;  %v1159_v21 = vmul.f32 3.0, %v1143_v54  ;;  %v7273_v54 = vld [vmem:[#allocation18_spill] sm:$0xff] }
 0x33f   :  { %v4886_v42 = vpop.eup %4885  ;;  %v1305_v44 = vmul.f32 %v4884_v17, %v6003_v12  ;;  %v1319_v23 = vmul.f32 2.0, %v1303_v56  ;;  %v1317_v17 = vmul.f32 2.0, %v1301_v31 }
 0x340   :  { %v4888_v63 = vpop.eup %4887  ;;  %v1145_v46 = vmul.f32 %v4886_v42, %v6008_v37  ;;  %v1160_v35 = vmul.f32 3.0, %v1144_v41  ;;  %v1155_v42 = vmul.f32 3.0, %v1139_v47 }
 0x341   :  { %v4890_v55 = vpop.eup %4889  ;;  %v1306_v9 = vmul.f32 %v4888_v63, %v6013_v39  ;;  %v1304_v39 = vmul.f32 %v4876_v49, %v5985_v59  ;;  %v1321_v10 = vmul.f32 2.0, %v1305_v44  ;;  %v1334_v63 = vsub.f32 %v1157_v48, %v1318_v4  ;;  %v1506_v48 = vld [vmem:[#allocation10 + $0x10] sm:$0xff]  ;;  %v6170_v4 = vld [vmem:[%s7193_s4 + $0x8] sm:$0xff] }
 0x342   :  { %v4892_v34 = vpop.eup %4891  ;;  %v1147_v22 = vmul.f32 %v4890_v55, %v6018_v2  ;;  %v1161_v29 = vmul.f32 3.0, %v1145_v46  ;;  %v1158_v2 = vmul.f32 3.0, %v1142_v58  ;;  %v1313_v46 = vmul.f32 2.0, %v1297_v45  ;;  %7278 = vst [vmem:[#allocation20_spill] sm:$0xff] %v6170_v4 }
 0x343   :  { %v4894_v36 = vpop.eup %4893  ;;  %v1308_v19 = vmul.f32 %v4892_v34, %v6023_v14  ;;  %v1322_v50 = vmul.f32 2.0, %v1306_v9  ;;  %v1320_v61 = vmul.f32 2.0, %v1304_v39  ;;  %v1152_v34 = vmul.f32 3.0, %v1136_v43 }
 0x344   :  { %v4896_v27 = vpop.eup %4895  ;;  %v1146_v13 = vmul.f32 %v4894_v36, %v6028_v15  ;;  %v1163_v24 = vmul.f32 3.0, %v1147_v22  ;;  %v1335_v51 = vsub.f32 %v1158_v2, %v1319_v23  ;;  %v1337_v9 = vsub.f32 %v1160_v35, %v1321_v10  ;;  %v1865_v35 = vld [vmem:[#allocation9 + $0x100] sm:$0xff] }
 0x345   :  { %v4898_v37 = vpop.eup %4897  ;;  %v1307_v3 = vmul.f32 %v4896_v27, %v6033_v7  ;;  %v1324_v59 = vmul.f32 2.0, %v1308_v19  ;;  %v1314_v7 = vmul.f32 2.0, %v1298_v52  ;;  %v1338_v30 = vsub.f32 %v1161_v29, %v1322_v50 }
 0x346   :  { %v4900_v53 = vpop.eup %4899  ;;  %v1162_v20 = vmul.f32 3.0, %v1146_v13  ;;  %v1148_v11 = vmul.f32 %v4898_v37, %v6038_v38  ;;  %v1331_v52 = vsub.f32 %v6102_v60, %v6106_v33  ;;  %v1151_v36 = vmul.f32 3.0, %v6077_v6  ;;  %v1507_v13 = vld [vmem:[#allocation10 + $0x18] sm:$0xff] }
 0x347   :  { %v1323_v14 = vmul.f32 2.0, %v1307_v3  ;;  %v1309_v15 = vmul.f32 %v4900_v53, %v7270_v62  ;;  %v1340_v55 = vsub.f32 %v1163_v24, %v1324_v59  ;;  %v1330_v31 = vsub.f32 %v6094_v32, %v1314_v7  ;;  %v7271_v32 = vld [vmem:[#allocation24_spill] sm:$0xff]  ;;  %v7274_v53 = vld [vmem:[#allocation19_spill] sm:$0xff]  ;;  %v6192_v59 = vld [vmem:[%s7193_s4 + $0x18] sm:$0xff] }
 0x348   :  { %v1164_v49 = vmul.f32 3.0, %v1148_v11  ;;  %v1336_v0 = vsub.f32 %v1159_v21, %v1320_v61  ;;  %v1333_v47 = vsub.f32 %v1156_v16, %v1317_v17  ;;  %v1327_v43 = vsub.f32 %v6085_v1, %v6090_v8  ;;  %v6181_v24 = vld [vmem:[%s7193_s4 + $0x10] sm:$0xff]  ;;  %7280 = vst [vmem:[#allocation18_spill] sm:$0xff] %v6192_v59  ;;  %v1705_v61 = vld [vmem:[#allocation7 + $0x108] sm:$0xff] }
 0x349   :  { %v1325_v12 = vmul.f32 2.0, %v1309_v15  ;;  %v1339_v5 = vsub.f32 %v1162_v20, %v1323_v14  ;;  %v1326_v45 = vsub.f32 %v6071_v25, %v6073_v28  ;;  %v1332_v40 = vsub.f32 %v1155_v42, %v1316_v18  ;;  %v6157_v15 = vld [vmem:[%s7193_s4] sm:$0xff]  ;;  %7279 = vst [vmem:[#allocation24_spill] sm:$0xff] %v6181_v24 }
 0x34a   :  { %v1329_v6 = vsub.f32 %v1152_v34, %v1313_v46  ;;  %v1328_v57 = vsub.f32 %v1151_v36, %v1312_v26  ;;  %v7272_v60 = vmov 0.0   ;;  %v1490_v28 = vstv %s4432_s14  ;;  %7277 = vst [vmem:[#allocation23_spill] sm:$0xff] %v6157_v15  ;;  %v1708_v36 = vld [vmem:[#allocation7 + $0x120] sm:$0xff]  ;;  %s4579_s14 = sld [smem:[#allocation2 + $0x201]] }
 0x34b   :  { %1366 = vmatprep.subr.mxu0 %v1339_v5  ;;  %v1341_v38 = vsub.f32 %v1164_v49, %v1325_v12  ;;  %v1487_v1 = vstv %s4431_s15  ;;  %v1508_v58 = vstv %s4433_s16  ;;  %v1704_v49 = vld [vmem:[#allocation7 + $0x100] sm:$0xff]  ;;  %v1706_v12 = vld [vmem:[#allocation7 + $0x110] sm:$0xff]  ;;  %s4578_s15 = sld [smem:[#allocation2 + $0x200]] }
 0x34c   :  { %1367 = vmatpush1.msra.mxu0 %v1338_v30  ;;  %v1488_v22 = vmul.f32 %v1487_v1, %v7273_v54  ;;  %v1509_v41 = vmul.f32 %v1508_v58, %v1506_v48  ;;  %v1489_v29 = vmul.f32 %v1487_v1, %v7274_v53  ;;  %v1510_v20 = vmul.f32 %v1508_v58, %v1507_v13  ;;  %v1867_v5 = vld [vmem:[#allocation9 + $0x110] sm:$0xff]  ;;  %v1866_v30 = vld [vmem:[#allocation9 + $0x108] sm:$0xff]  ;;  %v1869_v26 = vld [vmem:[#allocation9 + $0x120] sm:$0xff]  ;;  %s4580_s16 = sld [smem:[#allocation2 + $0x202]] }
 0x34d   :  { %1437 = vmatprep.subr.mxu1 %v1341_v38  ;;  %1368 = vmatprep.subr.mxu0 %v1335_v51  ;;  %v1707_v38 = vld [vmem:[#allocation7 + $0x118] sm:$0xff]  ;;  %v1870_v48 = vld [vmem:[#allocation9 + $0x128] sm:$0xff] }
 0x34e   :  { %1438 = vmatpush1.msra.mxu1 %v1340_v55  ;;  %1369 = vmatpush1.msra.mxu0 %v1334_v63  ;;  %v1868_v55 = vld [vmem:[#allocation9 + $0x118] sm:$0xff] }
 0x34f   :  { %1439 = vmatprep.subr.mxu1 %v1337_v9  ;;  %1370 = vmatprep.subr.mxu0 %v1331_v52 }
 0x350   :  { %1440 = vmatpush1.msra.mxu1 %v1336_v0  ;;  %1371 = vmatpush1.msra.mxu0 %v1330_v31 }
 0x351   :  { %1441 = vmatprep.subr.mxu1 %v1333_v47  ;;  %1372 = vmatprep.subr.mxu0 %v1327_v43  ;;  %v1710_v43 = vld [vmem:[#allocation7 + $0x130] sm:$0xff] }
 0x352   :  { %1442 = vmatpush1.msra.mxu1 %v1332_v40  ;;  %1373 = vmatpush1.msra.mxu0 %v1326_v45  ;;  %v1871_v45 = vld [vmem:[#allocation9 + $0x130] sm:$0xff] }
 0x353   :  { %1443 = vmatprep.subr.mxu1 %v1329_v6  ;;  %4429 = vmatmul.mubr.msk.f32.vlgmr.msra.gmra.mxu0 %vm640_vm2, %v7271_v32 }
 0x354   :  { %1444 = vmatpush1.msra.mxu1 %v1328_v57  ;;  %1589 = vmatprep.mubr.f32.mxu0 %v7272_v60 }
 0x355   :  { %4430 = vmatmul.mubr.msk.f32.vlgmr.msra.gmra.mxu1 %vm640_vm2, %v7271_v32 }
 0x356   :  { %1678 = vmatprep.mubr.f32.mxu1 %v7272_v60 }
 0x413   :  { %v1408_v25 = vpop.f32.mrf.mxu0 }
 0x414   :  { %v1491_v56 = vmul.f32 %v1490_v28, %v1408_v25 }
 0x415   :  { %v1479_v8 = vpop.f32.mrf.mxu1  ;;  %v1410_v33 = vpop.f32.mrf.mxu0 }
 0x416   :  { %v1492_v27 = vmul.f32 %v1490_v28, %v1410_v33  ;;  %v1493_v37 = vmul.f32 %v1490_v28, %v1479_v8 }
 0x417   :  { %v1481_v19 = vpop.f32.mrf.mxu1 }
 0x418   :  { %v1499_v39 = vcombine.low %v1491_v56, %v1492_v27  ;;  %v1494_v44 = vmul.f32 %v1490_v28, %v1481_v19  ;;  %v1709_v28 = vld [vmem:[#allocation7 + $0x128] sm:$0xff] }
 0x41a   :  { %v1503_v3 = vsub.f32 %v1488_v22, %v1499_v39  ;;  %v1500_v50 = vcombine.low %v1493_v37, %v1494_v44  ;;  %v1711_v22 = vld [vmem:[#allocation7 + $0x138] sm:$0xff] }
 0x41b   :  { %v1872_v37 = vld [vmem:[#allocation9 + $0x138] sm:$0xff] }
 0x41c   :  { %v6142_v11 = vadd.f32 %v1509_v41, %v1503_v3  ;;  %v1504_v2 = vsub.f32 %v1489_v29, %v1500_v50 }
 0x41e   :  { %7275 = vst [vmem:[#allocation21_spill] sm:$0xff] %v6142_v11  ;;  %v6144_v23 = vadd.f32 %v1510_v20, %v1504_v2  ;;  %v1515_v14 = vcombine.high %v6142_v11, %v6142_v11 }
 0x420   :  { %7276 = vst [vmem:[#allocation22_spill] sm:$0xff] %v6144_v23  ;;  %4434 = vmatprep.subr.msk.mxu0 %vm117_vm0, %v1515_v14  ;;  %v1516_v62 = vcombine.high %v6144_v23, %v6144_v23 }
 0x421   :  { %4435 = vmatpush1.msk.msra.mxu0 %vm117_vm0, %v6142_v11 }
 0x422   :  { %4440 = vmatprep.subr.msk.mxu1 %vm117_vm0, %v1516_v62  ;;  %4436 = vmatmul.mubr.msk.f32.vlgmr.msra.gmra.mxu0 %vm104_vm1, %v6157_v15 }
 0x423   :  { %4441 = vmatpush1.msk.msra.mxu1 %vm117_vm0, %v6144_v23  ;;  %1595 = vmatprep.mubr.f32.mxu0 %v7272_v60 }
 0x424   :  { %4442 = vmatmul.mubr.msk.f32.vlgmr.msra.gmra.mxu1 %vm104_vm1, %v6157_v15 }
 0x425   :  { %1684 = vmatprep.mubr.f32.mxu1 %v7272_v60 }
 0x426   :  { %4437 = vmatmul.mubr.msk.f32.gmra.mxu0 %vm104_vm1, %v6170_v4 }
 0x427   :  { %1601 = vmatprep.mubr.f32.mxu0 %v7272_v60 }
 0x428   :  { %4443 = vmatmul.mubr.msk.f32.gmra.mxu1 %vm104_vm1, %v6170_v4 }
 0x429   :  { %1690 = vmatprep.mubr.f32.mxu1 %v7272_v60 }
 0x42a   :  { %4438 = vmatmul.mubr.msk.f32.gmra.mxu0 %vm104_vm1, %v6181_v24 }
 0x42b   :  { %1607 = vmatprep.mubr.f32.mxu0 %v7272_v60 }
 0x42c   :  { %4444 = vmatmul.mubr.msk.f32.gmra.mxu1 %vm104_vm1, %v6181_v24 }
 0x42d   :  { %1696 = vmatprep.mubr.f32.mxu1 %v7272_v60 }
 0x42e   :  { %4439 = vmatmul.mubr.msk.f32.gmra.mxu0 %vm104_vm1, %v6192_v59 }
 0x42f   :  { %2105 = vmatprep.mubr.f32.mxu0 %v7272_v60 }
 0x430   :  { %4445 = vmatmul.mubr.msk.f32.gmra.mxu1 %vm104_vm1, %v6192_v59 }
 0x431   :  { %2176 = vmatprep.mubr.f32.mxu1 %v7272_v60 }
 0x4e2   :  { %v1591_v10 = vpop.f32.mrf.mxu0 }
 0x4e3   :  { %v6200_v7 = vadd.f32 %v1704_v49, %v1591_v10  ;;  %v6202_v21 = vadd.f32 %v1865_v35, %v1591_v10 }
 0x4e4   :  { %v1680_v16 = vpop.f32.mrf.mxu1  ;;  %v1593_v17 = vpop.f32.mrf.mxu0 }
 0x4e5   :  { %v4446_v51 = vmul.f32 -1.442695, %v6200_v7  ;;  %v4462_v42 = vmul.f32 -1.442695, %v6202_v21  ;;  %v6206_v18 = vadd.f32 %v1706_v12, %v1680_v16  ;;  %v6208_v63 = vadd.f32 %v1867_v5, %v1680_v16 }
 0x4e6   :  { %v6210_v34 = vadd.f32 %v1705_v61, %v1593_v17  ;;  %v6212_v46 = vadd.f32 %v1866_v30, %v1593_v17  ;;  %v1682_v9 = vpop.f32.mrf.mxu1  ;;  %v1597_v52 = vpop.f32.mrf.mxu0 }
 0x4e7   :  { %4901 = vpow2.f32 %v4446_v51  ;;  %v4448_v31 = vmul.f32 -1.442695, %v6206_v18  ;;  %v4464_v0 = vmul.f32 -1.442695, %v6208_v63  ;;  %v6216_v47 = vadd.f32 %v1707_v38, %v1682_v9 }
 0x4e8   :  { %4903 = vpow2.f32 %v4462_v42  ;;  %v4447_v40 = vmul.f32 -1.442695, %v6210_v34  ;;  %v4463_v6 = vmul.f32 -1.442695, %v6212_v46  ;;  %v6220_v57 = vadd.f32 %v1868_v55, %v1682_v9  ;;  %v1686_v32 = vpop.f32.mrf.mxu1  ;;  %v1599_v25 = vpop.f32.mrf.mxu0 }
 0x4e9   :  { %4905 = vpow2.f32 %v4448_v31  ;;  %v4449_v1 = vmul.f32 -1.442695, %v6216_v47  ;;  %v6223_v8 = vadd.f32 %v1708_v36, %v1597_v52  ;;  %v6225_v33 = vadd.f32 %v1869_v26, %v1597_v52  ;;  %v1712_v31 = vld [vmem:[#allocation7 + $0x140] sm:$0xff] }
 0x4ea   :  { %4907 = vpow2.f32 %v4464_v0  ;;  %v4465_v58 = vmul.f32 -1.442695, %v6220_v57  ;;  %v6228_v56 = vadd.f32 %v1710_v43, %v1686_v32  ;;  %v6230_v27 = vadd.f32 %v1871_v45, %v1686_v32  ;;  %v1688_v54 = vpop.f32.mrf.mxu1  ;;  %v1603_v26 = vpop.f32.mrf.mxu0  ;;  %v1873_v45 = vld [vmem:[#allocation9 + $0x140] sm:$0xff] }
 0x4eb   :  { %4909 = vpow2.f32 %v4447_v40  ;;  %v4450_v19 = vmul.f32 -1.442695, %v6223_v8  ;;  %v6233_v13 = vadd.f32 %v1709_v28, %v1599_v25  ;;  %v4466_v39 = vmul.f32 -1.442695, %v6225_v33 }
 0x4ec   :  { %4911 = vpow2.f32 %v4463_v6  ;;  %v6236_v41 = vadd.f32 %v1870_v48, %v1599_v25  ;;  %v4452_v44 = vmul.f32 -1.442695, %v6228_v56  ;;  %v6239_v3 = vadd.f32 %v1711_v22, %v1688_v54  ;;  %v1692_v32 = vpop.f32.mrf.mxu1  ;;  %v1714_v25 = vld [vmem:[#allocation7 + $0x150] sm:$0xff] }
 0x4ed   :  { %4913 = vpow2.f32 %v4449_v1  ;;  %v4468_v53 = vmul.f32 -1.442695, %v6230_v27  ;;  %v6242_v29 = vadd.f32 %v1872_v37, %v1688_v54  ;;  %v4451_v50 = vmul.f32 -1.442695, %v6233_v13  ;;  %v1605_v37 = vpop.f32.mrf.mxu0 }
 0x4ee   :  { %4915 = vpow2.f32 %v4465_v58  ;;  %v4467_v20 = vmul.f32 -1.442695, %v6236_v41  ;;  %v4453_v2 = vmul.f32 -1.442695, %v6239_v3  ;;  %v6248_v48 = vadd.f32 %v1712_v31, %v1603_v26  ;;  %v1875_v58 = vld [vmem:[#allocation9 + $0x150] sm:$0xff] }
 0x4ef   :  { %4917 = vpow2.f32 %v4450_v19  ;;  %v4469_v14 = vmul.f32 -1.442695, %v6242_v29  ;;  %v6250_v19 = vadd.f32 %v1873_v45, %v1603_v26  ;;  %v1877_v26 = vld [vmem:[#allocation9 + $0x160] sm:$0xff] }
 0x4f0   :  { %4919 = vpow2.f32 %v4466_v39  ;;  %v1713_v39 = vld [vmem:[#allocation7 + $0x148] sm:$0xff] }
 0x4f1   :  { %4921 = vpow2.f32 %v4452_v44 }
 0x4f2   :  { %4923 = vpow2.f32 %v4468_v53 }
 0x4f3   :  { %4925 = vpow2.f32 %v4451_v50  ;;  %v6252_v50 = vadd.f32 %v1714_v25, %v1692_v32 }
 0x4f4   :  { %v4902_v62 = vpop.eup %4901  ;;  %4927 = vpow2.f32 %v4467_v20  ;;  %v1874_v20 = vld [vmem:[#allocation9 + $0x148] sm:$0xff] }
 0x4f5   :  { %v4904_v49 = vpop.eup %4903  ;;  %v1784_v35 = vadd.f32 1.0, %v4902_v62  ;;  %4929 = vpow2.f32 %v4453_v2  ;;  %v6254_v62 = vadd.f32 %v1875_v58, %v1692_v32 }
 0x4f6   :  { %v4906_v10 = vpop.eup %4905  ;;  %v1945_v12 = vadd.f32 1.0, %v4904_v49  ;;  %4931 = vpow2.f32 %v4469_v14  ;;  %v1694_v49 = vpop.f32.mrf.mxu1 }
 0x4f7   :  { %v4908_v5 = vpop.eup %4907  ;;  %4933 = vrcp.f32 %v1784_v35  ;;  %v1786_v61 = vadd.f32 1.0, %v4906_v10  ;;  %v1715_v35 = vld [vmem:[#allocation7 + $0x158] sm:$0xff] }
 0x4f8   :  { %v4910_v30 = vpop.eup %4909  ;;  %4935 = vrcp.f32 %v1945_v12  ;;  %v1947_v16 = vadd.f32 1.0, %v4908_v5  ;;  %v4454_v5 = vmul.f32 -1.442695, %v6248_v48  ;;  %v1698_v45 = vpop.f32.mrf.mxu1 }
 0x4f9   :  { %v4912_v17 = vpop.eup %4911  ;;  %4937 = vrcp.f32 %v1786_v61  ;;  %v1785_v38 = vadd.f32 1.0, %v4910_v30  ;;  %v6257_v61 = vadd.f32 %v1713_v39, %v1605_v37  ;;  %v1876_v30 = vld [vmem:[#allocation9 + $0x158] sm:$0xff] }
 0x4fa   :  { %v4914_v51 = vpop.eup %4913  ;;  %4939 = vrcp.f32 %v1947_v16  ;;  %v1946_v42 = vadd.f32 1.0, %v4912_v17 }
 0x4fb   :  { %v4916_v55 = vpop.eup %4915  ;;  %4941 = vrcp.f32 %v1785_v38  ;;  %v1787_v9 = vadd.f32 1.0, %v4914_v51  ;;  %v4470_v38 = vmul.f32 -1.442695, %v6250_v19  ;;  %v6262_v51 = vadd.f32 %v1874_v20, %v1605_v37  ;;  %v1717_v37 = vld [vmem:[#allocation7 + $0x168] sm:$0xff] }
 0x4fc   :  { %v4918_v52 = vpop.eup %4917  ;;  %4943 = vrcp.f32 %v1946_v42  ;;  %v1948_v36 = vadd.f32 1.0, %v4916_v55  ;;  %v1609_v42 = vpop.f32.mrf.mxu0  ;;  %v1716_v55 = vld [vmem:[#allocation7 + $0x160] sm:$0xff]  ;;  %v4455_v32 = vmul.f32 -1.442695, %v6257_v61  ;;  %v1878_v20 = vld [vmem:[#allocation9 + $0x168] sm:$0xff] }
 0x4fd   :  { %v4920_v0 = vpop.eup %4919  ;;  %4945 = vrcp.f32 %v1787_v9  ;;  %v1788_v43 = vadd.f32 1.0, %v4918_v52  ;;  %v4456_v52 = vmul.f32 -1.442695, %v6252_v50  ;;  %v6277_v25 = vadd.f32 %v1716_v55, %v1609_v42 }
 0x4fe   :  { %v4922_v40 = vpop.eup %4921  ;;  %4947 = vrcp.f32 %v1948_v36  ;;  %v1949_v6 = vadd.f32 1.0, %v4920_v0  ;;  %v6267_v36 = vadd.f32 %v1715_v35, %v1694_v49  ;;  %v4472_v0 = vmul.f32 -1.442695, %v6254_v62  ;;  %v1700_v35 = vpop.f32.mrf.mxu1 }
 0x4ff   :  { %v4924_v28 = vpop.eup %4923  ;;  %4949 = vrcp.f32 %v1788_v43  ;;  %v1790_v1 = vadd.f32 1.0, %v4922_v40  ;;  %v6272_v43 = vadd.f32 %v1876_v30, %v1694_v49  ;;  %v1718_v40 = vld [vmem:[#allocation7 + $0x170] sm:$0xff]  ;;  %v4471_v58 = vmul.f32 -1.442695, %v6262_v51 }
 0x500   :  { %v4926_v54 = vpop.eup %4925  ;;  %4951 = vrcp.f32 %v1949_v6  ;;  %v1951_v22 = vadd.f32 1.0, %v4924_v28  ;;  %v1879_v28 = vld [vmem:[#allocation9 + $0x170] sm:$0xff] }
 0x501   :  { %v4928_v44 = vpop.eup %4927  ;;  %4953 = vrcp.f32 %v1790_v1  ;;  %v1789_v53 = vadd.f32 1.0, %v4926_v54  ;;  %v6282_v54 = vadd.f32 %v1877_v26, %v1609_v42  ;;  %v6292_v49 = vadd.f32 %v1879_v28, %v1698_v45 }
 0x502   :  { %v4930_v2 = vpop.eup %4929  ;;  %4955 = vrcp.f32 %v1951_v22  ;;  %v1950_v14 = vadd.f32 1.0, %v4928_v44  ;;  %v1611_v22 = vpop.f32.mrf.mxu0  ;;  %v4457_v44 = vmul.f32 -1.442695, %v6267_v36 }
 0x503   :  { %v4932_v10 = vpop.eup %4931  ;;  %4957 = vrcp.f32 %v1789_v53  ;;  %v1791_v12 = vadd.f32 1.0, %v4930_v2  ;;  %v6287_v53 = vadd.f32 %v1718_v40, %v1698_v45  ;;  %v6297_v30 = vadd.f32 %v1717_v37, %v1611_v22 }
 0x504   :  { %v6259_v16 = vpop.eup %4933  ;;  %4959 = vrcp.f32 %v1950_v14  ;;  %v1952_v17 = vadd.f32 1.0, %v4932_v10  ;;  %v4473_v14 = vmul.f32 -1.442695, %v6272_v43  ;;  %v1719_v10 = vld [vmem:[#allocation7 + $0x178] sm:$0xff]  ;;  %v4474_v42 = vmul.f32 -1.442695, %v6282_v54 }
 0x505   :  { %v6264_v9 = vpop.eup %4935  ;;  %4961 = vrcp.f32 %v1791_v12  ;;  %v6302_v55 = vadd.f32 %v1878_v20, %v1611_v22  ;;  %v4460_v26 = vmul.f32 -1.442695, %v6287_v53  ;;  %v4476_v40 = vmul.f32 -1.442695, %v6292_v49 }
 0x506   :  { %v6269_v31 = vpop.eup %4937  ;;  %4963 = vrcp.f32 %v1952_v17  ;;  %v1880_v17 = vld [vmem:[#allocation9 + $0x178] sm:$0xff] }
 0x507   :  { %v6274_v6 = vpop.eup %4939  ;;  %4965 = vpow2.f32 %v4454_v5  ;;  %v4458_v5 = vmul.f32 -1.442695, %v6277_v25  ;;  %v4475_v37 = vmul.f32 -1.442695, %v6302_v55 }
 0x508   :  { %v6279_v1 = vpop.eup %4941  ;;  %4967 = vpow2.f32 %v4470_v38 }
 0x509   :  { %v6284_v39 = vpop.eup %4943  ;;  %4969 = vpow2.f32 %v4456_v52 }
 0x50a   :  { %v6289_v2 = vpop.eup %4945  ;;  %4971 = vpow2.f32 %v4472_v0  ;;  %v6307_v0 = vadd.f32 %v1719_v10, %v1700_v35 }
 0x50b   :  { %v6294_v12 = vpop.eup %4947  ;;  %4973 = vpow2.f32 %v4455_v32  ;;  %v6312_v32 = vadd.f32 %v1880_v17, %v1700_v35 }
 0x50c   :  { %v6299_v38 = vpop.eup %4949  ;;  %4975 = vpow2.f32 %v4471_v58  ;;  %v4459_v58 = vmul.f32 -1.442695, %v6297_v30  ;;  %v4461_v20 = vmul.f32 -1.442695, %v6307_v0 }
 0x50d   :  { %v6304_v52 = vpop.eup %4951  ;;  %4977 = vpow2.f32 %v4457_v44  ;;  %7281 = vst [vmem:[#allocation19_spill] sm:$0xff] %v6312_v32  ;;  %v4477_v35 = vmul.f32 -1.442695, %v6312_v32 }
 0x50e   :  { %v6309_v45 = vpop.eup %4953  ;;  %4979 = vpow2.f32 %v4473_v14 }
 0x50f   :  { %v6314_v28 = vpop.eup %4955  ;;  %4981 = vpow2.f32 %v4458_v5 }
 0x510   :  { %v6317_v22 = vpop.eup %4957  ;;  %4983 = vpow2.f32 %v4474_v42 }
 0x511   :  { %v6320_v44 = vpop.eup %4959  ;;  %4985 = vpow2.f32 %v4460_v26 }
 0x512   :  { %v6323_v14 = vpop.eup %4961  ;;  %4987 = vpow2.f32 %v4476_v40 }
 0x513   :  { %v6326_v10 = vpop.eup %4963  ;;  %4989 = vpow2.f32 %v4459_v58 }
 0x514   :  { %v4966_v5 = vpop.eup %4965  ;;  %4991 = vpow2.f32 %v4475_v37 }
 0x515   :  { %v4968_v17 = vpop.eup %4967  ;;  %v1792_v59 = vadd.f32 1.0, %v4966_v5  ;;  %4993 = vpow2.f32 %v4461_v20 }
 0x516   :  { %v4970_v42 = vpop.eup %4969  ;;  %v1953_v24 = vadd.f32 1.0, %v4968_v17  ;;  %4995 = vpow2.f32 %v4477_v35 }
 0x517   :  { %v4972_v4 = vpop.eup %4971  ;;  %4997 = vrcp.f32 %v1792_v59  ;;  %v1794_v26 = vadd.f32 1.0, %v4970_v42 }
 0x518   :  { %v4974_v15 = vpop.eup %4973  ;;  %4999 = vrcp.f32 %v1953_v24  ;;  %v1955_v23 = vadd.f32 1.0, %v4972_v4 }
 0x519   :  { %v4976_v40 = vpop.eup %4975  ;;  %5001 = vrcp.f32 %v1794_v26  ;;  %v1793_v11 = vadd.f32 1.0, %v4974_v15 }
 0x51a   :  { %v4978_v60 = vpop.eup %4977  ;;  %5003 = vrcp.f32 %v1955_v23  ;;  %v1954_v58 = vadd.f32 1.0, %v4976_v40 }
 0x51b   :  { %v4980_v32 = vpop.eup %4979  ;;  %5005 = vrcp.f32 %v1793_v11  ;;  %v1795_v37 = vadd.f32 1.0, %v4978_v60 }
 0x51c   :  { %v4982_v5 = vpop.eup %4981  ;;  %5007 = vrcp.f32 %v1954_v58  ;;  %v1956_v20 = vadd.f32 1.0, %v4980_v32 }
 0x51d   :  { %v4984_v17 = vpop.eup %4983  ;;  %5009 = vrcp.f32 %v1795_v37  ;;  %v1796_v35 = vadd.f32 1.0, %v4982_v5 }
 0x51e   :  { %v4986_v59 = vpop.eup %4985  ;;  %5011 = vrcp.f32 %v1956_v20  ;;  %v1957_v42 = vadd.f32 1.0, %v4984_v17 }
 0x51f   :  { %v4988_v24 = vpop.eup %4987  ;;  %5013 = vrcp.f32 %v1796_v35  ;;  %v1798_v4 = vadd.f32 1.0, %v4986_v59  ;;  %v1832_v59 = vmul.f32 %v6259_v16, %v6200_v7 }
 0x520   :  { %v4990_v26 = vpop.eup %4989  ;;  %5015 = vrcp.f32 %v1957_v42  ;;  %v1959_v15 = vadd.f32 1.0, %v4988_v24  ;;  %v1993_v42 = vmul.f32 %v6264_v9, %v6202_v21  ;;  %v6346_v21 = vmul.f32 %v6269_v31, %v6206_v18 }
 0x521   :  { %v4992_v23 = vpop.eup %4991  ;;  %5017 = vrcp.f32 %v1798_v4  ;;  %v1797_v40 = vadd.f32 1.0, %v4990_v26  ;;  %v1833_v4 = vmul.f32 %v6279_v1, %v6210_v34  ;;  %v6340_v7 = vmul.f32 3.0, %v1832_v59  ;;  %v7282_v59 = vld [vmem:[#allocation19_spill] sm:$0xff] }
 0x522   :  { %v4994_v11 = vpop.eup %4993  ;;  %5019 = vrcp.f32 %v1959_v15  ;;  %v1958_v60 = vadd.f32 1.0, %v4992_v23  ;;  %v1994_v15 = vmul.f32 %v6284_v39, %v6212_v46  ;;  %v1836_v23 = vmul.f32 %v6299_v38, %v6223_v8 }
 0x523   :  { %v4996_v58 = vpop.eup %4995  ;;  %5021 = vrcp.f32 %v1797_v40  ;;  %v1799_v32 = vadd.f32 1.0, %v4994_v11  ;;  %v1837_v11 = vmul.f32 %v6317_v22, %v6233_v13  ;;  %v6342_v16 = vmul.f32 2.0, %v1993_v42 }
 0x524   :  { %v4998_v37 = vpop.eup %4997  ;;  %5023 = vrcp.f32 %v1958_v60  ;;  %v1960_v5 = vadd.f32 1.0, %v4996_v58  ;;  %v1998_v34 = vmul.f32 %v6320_v44, %v6236_v41  ;;  %v6352_v8 = vmul.f32 %v6274_v6, %v6208_v63 }
 0x525   :  { %v5000_v20 = vpop.eup %4999  ;;  %5025 = vrcp.f32 %v1799_v32  ;;  %v6354_v9 = vmul.f32 3.0, %v1833_v4  ;;  %v1835_v13 = vmul.f32 %v6289_v2, %v6216_v47  ;;  %v1840_v1 = vmul.f32 %v4998_v37, %v6248_v48 }
 0x526   :  { %v5002_v17 = vpop.eup %5001  ;;  %5027 = vrcp.f32 %v1960_v5  ;;  %v6359_v38 = vmul.f32 2.0, %v1994_v15  ;;  %v1996_v18 = vmul.f32 %v6294_v12, %v6220_v57  ;;  %v6363_v31 = vmul.f32 3.0, %v1836_v23 }
 0x527   :  { %v5004_v35 = vpop.eup %5003  ;;  %v1997_v41 = vmul.f32 %v6304_v52, %v6225_v33  ;;  %v1838_v6 = vmul.f32 %v6309_v45, %v6228_v56  ;;  %v1999_v47 = vmul.f32 %v6314_v28, %v6230_v27  ;;  %v6371_v2 = vmul.f32 3.0, %v1837_v11 }
 0x528   :  { %v5006_v24 = vpop.eup %5005  ;;  %v1839_v48 = vmul.f32 %v6323_v14, %v6239_v3  ;;  %v6375_v44 = vmul.f32 2.0, %v1998_v34  ;;  %v2000_v57 = vmul.f32 %v6326_v10, %v6242_v29  ;;  %v1856_v56 = vmul.f32 3.0, %v1840_v1 }
 0x529   :  { %v5008_v26 = vpop.eup %5007  ;;  %v2001_v45 = vmul.f32 %v5000_v20, %v6250_v19  ;;  %v1841_v27 = vmul.f32 %v5006_v24, %v6257_v61  ;;  %v1842_v3 = vmul.f32 %v5002_v17, %v6252_v50  ;;  %v2015_v1 = vmul.f32 2.0, %v1999_v47 }
 0x52a   :  { %v5010_v40 = vpop.eup %5009  ;;  %v2002_v28 = vmul.f32 %v5008_v26, %v6262_v51  ;;  %v1855_v11 = vmul.f32 3.0, %v1839_v48  ;;  %v2011_v48 = vmul.f32 2.0, %v6352_v8 }
 0x52b   :  { %v5012_v60 = vpop.eup %5011  ;;  %v1843_v10 = vmul.f32 %v5010_v40, %v6267_v36  ;;  %v2017_v42 = vmul.f32 2.0, %v2001_v45  ;;  %v1858_v15 = vmul.f32 3.0, %v1842_v3  ;;  %v7285_v3 = vld [vmem:[#allocation21_spill] sm:$0xff] }
 0x52c   :  { %v5014_v46 = vpop.eup %5013  ;;  %v2004_v19 = vmul.f32 %v5012_v60, %v6272_v43  ;;  %v2018_v17 = vmul.f32 2.0, %v2002_v28  ;;  %v2016_v60 = vmul.f32 2.0, %v2000_v57 }
 0x52d   :  { %v5016_v39 = vpop.eup %5015  ;;  %v1844_v33 = vmul.f32 %v5014_v46, %v6277_v25  ;;  %v1859_v36 = vmul.f32 3.0, %v1843_v10  ;;  %v1854_v46 = vmul.f32 3.0, %v1838_v6 }
 0x52e   :  { %v5018_v63 = vpop.eup %5017  ;;  %v2005_v12 = vmul.f32 %v5016_v39, %v6282_v54  ;;  %v2003_v54 = vmul.f32 %v5004_v35, %v6254_v62  ;;  %v2020_v4 = vmul.f32 2.0, %v2004_v19  ;;  %v2033_v39 = vsub.f32 %v1856_v56, %v2017_v42  ;;  %v2205_v56 = vld [vmem:[#allocation10 + $0x20] sm:$0xff] }
 0x52f   :  { %v5020_v22 = vpop.eup %5019  ;;  %v1846_v14 = vmul.f32 %v5018_v63, %v6287_v53  ;;  %v1860_v51 = vmul.f32 3.0, %v1844_v33  ;;  %v1857_v53 = vmul.f32 3.0, %v1841_v27  ;;  %v2012_v33 = vmul.f32 2.0, %v1996_v18  ;;  %v7290_v42 = vld [vmem:[#allocation20_spill] sm:$0xff] }
 0x530   :  { %v5022_v52 = vpop.eup %5021  ;;  %v2007_v32 = vmul.f32 %v5020_v22, %v6292_v49  ;;  %v2021_v5 = vmul.f32 2.0, %v2005_v12  ;;  %v2019_v23 = vmul.f32 2.0, %v2003_v54  ;;  %v1851_v22 = vmul.f32 3.0, %v1835_v13 }
 0x531   :  { %v5024_v58 = vpop.eup %5023  ;;  %v1845_v29 = vmul.f32 %v5022_v52, %v6297_v30  ;;  %v1862_v24 = vmul.f32 3.0, %v1846_v14  ;;  %v2034_v34 = vsub.f32 %v1857_v53, %v2018_v17  ;;  %v2036_v12 = vsub.f32 %v1859_v36, %v2020_v4  ;;  %v2564_v36 = vld [vmem:[#allocation9 + $0x180] sm:$0xff] }
 0x532   :  { %v5026_v25 = vpop.eup %5025  ;;  %v2006_v61 = vmul.f32 %v5024_v58, %v6302_v55  ;;  %v2023_v62 = vmul.f32 2.0, %v2007_v32  ;;  %v2013_v55 = vmul.f32 2.0, %v1997_v41  ;;  %v2037_v40 = vsub.f32 %v1860_v51, %v2021_v5 }
 0x533   :  { %v5028_v37 = vpop.eup %5027  ;;  %v1861_v20 = vmul.f32 3.0, %v1845_v29  ;;  %v1847_v50 = vmul.f32 %v5026_v25, %v6307_v0  ;;  %v2030_v41 = vsub.f32 %v6371_v2, %v6375_v44  ;;  %v1850_v52 = vmul.f32 3.0, %v6346_v21  ;;  %v2206_v29 = vld [vmem:[#allocation10 + $0x28] sm:$0xff] }
 0x534   :  { %v2022_v49 = vmul.f32 2.0, %v2006_v61  ;;  %v2008_v30 = vmul.f32 %v5028_v37, %v7282_v59  ;;  %v2039_v63 = vsub.f32 %v1862_v24, %v2023_v62  ;;  %v2029_v57 = vsub.f32 %v6363_v31, %v2013_v55  ;;  %v6406_v31 = vld [vmem:[%s7194_s5] sm:$0xf]  ;;  %v7291_v24 = vld [vmem:[#allocation24_spill] sm:$0xff] }
 0x535   :  { %v1863_v35 = vmul.f32 3.0, %v1847_v50  ;;  %v2035_v45 = vsub.f32 %v1858_v15, %v2019_v23  ;;  %v2032_v6 = vsub.f32 %v1855_v11, %v2016_v60  ;;  %v2026_v13 = vsub.f32 %v6354_v9, %v6359_v38  ;;  %7283 = vst [vmem:[#allocation19_spill] sm:$0xff] %v6406_v31  ;;  %v7286_v37 = vld [vmem:[#allocation22_spill] sm:$0xff]  ;;  %v2404_v23 = vld [vmem:[#allocation7 + $0x188] sm:$0xff] }
 0x536   :  { %v2024_v43 = vmul.f32 2.0, %v2008_v30  ;;  %v2038_v26 = vsub.f32 %v1861_v20, %v2022_v49  ;;  %v2025_v18 = vsub.f32 %v6340_v7, %v6342_v16  ;;  %v2031_v47 = vsub.f32 %v1854_v46, %v2015_v1  ;;  %v7289_v30 = vld [vmem:[#allocation23_spill] sm:$0xff]  ;;  %v7292_v62 = vld [vmem:[#allocation18_spill] sm:$0xff] }
 0x537   :  { %v2028_v21 = vsub.f32 %v1851_v22, %v2012_v33  ;;  %v2027_v8 = vsub.f32 %v1850_v52, %v2011_v48  ;;  %v7284_v7 = vmov 0.0   ;;  %v2189_v9 = vstv %s4481_s25  ;;  %v2407_v52 = vld [vmem:[#allocation7 + $0x1a0] sm:$0xff] }
 0x538   :  { %2065 = vmatprep.subr.mxu0 %v2038_v26  ;;  %v2040_v0 = vsub.f32 %v1863_v35, %v2024_v43  ;;  %v2186_v38 = vstv %s4480_s26  ;;  %v2207_v27 = vstv %s4482_s3  ;;  %v2403_v35 = vld [vmem:[#allocation7 + $0x180] sm:$0xff]  ;;  %v2405_v43 = vld [vmem:[#allocation7 + $0x190] sm:$0xff] }
 0x539   :  { %2066 = vmatpush1.msra.mxu0 %v2037_v40  ;;  %v2187_v14 = vmul.f32 %v2186_v38, %v7285_v3  ;;  %v2208_v10 = vmul.f32 %v2207_v27, %v2205_v56  ;;  %v2188_v51 = vmul.f32 %v2186_v38, %v7286_v37  ;;  %v2209_v20 = vmul.f32 %v2207_v27, %v2206_v29  ;;  %v2566_v26 = vld [vmem:[#allocation9 + $0x190] sm:$0xff]  ;;  %v2565_v40 = vld [vmem:[#allocation9 + $0x188] sm:$0xff]  ;;  %v2568_v48 = vld [vmem:[#allocation9 + $0x1a0] sm:$0xff] }
 0x53a   :  { %2136 = vmatprep.subr.mxu1 %v2040_v0  ;;  %2067 = vmatprep.subr.mxu0 %v2034_v34  ;;  %v2406_v0 = vld [vmem:[#allocation7 + $0x198] sm:$0xff]  ;;  %v2408_v38 = vld [vmem:[#allocation7 + $0x1a8] sm:$0xff] }
 0x53b   :  { %2137 = vmatpush1.msra.mxu1 %v2039_v63  ;;  %2068 = vmatpush1.msra.mxu0 %v2033_v39  ;;  %v2567_v63 = vld [vmem:[#allocation9 + $0x198] sm:$0xff]  ;;  %v2569_v27 = vld [vmem:[#allocation9 + $0x1a8] sm:$0xff] }
 0x53c   :  { %2138 = vmatprep.subr.mxu1 %v2036_v12  ;;  %2069 = vmatprep.subr.mxu0 %v2030_v41 }
 0x53d   :  { %2139 = vmatpush1.msra.mxu1 %v2035_v45  ;;  %2070 = vmatpush1.msra.mxu0 %v2029_v57 }
 0x53e   :  { %2140 = vmatprep.subr.mxu1 %v2032_v6  ;;  %2071 = vmatprep.subr.mxu0 %v2026_v13  ;;  %v2409_v13 = vld [vmem:[#allocation7 + $0x1b0] sm:$0xff] }
 0x53f   :  { %2141 = vmatpush1.msra.mxu1 %v2031_v47  ;;  %2072 = vmatpush1.msra.mxu0 %v2025_v18  ;;  %v2570_v18 = vld [vmem:[#allocation9 + $0x1b0] sm:$0xff] }
 0x540   :  { %2142 = vmatprep.subr.mxu1 %v2028_v21  ;;  %4478 = vmatmul.mubr.msk.f32.vlgmr.msra.gmra.mxu0 %vm640_vm2, %v6406_v31 }
 0x541   :  { %2143 = vmatpush1.msra.mxu1 %v2027_v8  ;;  %2288 = vmatprep.mubr.f32.mxu0 %v7284_v7 }
 0x542   :  { %4479 = vmatmul.mubr.msk.f32.vlgmr.msra.gmra.mxu1 %vm640_vm2, %v6406_v31 }
 0x543   :  { %2377 = vmatprep.mubr.f32.mxu1 %v7284_v7 }
 0x600   :  { %v2107_v16 = vpop.f32.mrf.mxu0 }
 0x601   :  { %v2190_v28 = vmul.f32 %v2189_v9, %v2107_v16 }
 0x602   :  { %v2178_v2 = vpop.f32.mrf.mxu1  ;;  %v2109_v44 = vpop.f32.mrf.mxu0 }
 0x603   :  { %v2191_v58 = vmul.f32 %v2189_v9, %v2109_v44  ;;  %v2192_v25 = vmul.f32 %v2189_v9, %v2178_v2 }
 0x604   :  { %v2180_v32 = vpop.f32.mrf.mxu1 }
 0x605   :  { %v2198_v54 = vcombine.low %v2190_v28, %v2191_v58  ;;  %v2193_v19 = vmul.f32 %v2189_v9, %v2180_v32  ;;  %v2410_v32 = vld [vmem:[#allocation7 + $0x1b8] sm:$0xff] }
 0x607   :  { %v2202_v61 = vsub.f32 %v2187_v14, %v2198_v54  ;;  %v2199_v5 = vcombine.low %v2192_v25, %v2193_v19  ;;  %v2571_v54 = vld [vmem:[#allocation9 + $0x1b8] sm:$0xff] }
 0x609   :  { %v6416_v50 = vadd.f32 %v2208_v10, %v2202_v61  ;;  %v2203_v53 = vsub.f32 %v2188_v51, %v2199_v5 }
 0x60b   :  { %7287 = vst [vmem:[#allocation21_spill] sm:$0xff] %v6416_v50  ;;  %v6418_v17 = vadd.f32 %v2209_v20, %v2203_v53  ;;  %v2214_v49 = vcombine.high %v6416_v50, %v6416_v50 }
 0x60d   :  { %7288 = vst [vmem:[#allocation22_spill] sm:$0xff] %v6418_v17  ;;  %4483 = vmatprep.subr.msk.mxu0 %vm117_vm0, %v2214_v49  ;;  %v2215_v59 = vcombine.high %v6418_v17, %v6418_v17 }
 0x60e   :  { %4484 = vmatpush1.msk.msra.mxu0 %vm117_vm0, %v6416_v50 }
 0x60f   :  { %4489 = vmatprep.subr.msk.mxu1 %vm117_vm0, %v2215_v59  ;;  %4485 = vmatmul.mubr.msk.f32.vlgmr.msra.gmra.mxu0 %vm104_vm1, %v7289_v30 }
 0x610   :  { %4490 = vmatpush1.msk.msra.mxu1 %vm117_vm0, %v6418_v17  ;;  %2294 = vmatprep.mubr.f32.mxu0 %v7284_v7 }
 0x611   :  { %4491 = vmatmul.mubr.msk.f32.vlgmr.msra.gmra.mxu1 %vm104_vm1, %v7289_v30 }
 0x612   :  { %2383 = vmatprep.mubr.f32.mxu1 %v7284_v7 }
 0x613   :  { %4486 = vmatmul.mubr.msk.f32.gmra.mxu0 %vm104_vm1, %v7290_v42 }
 0x614   :  { %2300 = vmatprep.mubr.f32.mxu0 %v7284_v7 }
 0x615   :  { %4492 = vmatmul.mubr.msk.f32.gmra.mxu1 %vm104_vm1, %v7290_v42 }
 0x616   :  { %2389 = vmatprep.mubr.f32.mxu1 %v7284_v7 }
 0x617   :  { %4487 = vmatmul.mubr.msk.f32.gmra.mxu0 %vm104_vm1, %v7291_v24 }
 0x618   :  { %2306 = vmatprep.mubr.f32.mxu0 %v7284_v7 }
 0x619   :  { %4493 = vmatmul.mubr.msk.f32.gmra.mxu1 %vm104_vm1, %v7291_v24 }
 0x61a   :  { %2395 = vmatprep.mubr.f32.mxu1 %v7284_v7 }
 0x61b   :  { %4488 = vmatmul.mubr.msk.f32.gmra.mxu0 %vm104_vm1, %v7292_v62 }
 0x61c   :  { %2804 = vmatprep.mubr.f32.mxu0 %v7284_v7 }
 0x61d   :  { %4494 = vmatmul.mubr.msk.f32.gmra.mxu1 %vm104_vm1, %v7292_v62 }
 0x61e   :  { %2875 = vmatprep.mubr.f32.mxu1 %v7284_v7 }
 0x6cf   :  { %v2290_v4 = vpop.f32.mrf.mxu0 }
 0x6d0   :  { %v6454_v55 = vadd.f32 %v2403_v35, %v2290_v4  ;;  %v6456_v15 = vadd.f32 %v2564_v36, %v2290_v4 }
 0x6d1   :  { %v2379_v11 = vpop.f32.mrf.mxu1  ;;  %v2292_v60 = vpop.f32.mrf.mxu0 }
 0x6d2   :  { %v4495_v34 = vmul.f32 -1.442695, %v6454_v55  ;;  %v4511_v46 = vmul.f32 -1.442695, %v6456_v15  ;;  %v6460_v1 = vadd.f32 %v2405_v43, %v2379_v11  ;;  %v6462_v39 = vadd.f32 %v2566_v26, %v2379_v11 }
 0x6d3   :  { %v6464_v22 = vadd.f32 %v2404_v23, %v2292_v60  ;;  %v6466_v33 = vadd.f32 %v2565_v40, %v2292_v60  ;;  %v2381_v12 = vpop.f32.mrf.mxu1  ;;  %v2296_v41 = vpop.f32.mrf.mxu0 }
 0x6d4   :  { %5029 = vpow2.f32 %v4495_v34  ;;  %v4497_v57 = vmul.f32 -1.442695, %v6460_v1  ;;  %v4513_v45 = vmul.f32 -1.442695, %v6462_v39  ;;  %v6470_v6 = vadd.f32 %v2406_v0, %v2381_v12 }
 0x6d5   :  { %5031 = vpow2.f32 %v4511_v46  ;;  %v4496_v47 = vmul.f32 -1.442695, %v6464_v22  ;;  %v4512_v21 = vmul.f32 -1.442695, %v6466_v33  ;;  %v6474_v8 = vadd.f32 %v2567_v63, %v2381_v12  ;;  %v2385_v16 = vpop.f32.mrf.mxu1  ;;  %v2298_v9 = vpop.f32.mrf.mxu0 }
 0x6d6   :  { %5033 = vpow2.f32 %v4497_v57  ;;  %v4498_v2 = vmul.f32 -1.442695, %v6470_v6  ;;  %v6477_v44 = vadd.f32 %v2407_v52, %v2296_v41  ;;  %v6479_v56 = vadd.f32 %v2568_v48, %v2296_v41  ;;  %v2411_v41 = vld [vmem:[#allocation7 + $0x1c0] sm:$0xff] }
 0x6d7   :  { %5035 = vpow2.f32 %v4513_v45  ;;  %v4514_v28 = vmul.f32 -1.442695, %v6474_v8  ;;  %v6482_v58 = vadd.f32 %v2409_v13, %v2385_v16  ;;  %v6484_v3 = vadd.f32 %v2570_v18, %v2385_v16  ;;  %v2387_v14 = vpop.f32.mrf.mxu1  ;;  %v2302_v12 = vpop.f32.mrf.mxu0  ;;  %v2572_v57 = vld [vmem:[#allocation9 + $0x1c0] sm:$0xff] }
 0x6d8   :  { %5037 = vpow2.f32 %v4496_v47  ;;  %v4499_v29 = vmul.f32 -1.442695, %v6477_v44  ;;  %v6487_v25 = vadd.f32 %v2408_v38, %v2298_v9  ;;  %v4515_v10 = vmul.f32 -1.442695, %v6479_v56  ;;  %v2413_v47 = vld [vmem:[#allocation7 + $0x1d0] sm:$0xff] }
 0x6d9   :  { %5039 = vpow2.f32 %v4512_v21  ;;  %v6490_v19 = vadd.f32 %v2569_v27, %v2298_v9  ;;  %v4501_v61 = vmul.f32 -1.442695, %v6482_v58  ;;  %v6493_v37 = vadd.f32 %v2410_v32, %v2387_v14  ;;  %v2391_v18 = vpop.f32.mrf.mxu1  ;;  %v2574_v38 = vld [vmem:[#allocation9 + $0x1d0] sm:$0xff]  ;;  %v2412_v32 = vld [vmem:[#allocation7 + $0x1c8] sm:$0xff] }
 0x6da   :  { %5041 = vpow2.f32 %v4498_v2  ;;  %v4517_v51 = vmul.f32 -1.442695, %v6484_v3  ;;  %v6496_v5 = vadd.f32 %v2571_v54, %v2387_v14  ;;  %v4500_v20 = vmul.f32 -1.442695, %v6487_v25  ;;  %v2304_v14 = vpop.f32.mrf.mxu0 }
 0x6db   :  { %5043 = vpow2.f32 %v4514_v28  ;;  %v4516_v53 = vmul.f32 -1.442695, %v6490_v19  ;;  %v4502_v49 = vmul.f32 -1.442695, %v6493_v37  ;;  %v6502_v9 = vadd.f32 %v2411_v41, %v2302_v12 }
 0x6dc   :  { %5045 = vpow2.f32 %v4499_v29  ;;  %v4518_v59 = vmul.f32 -1.442695, %v6496_v5  ;;  %v6504_v28 = vadd.f32 %v2572_v57, %v2302_v12 }
 0x6dd   :  { %5047 = vpow2.f32 %v4515_v10  ;;  %v6506_v10 = vadd.f32 %v2413_v47, %v2391_v18 }
 0x6de   :  { %5049 = vpow2.f32 %v4501_v61  ;;  %v2573_v61 = vld [vmem:[#allocation9 + $0x1c8] sm:$0xff] }
 0x6df   :  { %5051 = vpow2.f32 %v4517_v51 }
 0x6e0   :  { %5053 = vpow2.f32 %v4500_v20 }
 0x6e1   :  { %v5030_v30 = vpop.eup %5029  ;;  %5055 = vpow2.f32 %v4516_v53  ;;  %v6508_v53 = vadd.f32 %v2574_v38, %v2391_v18  ;;  %v2416_v38 = vld [vmem:[#allocation7 + $0x1e8] sm:$0xff] }
 0x6e2   :  { %v5032_v42 = vpop.eup %5031  ;;  %v2483_v24 = vadd.f32 1.0, %v5030_v30  ;;  %5057 = vpow2.f32 %v4502_v49  ;;  %v2393_v49 = vpop.f32.mrf.mxu1 }
 0x6e3   :  { %v5034_v62 = vpop.eup %5033  ;;  %v2644_v35 = vadd.f32 1.0, %v5032_v42  ;;  %5059 = vpow2.f32 %v4518_v59  ;;  %v2414_v59 = vld [vmem:[#allocation7 + $0x1d8] sm:$0xff] }
 0x6e4   :  { %v5036_v36 = vpop.eup %5035  ;;  %5061 = vrcp.f32 %v2483_v24  ;;  %v2485_v4 = vadd.f32 1.0, %v5034_v62  ;;  %v4503_v24 = vmul.f32 -1.442695, %v6502_v9  ;;  %v6511_v62 = vadd.f32 %v2412_v32, %v2304_v14  ;;  %v2397_v41 = vpop.f32.mrf.mxu1  ;;  %v2577_v32 = vld [vmem:[#allocation9 + $0x1e8] sm:$0xff] }
 0x6e5   :  { %v5038_v43 = vpop.eup %5037  ;;  %5063 = vrcp.f32 %v2644_v35  ;;  %v2646_v26 = vadd.f32 1.0, %v5036_v36  ;;  %v2575_v35 = vld [vmem:[#allocation9 + $0x1d8] sm:$0xff] }
 0x6e6   :  { %v5040_v23 = vpop.eup %5039  ;;  %5065 = vrcp.f32 %v2485_v4  ;;  %v2484_v40 = vadd.f32 1.0, %v5038_v43  ;;  %v4519_v43 = vmul.f32 -1.442695, %v6504_v28  ;;  %v6526_v12 = vadd.f32 %v2575_v35, %v2393_v49 }
 0x6e7   :  { %v5042_v11 = vpop.eup %5041  ;;  %5067 = vrcp.f32 %v2646_v26  ;;  %v2645_v60 = vadd.f32 1.0, %v5040_v23  ;;  %v6516_v26 = vadd.f32 %v2573_v61, %v2304_v14  ;;  %v2308_v23 = vpop.f32.mrf.mxu0  ;;  %v4504_v57 = vmul.f32 -1.442695, %v6511_v62 }
 0x6e8   :  { %v5044_v0 = vpop.eup %5043  ;;  %5069 = vrcp.f32 %v2484_v40  ;;  %v2486_v34 = vadd.f32 1.0, %v5042_v11  ;;  %v2415_v40 = vld [vmem:[#allocation7 + $0x1e0] sm:$0xff] }
 0x6e9   :  { %v5046_v46 = vpop.eup %5045  ;;  %5071 = vrcp.f32 %v2645_v60  ;;  %v2647_v63 = vadd.f32 1.0, %v5044_v0  ;;  %v4505_v60 = vmul.f32 -1.442695, %v6506_v10  ;;  %v6521_v0 = vadd.f32 %v2414_v59, %v2393_v49 }
 0x6ea   :  { %v5048_v52 = vpop.eup %5047  ;;  %5073 = vrcp.f32 %v2486_v34  ;;  %v2487_v48 = vadd.f32 1.0, %v5046_v46  ;;  %v2576_v34 = vld [vmem:[#allocation9 + $0x1e0] sm:$0xff]  ;;  %v4520_v47 = vmul.f32 -1.442695, %v6516_v26 }
 0x6eb   :  { %v5050_v45 = vpop.eup %5049  ;;  %5075 = vrcp.f32 %v2647_v63  ;;  %v2648_v13 = vadd.f32 1.0, %v5048_v52  ;;  %v4521_v63 = vmul.f32 -1.442695, %v6508_v53  ;;  %v2417_v52 = vld [vmem:[#allocation7 + $0x1f0] sm:$0xff] }
 0x6ec   :  { %v5052_v21 = vpop.eup %5051  ;;  %5077 = vrcp.f32 %v2487_v48  ;;  %v2489_v16 = vadd.f32 1.0, %v5050_v45  ;;  %v6531_v45 = vadd.f32 %v2415_v40, %v2308_v23  ;;  %v6541_v14 = vadd.f32 %v2417_v52, %v2397_v41 }
 0x6ed   :  { %v5054_v2 = vpop.eup %5053  ;;  %5079 = vrcp.f32 %v2648_v13  ;;  %v2650_v27 = vadd.f32 1.0, %v5052_v21  ;;  %v2578_v13 = vld [vmem:[#allocation9 + $0x1f0] sm:$0xff]  ;;  %v6536_v21 = vadd.f32 %v2576_v34, %v2308_v23 }
 0x6ee   :  { %v5056_v29 = vpop.eup %5055  ;;  %5081 = vrcp.f32 %v2489_v16  ;;  %v2488_v54 = vadd.f32 1.0, %v5054_v2  ;;  %v2310_v16 = vpop.f32.mrf.mxu0  ;;  %v6546_v61 = vadd.f32 %v2578_v13, %v2397_v41  ;;  %v4507_v59 = vmul.f32 -1.442695, %v6531_v45 }
 0x6ef   :  { %v5058_v51 = vpop.eup %5057  ;;  %5083 = vrcp.f32 %v2650_v27  ;;  %v2649_v20 = vadd.f32 1.0, %v5056_v29  ;;  %v4506_v27 = vmul.f32 -1.442695, %v6521_v0  ;;  %v4523_v35 = vmul.f32 -1.442695, %v6536_v21 }
 0x6f0   :  { %v5060_v30 = vpop.eup %5059  ;;  %5085 = vrcp.f32 %v2488_v54  ;;  %v2490_v42 = vadd.f32 1.0, %v5058_v51  ;;  %v4522_v54 = vmul.f32 -1.442695, %v6526_v12  ;;  %v2399_v51 = vpop.f32.mrf.mxu1  ;;  %v4509_v23 = vmul.f32 -1.442695, %v6541_v14 }
 0x6f1   :  { %v6513_v36 = vpop.eup %5061  ;;  %5087 = vrcp.f32 %v2649_v20  ;;  %v2651_v4 = vadd.f32 1.0, %v5060_v30  ;;  %v2418_v20 = vld [vmem:[#allocation7 + $0x1f8] sm:$0xff]  ;;  %v6551_v30 = vadd.f32 %v2416_v38, %v2310_v16  ;;  %v4525_v34 = vmul.f32 -1.442695, %v6546_v61 }
 0x6f2   :  { %v6518_v11 = vpop.eup %5063  ;;  %5089 = vrcp.f32 %v2490_v42  ;;  %v2579_v42 = vld [vmem:[#allocation9 + $0x1f8] sm:$0xff]  ;;  %v6561_v40 = vadd.f32 %v2418_v20, %v2399_v51 }
 0x6f3   :  { %v6523_v46 = vpop.eup %5065  ;;  %5091 = vrcp.f32 %v2651_v4  ;;  %v6556_v4 = vadd.f32 %v2577_v32, %v2310_v16  ;;  %v4508_v52 = vmul.f32 -1.442695, %v6551_v30 }
 0x6f4   :  { %v6528_v48 = vpop.eup %5067  ;;  %5093 = vpow2.f32 %v4503_v24  ;;  %v4510_v16 = vmul.f32 -1.442695, %v6561_v40 }
 0x6f5   :  { %v6533_v18 = vpop.eup %5069  ;;  %5095 = vpow2.f32 %v4519_v43  ;;  %v4524_v13 = vmul.f32 -1.442695, %v6556_v4 }
 0x6f6   :  { %v6538_v2 = vpop.eup %5071  ;;  %5097 = vpow2.f32 %v4505_v60 }
 0x6f7   :  { %v6543_v29 = vpop.eup %5073  ;;  %5099 = vpow2.f32 %v4521_v63  ;;  %v6566_v63 = vadd.f32 %v2579_v42, %v2399_v51 }
 0x6f8   :  { %v6548_v49 = vpop.eup %5075  ;;  %5101 = vpow2.f32 %v4504_v57 }
 0x6f9   :  { %v6553_v24 = vpop.eup %5077  ;;  %5103 = vpow2.f32 %v4520_v47  ;;  %7293 = vst [vmem:[#allocation23_spill] sm:$0xff] %v6566_v63 }
 0x6fa   :  { %v6558_v43 = vpop.eup %5079  ;;  %5105 = vpow2.f32 %v4506_v27  ;;  %v4526_v27 = vmul.f32 -1.442695, %v6566_v63 }
 0x6fb   :  { %v6563_v60 = vpop.eup %5081  ;;  %5107 = vpow2.f32 %v4522_v54 }
 0x6fc   :  { %v6568_v41 = vpop.eup %5083  ;;  %5109 = vpow2.f32 %v4507_v59 }
 0x6fd   :  { %v6571_v57 = vpop.eup %5085  ;;  %5111 = vpow2.f32 %v4523_v35 }
 0x6fe   :  { %v6574_v47 = vpop.eup %5087  ;;  %5113 = vpow2.f32 %v4509_v23 }
 0x6ff   :  { %v6577_v38 = vpop.eup %5089  ;;  %5115 = vpow2.f32 %v4525_v34 }
 0x700   :  { %v6580_v32 = vpop.eup %5091  ;;  %5117 = vpow2.f32 %v4508_v52 }
 0x701   :  { %v5094_v54 = vpop.eup %5093  ;;  %5119 = vpow2.f32 %v4524_v13 }
 0x702   :  { %v5096_v51 = vpop.eup %5095  ;;  %v2491_v20 = vadd.f32 1.0, %v5094_v54  ;;  %5121 = vpow2.f32 %v4510_v16 }
 0x703   :  { %v5098_v59 = vpop.eup %5097  ;;  %v2652_v42 = vadd.f32 1.0, %v5096_v51  ;;  %5123 = vpow2.f32 %v4526_v27 }
 0x704   :  { %v5100_v35 = vpop.eup %5099  ;;  %5125 = vrcp.f32 %v2491_v20  ;;  %v2493_v23 = vadd.f32 1.0, %v5098_v59 }
 0x705   :  { %v5102_v17 = vpop.eup %5101  ;;  %5127 = vrcp.f32 %v2652_v42  ;;  %v2654_v50 = vadd.f32 1.0, %v5100_v35 }
 0x706   :  { %v5104_v34 = vpop.eup %5103  ;;  %5129 = vrcp.f32 %v2493_v23  ;;  %v2492_v7 = vadd.f32 1.0, %v5102_v17 }
 0x707   :  { %v5106_v31 = vpop.eup %5105  ;;  %5131 = vrcp.f32 %v2654_v50  ;;  %v2653_v52 = vadd.f32 1.0, %v5104_v34 }
 0x708   :  { %v5108_v63 = vpop.eup %5107  ;;  %5133 = vrcp.f32 %v2492_v7  ;;  %v2494_v13 = vadd.f32 1.0, %v5106_v31 }
 0x709   :  { %v5110_v54 = vpop.eup %5109  ;;  %5135 = vrcp.f32 %v2653_v52  ;;  %v2655_v16 = vadd.f32 1.0, %v5108_v63 }
 0x70a   :  { %v5112_v51 = vpop.eup %5111  ;;  %5137 = vrcp.f32 %v2494_v13  ;;  %v2495_v27 = vadd.f32 1.0, %v5110_v54 }
 0x70b   :  { %v5114_v20 = vpop.eup %5113  ;;  %5139 = vrcp.f32 %v2655_v16  ;;  %v2656_v59 = vadd.f32 1.0, %v5112_v51 }
 0x70c   :  { %v5116_v42 = vpop.eup %5115  ;;  %5141 = vrcp.f32 %v2495_v27  ;;  %v2497_v35 = vadd.f32 1.0, %v5114_v20  ;;  %v2531_v20 = vmul.f32 %v6513_v36, %v6454_v55 }
 0x70d   :  { %v5118_v23 = vpop.eup %5117  ;;  %5143 = vrcp.f32 %v2656_v59  ;;  %v2658_v17 = vadd.f32 1.0, %v5116_v42  ;;  %v2692_v59 = vmul.f32 %v6518_v11, %v6456_v15  ;;  %v6600_v15 = vmul.f32 %v6523_v46, %v6460_v1 }
 0x70e   :  { %v5120_v50 = vpop.eup %5119  ;;  %5145 = vrcp.f32 %v2497_v35  ;;  %v2496_v34 = vadd.f32 1.0, %v5118_v23  ;;  %v2532_v35 = vmul.f32 %v6533_v18, %v6464_v22  ;;  %v6594_v55 = vmul.f32 3.0, %v2531_v20  ;;  %v7294_v20 = vld [vmem:[#allocation23_spill] sm:$0xff] }
 0x70f   :  { %v5122_v7 = vpop.eup %5121  ;;  %5147 = vrcp.f32 %v2658_v17  ;;  %v2657_v31 = vadd.f32 1.0, %v5120_v50  ;;  %v2693_v17 = vmul.f32 %v6538_v2, %v6466_v33  ;;  %v2535_v50 = vmul.f32 %v6553_v24, %v6477_v44 }
 0x710   :  { %v5124_v52 = vpop.eup %5123  ;;  %5149 = vrcp.f32 %v2496_v34  ;;  %v2498_v63 = vadd.f32 1.0, %v5122_v7  ;;  %v2536_v7 = vmul.f32 %v6571_v57, %v6487_v25  ;;  %v6596_v36 = vmul.f32 2.0, %v2692_v59 }
 0x711   :  { %v5126_v13 = vpop.eup %5125  ;;  %5151 = vrcp.f32 %v2657_v31  ;;  %v2659_v54 = vadd.f32 1.0, %v5124_v52  ;;  %v2697_v22 = vmul.f32 %v6574_v47, %v6490_v19  ;;  %v6606_v44 = vmul.f32 %v6528_v48, %v6462_v39 }
 0x712   :  { %v5128_v16 = vpop.eup %5127  ;;  %5153 = vrcp.f32 %v2498_v63  ;;  %v6608_v11 = vmul.f32 3.0, %v2532_v35  ;;  %v2534_v25 = vmul.f32 %v6543_v29, %v6470_v6  ;;  %v2539_v18 = vmul.f32 %v5126_v13, %v6502_v9 }
 0x713   :  { %v5130_v51 = vpop.eup %5129  ;;  %5155 = vrcp.f32 %v2659_v54  ;;  %v6613_v24 = vmul.f32 2.0, %v2693_v17  ;;  %v2695_v1 = vmul.f32 %v6548_v49, %v6474_v8  ;;  %v6617_v46 = vmul.f32 3.0, %v2535_v50 }
 0x714   :  { %v5132_v27 = vpop.eup %5131  ;;  %v2696_v19 = vmul.f32 %v6558_v43, %v6479_v56  ;;  %v2537_v48 = vmul.f32 %v6563_v60, %v6482_v58  ;;  %v2698_v6 = vmul.f32 %v6568_v41, %v6484_v3  ;;  %v6625_v29 = vmul.f32 3.0, %v2536_v7 }
 0x715   :  { %v5134_v42 = vpop.eup %5133  ;;  %v2538_v9 = vmul.f32 %v6577_v38, %v6493_v37  ;;  %v6629_v47 = vmul.f32 2.0, %v2697_v22  ;;  %v2699_v8 = vmul.f32 %v6580_v32, %v6496_v5  ;;  %v2555_v58 = vmul.f32 3.0, %v2539_v18 }
 0x716   :  { %v5136_v23 = vpop.eup %5135  ;;  %v2700_v60 = vmul.f32 %v5128_v16, %v6504_v28  ;;  %v2540_v3 = vmul.f32 %v5134_v42, %v6511_v62  ;;  %v2541_v37 = vmul.f32 %v5130_v51, %v6506_v10  ;;  %v2714_v18 = vmul.f32 2.0, %v2698_v6 }
 0x717   :  { %v5138_v34 = vpop.eup %5137  ;;  %v2701_v41 = vmul.f32 %v5136_v23, %v6516_v26  ;;  %v2554_v7 = vmul.f32 3.0, %v2538_v9  ;;  %v2710_v9 = vmul.f32 2.0, %v6606_v44 }
 0x718   :  { %v5140_v31 = vpop.eup %5139  ;;  %v2542_v32 = vmul.f32 %v5138_v34, %v6521_v0  ;;  %v2716_v59 = vmul.f32 2.0, %v2700_v60  ;;  %v2557_v17 = vmul.f32 3.0, %v2541_v37  ;;  %v7297_v37 = vld [vmem:[#allocation21_spill] sm:$0xff] }
 0x719   :  { %v5142_v33 = vpop.eup %5141  ;;  %v2703_v28 = vmul.f32 %v5140_v31, %v6526_v12  ;;  %v2717_v51 = vmul.f32 2.0, %v2701_v41  ;;  %v2715_v31 = vmul.f32 2.0, %v2699_v8 }
 0x71a   :  { %v5144_v2 = vpop.eup %5143  ;;  %v2543_v56 = vmul.f32 %v5142_v33, %v6531_v45  ;;  %v2558_v0 = vmul.f32 3.0, %v2542_v32  ;;  %v2553_v33 = vmul.f32 3.0, %v2537_v48 }
 0x71b   :  { %v5146_v39 = vpop.eup %5145  ;;  %v2704_v49 = vmul.f32 %v5144_v2, %v6536_v21  ;;  %v2702_v21 = vmul.f32 %v5132_v27, %v6508_v53  ;;  %v2719_v35 = vmul.f32 2.0, %v2703_v28  ;;  %v2732_v2 = vsub.f32 %v2555_v58, %v2716_v59  ;;  %v2904_v58 = vld [vmem:[#allocation10 + $0x30] sm:$0xff]  ;;  %v6693_v59 = vld [vmem:[%s7193_s4 + $0x8] sm:$0xff] }
 0x71c   :  { %v5148_v57 = vpop.eup %5147  ;;  %v2545_v38 = vmul.f32 %v5146_v39, %v6541_v14  ;;  %v2559_v26 = vmul.f32 3.0, %v2543_v56  ;;  %v2556_v14 = vmul.f32 3.0, %v2540_v3  ;;  %v2711_v56 = vmul.f32 2.0, %v2695_v1  ;;  %7302 = vst [vmem:[#allocation23_spill] sm:$0xff] %v6693_v59 }
 0x71d   :  { %v5150_v43 = vpop.eup %5149  ;;  %v2706_v63 = vmul.f32 %v5148_v57, %v6546_v61  ;;  %v2720_v54 = vmul.f32 2.0, %v2704_v49  ;;  %v2718_v50 = vmul.f32 2.0, %v2702_v21  ;;  %v2550_v57 = vmul.f32 3.0, %v2534_v25 }
 0x71e   :  { %v5152_v52 = vpop.eup %5151  ;;  %v2544_v5 = vmul.f32 %v5150_v43, %v6551_v30  ;;  %v2561_v42 = vmul.f32 3.0, %v2545_v38  ;;  %v2733_v22 = vsub.f32 %v2556_v14, %v2717_v51  ;;  %v2735_v49 = vsub.f32 %v2558_v0, %v2719_v35  ;;  %v3263_v0 = vld [vmem:[#allocation9 + $0x200] sm:$0xff] }
 0x71f   :  { %v5154_v45 = vpop.eup %5153  ;;  %v2705_v62 = vmul.f32 %v5152_v52, %v6556_v4  ;;  %v2722_v53 = vmul.f32 2.0, %v2706_v63  ;;  %v2712_v4 = vmul.f32 2.0, %v2696_v19  ;;  %v2736_v34 = vsub.f32 %v2559_v26, %v2720_v54 }
 0x720   :  { %v5156_v13 = vpop.eup %5155  ;;  %v2560_v16 = vmul.f32 3.0, %v2544_v5  ;;  %v2546_v10 = vmul.f32 %v5154_v45, %v6561_v40  ;;  %v2729_v19 = vsub.f32 %v6625_v29, %v6629_v47  ;;  %v2549_v43 = vmul.f32 3.0, %v6600_v15  ;;  %v2905_v5 = vld [vmem:[#allocation10 + $0x38] sm:$0xff] }
 0x721   :  { %v2721_v61 = vmul.f32 2.0, %v2705_v62  ;;  %v2707_v30 = vmul.f32 %v5156_v13, %v7294_v20  ;;  %v2738_v39 = vsub.f32 %v2561_v42, %v2722_v53  ;;  %v2728_v8 = vsub.f32 %v6617_v46, %v2712_v4  ;;  %v7295_v46 = vld [vmem:[#allocation19_spill] sm:$0xff]  ;;  %v7298_v13 = vld [vmem:[#allocation22_spill] sm:$0xff]  ;;  %v6704_v42 = vld [vmem:[%s7193_s4 + $0x10] sm:$0xff] }
 0x722   :  { %v2562_v27 = vmul.f32 3.0, %v2546_v10  ;;  %v2734_v60 = vsub.f32 %v2557_v17, %v2718_v50  ;;  %v2731_v48 = vsub.f32 %v2554_v7, %v2715_v31  ;;  %v2725_v25 = vsub.f32 %v6608_v11, %v6613_v24  ;;  %7303 = vst [vmem:[#allocation19_spill] sm:$0xff] %v6704_v42  ;;  %v6715_v53 = vld [vmem:[%s7193_s4 + $0x18] sm:$0xff] }
 0x723   :  { %v2723_v12 = vmul.f32 2.0, %v2707_v30  ;;  %v2737_v23 = vsub.f32 %v2560_v16, %v2721_v61  ;;  %v2724_v1 = vsub.f32 %v6594_v55, %v6596_v36  ;;  %v2730_v6 = vsub.f32 %v2553_v33, %v2714_v18  ;;  %v6680_v30 = vld [vmem:[%s7193_s4] sm:$0xff]  ;;  %7304 = vst [vmem:[#allocation21_spill] sm:$0xff] %v6715_v53  ;;  %v3103_v50 = vld [vmem:[#allocation7 + $0x208] sm:$0xff] }
 0x724   :  { %v2727_v15 = vsub.f32 %v2550_v57, %v2711_v56  ;;  %v2726_v44 = vsub.f32 %v2549_v43, %v2710_v9  ;;  %v7296_v29 = vmov 0.0   ;;  %v2888_v36 = vstv %s4530_s6  ;;  %7301 = vst [vmem:[#allocation18_spill] sm:$0xff] %v6680_v30  ;;  %v3106_v43 = vld [vmem:[#allocation7 + $0x220] sm:$0xff] }
 0x725   :  { %2764 = vmatprep.subr.mxu0 %v2737_v23  ;;  %v2739_v40 = vsub.f32 %v2562_v27, %v2723_v12  ;;  %v2885_v11 = vstv %s4529_s27  ;;  %v2906_v3 = vstv %s4531_s28  ;;  %v3102_v27 = vld [vmem:[#allocation7 + $0x200] sm:$0xff]  ;;  %v3104_v12 = vld [vmem:[#allocation7 + $0x210] sm:$0xff] }
 0x726   :  { %2765 = vmatpush1.msra.mxu0 %v2736_v34  ;;  %v2886_v38 = vmul.f32 %v2885_v11, %v7297_v37  ;;  %v2907_v32 = vmul.f32 %v2906_v3, %v2904_v58  ;;  %v2887_v26 = vmul.f32 %v2885_v11, %v7298_v13  ;;  %v2908_v16 = vmul.f32 %v2906_v3, %v2905_v5  ;;  %v3265_v23 = vld [vmem:[#allocation9 + $0x210] sm:$0xff]  ;;  %v3264_v34 = vld [vmem:[#allocation9 + $0x208] sm:$0xff]  ;;  %v3267_v9 = vld [vmem:[#allocation9 + $0x220] sm:$0xff] }
 0x727   :  { %2835 = vmatprep.subr.mxu1 %v2739_v40  ;;  %2766 = vmatprep.subr.mxu0 %v2733_v22  ;;  %v3105_v40 = vld [vmem:[#allocation7 + $0x218] sm:$0xff]  ;;  %v3268_v58 = vld [vmem:[#allocation9 + $0x228] sm:$0xff] }
 0x728   :  { %2836 = vmatpush1.msra.mxu1 %v2738_v39  ;;  %2767 = vmatpush1.msra.mxu0 %v2732_v2  ;;  %v3266_v39 = vld [vmem:[#allocation9 + $0x218] sm:$0xff] }
 0x729   :  { %2837 = vmatprep.subr.mxu1 %v2735_v49  ;;  %2768 = vmatprep.subr.mxu0 %v2729_v19 }
 0x72a   :  { %2838 = vmatpush1.msra.mxu1 %v2734_v60  ;;  %2769 = vmatpush1.msra.mxu0 %v2728_v8 }
 0x72b   :  { %2839 = vmatprep.subr.mxu1 %v2731_v48  ;;  %2770 = vmatprep.subr.mxu0 %v2725_v25  ;;  %v3108_v25 = vld [vmem:[#allocation7 + $0x230] sm:$0xff] }
 0x72c   :  { %2840 = vmatpush1.msra.mxu1 %v2730_v6  ;;  %2771 = vmatpush1.msra.mxu0 %v2724_v1  ;;  %v3269_v1 = vld [vmem:[#allocation9 + $0x230] sm:$0xff] }
 0x72d   :  { %2841 = vmatprep.subr.mxu1 %v2727_v15  ;;  %4527 = vmatmul.mubr.msk.f32.vlgmr.msra.gmra.mxu0 %vm640_vm2, %v7295_v46 }
 0x72e   :  { %2842 = vmatpush1.msra.mxu1 %v2726_v44  ;;  %2987 = vmatprep.mubr.f32.mxu0 %v7296_v29 }
 0x72f   :  { %4528 = vmatmul.mubr.msk.f32.vlgmr.msra.gmra.mxu1 %vm640_vm2, %v7295_v46 }
 0x730   :  { %3076 = vmatprep.mubr.f32.mxu1 %v7296_v29 }
 0x7ed   :  { %v2806_v55 = vpop.f32.mrf.mxu0 }
 0x7ee   :  { %v2889_v41 = vmul.f32 %v2888_v36, %v2806_v55 }
 0x7ef   :  { %v2877_v24 = vpop.f32.mrf.mxu1  ;;  %v2808_v47 = vpop.f32.mrf.mxu0 }
 0x7f0   :  { %v2890_v52 = vmul.f32 %v2888_v36, %v2808_v47  ;;  %v2891_v45 = vmul.f32 %v2888_v36, %v2877_v24 }
 0x7f1   :  { %v2879_v63 = vpop.f32.mrf.mxu1 }
 0x7f2   :  { %v2897_v21 = vcombine.low %v2889_v41, %v2890_v52  ;;  %v2892_v28 = vmul.f32 %v2888_v36, %v2879_v63  ;;  %v3107_v36 = vld [vmem:[#allocation7 + $0x228] sm:$0xff] }
 0x7f4   :  { %v2901_v62 = vsub.f32 %v2886_v38, %v2897_v21  ;;  %v2898_v54 = vcombine.low %v2891_v45, %v2892_v28  ;;  %v3109_v38 = vld [vmem:[#allocation7 + $0x238] sm:$0xff] }
 0x7f5   :  { %v3270_v45 = vld [vmem:[#allocation9 + $0x238] sm:$0xff] }
 0x7f6   :  { %v6665_v10 = vadd.f32 %v2907_v32, %v2901_v62  ;;  %v2902_v14 = vsub.f32 %v2887_v26, %v2898_v54 }
 0x7f8   :  { %7299 = vst [vmem:[#allocation20_spill] sm:$0xff] %v6665_v10  ;;  %v6667_v51 = vadd.f32 %v2908_v16, %v2902_v14  ;;  %v2913_v61 = vcombine.high %v6665_v10, %v6665_v10 }
 0x7fa   :  { %7300 = vst [vmem:[#allocation24_spill] sm:$0xff] %v6667_v51  ;;  %4532 = vmatprep.subr.msk.mxu0 %vm117_vm0, %v2913_v61  ;;  %v2914_v20 = vcombine.high %v6667_v51, %v6667_v51 }
 0x7fb   :  { %4533 = vmatpush1.msk.msra.mxu0 %vm117_vm0, %v6665_v10 }
 0x7fc   :  { %4538 = vmatprep.subr.msk.mxu1 %vm117_vm0, %v2914_v20  ;;  %4534 = vmatmul.mubr.msk.f32.vlgmr.msra.gmra.mxu0 %vm104_vm1, %v6680_v30 }
 0x7fd   :  { %4539 = vmatpush1.msk.msra.mxu1 %vm117_vm0, %v6667_v51  ;;  %2993 = vmatprep.mubr.f32.mxu0 %v7296_v29 }
 0x7fe   :  { %4540 = vmatmul.mubr.msk.f32.vlgmr.msra.gmra.mxu1 %vm104_vm1, %v6680_v30 }
 0x7ff   :  { %3082 = vmatprep.mubr.f32.mxu1 %v7296_v29 }
 0x800   :  { %4535 = vmatmul.mubr.msk.f32.gmra.mxu0 %vm104_vm1, %v6693_v59 }
 0x801   :  { %2999 = vmatprep.mubr.f32.mxu0 %v7296_v29 }
 0x802   :  { %4541 = vmatmul.mubr.msk.f32.gmra.mxu1 %vm104_vm1, %v6693_v59 }
 0x803   :  { %3088 = vmatprep.mubr.f32.mxu1 %v7296_v29 }
 0x804   :  { %4536 = vmatmul.mubr.msk.f32.gmra.mxu0 %vm104_vm1, %v6704_v42 }
 0x805   :  { %3005 = vmatprep.mubr.f32.mxu0 %v7296_v29 }
 0x806   :  { %4542 = vmatmul.mubr.msk.f32.gmra.mxu1 %vm104_vm1, %v6704_v42 }
 0x807   :  { %3094 = vmatprep.mubr.f32.mxu1 %v7296_v29 }
 0x808   :  { %4537 = vmatmul.mubr.msk.f32.gmra.mxu0 %vm104_vm1, %v6715_v53 }
 0x809   :  { %3503 = vmatprep.mubr.f32.mxu0 %v7296_v29 }
 0x80a   :  { %4543 = vmatmul.mubr.msk.f32.gmra.mxu1 %vm104_vm1, %v6715_v53 }
 0x80b   :  { %3574 = vmatprep.mubr.f32.mxu1 %v7296_v29 }
 0x8bc   :  { %v2989_v35 = vpop.f32.mrf.mxu0 }
 0x8bd   :  { %v6723_v4 = vadd.f32 %v3102_v27, %v2989_v35  ;;  %v6725_v17 = vadd.f32 %v3263_v0, %v2989_v35 }
 0x8be   :  { %v3078_v7 = vpop.f32.mrf.mxu1  ;;  %v2991_v31 = vpop.f32.mrf.mxu0 }
 0x8bf   :  { %v4544_v22 = vmul.f32 -1.442695, %v6723_v4  ;;  %v4560_v33 = vmul.f32 -1.442695, %v6725_v17  ;;  %v6729_v18 = vadd.f32 %v3104_v12, %v3078_v7  ;;  %v6731_v2 = vadd.f32 %v3265_v23, %v3078_v7 }
 0x8c0   :  { %v6733_v57 = vadd.f32 %v3103_v50, %v2991_v31  ;;  %v6735_v56 = vadd.f32 %v3264_v34, %v2991_v31  ;;  %v3080_v49 = vpop.f32.mrf.mxu1  ;;  %v2995_v19 = vpop.f32.mrf.mxu0 }
 0x8c1   :  { %5157 = vpow2.f32 %v4544_v22  ;;  %v4546_v8 = vmul.f32 -1.442695, %v6729_v18  ;;  %v4562_v60 = vmul.f32 -1.442695, %v6731_v2  ;;  %v6739_v48 = vadd.f32 %v3105_v40, %v3080_v49 }
 0x8c2   :  { %5159 = vpow2.f32 %v4560_v33  ;;  %v4545_v6 = vmul.f32 -1.442695, %v6733_v57  ;;  %v4561_v15 = vmul.f32 -1.442695, %v6735_v56  ;;  %v6743_v44 = vadd.f32 %v3266_v39, %v3080_v49  ;;  %v3084_v46 = vpop.f32.mrf.mxu1  ;;  %v2997_v55 = vpop.f32.mrf.mxu0 }
 0x8c3   :  { %5161 = vpow2.f32 %v4546_v8  ;;  %v4547_v11 = vmul.f32 -1.442695, %v6739_v48  ;;  %v6746_v24 = vadd.f32 %v3106_v43, %v2995_v19  ;;  %v6748_v47 = vadd.f32 %v3267_v9, %v2995_v19  ;;  %v3110_v8 = vld [vmem:[#allocation7 + $0x240] sm:$0xff] }
 0x8c4   :  { %5163 = vpow2.f32 %v4562_v60  ;;  %v4563_v3 = vmul.f32 -1.442695, %v6743_v44  ;;  %v6751_v41 = vadd.f32 %v3108_v25, %v3084_v46  ;;  %v6753_v52 = vadd.f32 %v3269_v1, %v3084_v46  ;;  %v3086_v37 = vpop.f32.mrf.mxu1  ;;  %v3001_v9 = vpop.f32.mrf.mxu0  ;;  %v3271_v1 = vld [vmem:[#allocation9 + $0x240] sm:$0xff] }
 0x8c5   :  { %5165 = vpow2.f32 %v4545_v6  ;;  %v4548_v63 = vmul.f32 -1.442695, %v6746_v24  ;;  %v6756_v5 = vadd.f32 %v3107_v36, %v2997_v55  ;;  %v4564_v21 = vmul.f32 -1.442695, %v6748_v47 }
 0x8c6   :  { %5167 = vpow2.f32 %v4561_v15  ;;  %v6759_v32 = vadd.f32 %v3268_v58, %v2997_v55  ;;  %v4550_v28 = vmul.f32 -1.442695, %v6751_v41  ;;  %v6762_v62 = vadd.f32 %v3109_v38, %v3086_v37  ;;  %v3090_v46 = vpop.f32.mrf.mxu1  ;;  %v3112_v55 = vld [vmem:[#allocation7 + $0x250] sm:$0xff] }
 0x8c7   :  { %5169 = vpow2.f32 %v4547_v11  ;;  %v4566_v13 = vmul.f32 -1.442695, %v6753_v52  ;;  %v6765_v26 = vadd.f32 %v3270_v45, %v3086_v37  ;;  %v4549_v54 = vmul.f32 -1.442695, %v6756_v5  ;;  %v3003_v45 = vpop.f32.mrf.mxu0 }
 0x8c8   :  { %5171 = vpow2.f32 %v4563_v3  ;;  %v4565_v16 = vmul.f32 -1.442695, %v6759_v32  ;;  %v4551_v14 = vmul.f32 -1.442695, %v6762_v62  ;;  %v6771_v58 = vadd.f32 %v3110_v8, %v3001_v9  ;;  %v3273_v3 = vld [vmem:[#allocation9 + $0x250] sm:$0xff] }
 0x8c9   :  { %5173 = vpow2.f32 %v4548_v63  ;;  %v4567_v61 = vmul.f32 -1.442695, %v6765_v26  ;;  %v6773_v63 = vadd.f32 %v3271_v1, %v3001_v9  ;;  %v3275_v9 = vld [vmem:[#allocation9 + $0x260] sm:$0xff] }
 0x8ca   :  { %5175 = vpow2.f32 %v4564_v21  ;;  %v3111_v21 = vld [vmem:[#allocation7 + $0x248] sm:$0xff] }
 0x8cb   :  { %5177 = vpow2.f32 %v4550_v28 }
 0x8cc   :  { %5179 = vpow2.f32 %v4566_v13 }
 0x8cd   :  { %5181 = vpow2.f32 %v4549_v54  ;;  %v6775_v54 = vadd.f32 %v3112_v55, %v3090_v46 }
 0x8ce   :  { %v5158_v20 = vpop.eup %5157  ;;  %5183 = vpow2.f32 %v4565_v16  ;;  %v3272_v16 = vld [vmem:[#allocation9 + $0x248] sm:$0xff] }
 0x8cf   :  { %v5160_v27 = vpop.eup %5159  ;;  %v3182_v0 = vadd.f32 1.0, %v5158_v20  ;;  %5185 = vpow2.f32 %v4551_v14  ;;  %v6777_v20 = vadd.f32 %v3273_v3, %v3090_v46 }
 0x8d0   :  { %v5162_v35 = vpop.eup %5161  ;;  %v3343_v12 = vadd.f32 1.0, %v5160_v27  ;;  %5187 = vpow2.f32 %v4567_v61  ;;  %v3092_v27 = vpop.f32.mrf.mxu1 }
 0x8d1   :  { %v5164_v23 = vpop.eup %5163  ;;  %5189 = vrcp.f32 %v3182_v0  ;;  %v3184_v50 = vadd.f32 1.0, %v5162_v35  ;;  %v3113_v0 = vld [vmem:[#allocation7 + $0x258] sm:$0xff] }
 0x8d2   :  { %v5166_v34 = vpop.eup %5165  ;;  %5191 = vrcp.f32 %v3343_v12  ;;  %v3345_v7 = vadd.f32 1.0, %v5164_v23  ;;  %v4552_v23 = vmul.f32 -1.442695, %v6771_v58  ;;  %v3096_v1 = vpop.f32.mrf.mxu1 }
 0x8d3   :  { %v5168_v31 = vpop.eup %5167  ;;  %5193 = vrcp.f32 %v3184_v50  ;;  %v3183_v40 = vadd.f32 1.0, %v5166_v34  ;;  %v6780_v50 = vadd.f32 %v3111_v21, %v3003_v45  ;;  %v3274_v34 = vld [vmem:[#allocation9 + $0x258] sm:$0xff] }
 0x8d4   :  { %v5170_v22 = vpop.eup %5169  ;;  %5195 = vrcp.f32 %v3345_v7  ;;  %v3344_v33 = vadd.f32 1.0, %v5168_v31 }
 0x8d5   :  { %v5172_v39 = vpop.eup %5171  ;;  %5197 = vrcp.f32 %v3183_v40  ;;  %v3185_v49 = vadd.f32 1.0, %v5170_v22  ;;  %v4568_v40 = vmul.f32 -1.442695, %v6773_v63  ;;  %v6785_v22 = vadd.f32 %v3272_v16, %v3003_v45  ;;  %v3115_v45 = vld [vmem:[#allocation7 + $0x268] sm:$0xff] }
 0x8d6   :  { %v5174_v19 = vpop.eup %5173  ;;  %5199 = vrcp.f32 %v3344_v33  ;;  %v3346_v43 = vadd.f32 1.0, %v5172_v39  ;;  %v3007_v33 = vpop.f32.mrf.mxu0  ;;  %v3114_v39 = vld [vmem:[#allocation7 + $0x260] sm:$0xff]  ;;  %v4553_v46 = vmul.f32 -1.442695, %v6780_v50  ;;  %v3276_v16 = vld [vmem:[#allocation9 + $0x268] sm:$0xff] }
 0x8d7   :  { %v5176_v60 = vpop.eup %5175  ;;  %5201 = vrcp.f32 %v3185_v49  ;;  %v3186_v25 = vadd.f32 1.0, %v5174_v19  ;;  %v4554_v19 = vmul.f32 -1.442695, %v6775_v54  ;;  %v6800_v55 = vadd.f32 %v3114_v39, %v3007_v33 }
 0x8d8   :  { %v5178_v6 = vpop.eup %5177  ;;  %5203 = vrcp.f32 %v3346_v43  ;;  %v3347_v15 = vadd.f32 1.0, %v5176_v60  ;;  %v6790_v43 = vadd.f32 %v3113_v0, %v3092_v27  ;;  %v4570_v60 = vmul.f32 -1.442695, %v6777_v20  ;;  %v3098_v0 = vpop.f32.mrf.mxu1 }
 0x8d9   :  { %v5180_v36 = vpop.eup %5179  ;;  %5205 = vrcp.f32 %v3186_v25  ;;  %v3188_v11 = vadd.f32 1.0, %v5178_v6  ;;  %v6795_v25 = vadd.f32 %v3274_v34, %v3092_v27  ;;  %v3116_v6 = vld [vmem:[#allocation7 + $0x270] sm:$0xff]  ;;  %v4569_v3 = vmul.f32 -1.442695, %v6785_v22 }
 0x8da   :  { %v5182_v37 = vpop.eup %5181  ;;  %5207 = vrcp.f32 %v3347_v15  ;;  %v3349_v38 = vadd.f32 1.0, %v5180_v36  ;;  %v3277_v36 = vld [vmem:[#allocation9 + $0x270] sm:$0xff] }
 0x8db   :  { %v5184_v28 = vpop.eup %5183  ;;  %5209 = vrcp.f32 %v3188_v11  ;;  %v3187_v13 = vadd.f32 1.0, %v5182_v37  ;;  %v6805_v37 = vadd.f32 %v3275_v9, %v3007_v33  ;;  %v6815_v27 = vadd.f32 %v3277_v36, %v3096_v1 }
 0x8dc   :  { %v5186_v14 = vpop.eup %5185  ;;  %5211 = vrcp.f32 %v3349_v38  ;;  %v3348_v61 = vadd.f32 1.0, %v5184_v28  ;;  %v3009_v38 = vpop.f32.mrf.mxu0  ;;  %v4555_v28 = vmul.f32 -1.442695, %v6790_v43 }
 0x8dd   :  { %v5188_v35 = vpop.eup %5187  ;;  %5213 = vrcp.f32 %v3187_v13  ;;  %v3189_v12 = vadd.f32 1.0, %v5186_v14  ;;  %v6810_v13 = vadd.f32 %v3116_v6, %v3096_v1  ;;  %v6820_v34 = vadd.f32 %v3115_v45, %v3009_v38 }
 0x8de   :  { %v6782_v7 = vpop.eup %5189  ;;  %5215 = vrcp.f32 %v3348_v61  ;;  %v3350_v31 = vadd.f32 1.0, %v5188_v35  ;;  %v4571_v61 = vmul.f32 -1.442695, %v6795_v25  ;;  %v3117_v35 = vld [vmem:[#allocation7 + $0x278] sm:$0xff]  ;;  %v4572_v33 = vmul.f32 -1.442695, %v6805_v37 }
 0x8df   :  { %v6787_v49 = vpop.eup %5191  ;;  %5217 = vrcp.f32 %v3189_v12  ;;  %v6825_v39 = vadd.f32 %v3276_v16, %v3009_v38  ;;  %v4558_v9 = vmul.f32 -1.442695, %v6810_v13  ;;  %v4574_v6 = vmul.f32 -1.442695, %v6815_v27 }
 0x8e0   :  { %v6792_v8 = vpop.eup %5193  ;;  %5219 = vrcp.f32 %v3350_v31  ;;  %v3278_v31 = vld [vmem:[#allocation9 + $0x278] sm:$0xff] }
 0x8e1   :  { %v6797_v15 = vpop.eup %5195  ;;  %5221 = vpow2.f32 %v4552_v23  ;;  %v4556_v23 = vmul.f32 -1.442695, %v6800_v55  ;;  %v4573_v45 = vmul.f32 -1.442695, %v6825_v39 }
 0x8e2   :  { %v6802_v11 = vpop.eup %5197  ;;  %5223 = vpow2.f32 %v4568_v40 }
 0x8e3   :  { %v6807_v21 = vpop.eup %5199  ;;  %5225 = vpow2.f32 %v4554_v19 }
 0x8e4   :  { %v6812_v14 = vpop.eup %5201  ;;  %5227 = vpow2.f32 %v4570_v60  ;;  %v6830_v60 = vadd.f32 %v3117_v35, %v3098_v0 }
 0x8e5   :  { %v6817_v12 = vpop.eup %5203  ;;  %5229 = vpow2.f32 %v4553_v46  ;;  %v6835_v46 = vadd.f32 %v3278_v31, %v3098_v0 }
 0x8e6   :  { %v6822_v40 = vpop.eup %5205  ;;  %5231 = vpow2.f32 %v4569_v3  ;;  %v4557_v3 = vmul.f32 -1.442695, %v6820_v34  ;;  %v4559_v16 = vmul.f32 -1.442695, %v6830_v60 }
 0x8e7   :  { %v6827_v19 = vpop.eup %5207  ;;  %5233 = vpow2.f32 %v4555_v28  ;;  %7305 = vst [vmem:[#allocation22_spill] sm:$0xff] %v6835_v46  ;;  %v4575_v0 = vmul.f32 -1.442695, %v6835_v46 }
 0x8e8   :  { %v6832_v1 = vpop.eup %5209  ;;  %5235 = vpow2.f32 %v4571_v61 }
 0x8e9   :  { %v6837_v36 = vpop.eup %5211  ;;  %5237 = vpow2.f32 %v4556_v23 }
 0x8ea   :  { %v6840_v38 = vpop.eup %5213  ;;  %5239 = vpow2.f32 %v4572_v33 }
 0x8eb   :  { %v6843_v28 = vpop.eup %5215  ;;  %5241 = vpow2.f32 %v4558_v9 }
 0x8ec   :  { %v6846_v61 = vpop.eup %5217  ;;  %5243 = vpow2.f32 %v4574_v6 }
 0x8ed   :  { %v6849_v35 = vpop.eup %5219  ;;  %5245 = vpow2.f32 %v4557_v3 }
 0x8ee   :  { %v5222_v23 = vpop.eup %5221  ;;  %5247 = vpow2.f32 %v4573_v45 }
 0x8ef   :  { %v5224_v31 = vpop.eup %5223  ;;  %v3190_v53 = vadd.f32 1.0, %v5222_v23  ;;  %5249 = vpow2.f32 %v4559_v16 }
 0x8f0   :  { %v5226_v33 = vpop.eup %5225  ;;  %v3351_v42 = vadd.f32 1.0, %v5224_v31  ;;  %5251 = vpow2.f32 %v4575_v0 }
 0x8f1   :  { %v5228_v59 = vpop.eup %5227  ;;  %5253 = vrcp.f32 %v3190_v53  ;;  %v3192_v9 = vadd.f32 1.0, %v5226_v33 }
 0x8f2   :  { %v5230_v30 = vpop.eup %5229  ;;  %5255 = vrcp.f32 %v3351_v42  ;;  %v3353_v51 = vadd.f32 1.0, %v5228_v59 }
 0x8f3   :  { %v5232_v6 = vpop.eup %5231  ;;  %5257 = vrcp.f32 %v3192_v9  ;;  %v3191_v10 = vadd.f32 1.0, %v5230_v30 }
 0x8f4   :  { %v5234_v29 = vpop.eup %5233  ;;  %5259 = vrcp.f32 %v3353_v51  ;;  %v3352_v3 = vadd.f32 1.0, %v5232_v6 }
 0x8f5   :  { %v5236_v46 = vpop.eup %5235  ;;  %5261 = vrcp.f32 %v3191_v10  ;;  %v3193_v45 = vadd.f32 1.0, %v5234_v29 }
 0x8f6   :  { %v5238_v23 = vpop.eup %5237  ;;  %5263 = vrcp.f32 %v3352_v3  ;;  %v3354_v16 = vadd.f32 1.0, %v5236_v46 }
 0x8f7   :  { %v5240_v31 = vpop.eup %5239  ;;  %5265 = vrcp.f32 %v3193_v45  ;;  %v3194_v0 = vadd.f32 1.0, %v5238_v23 }
 0x8f8   :  { %v5242_v53 = vpop.eup %5241  ;;  %5267 = vrcp.f32 %v3354_v16  ;;  %v3355_v33 = vadd.f32 1.0, %v5240_v31 }
 0x8f9   :  { %v5244_v42 = vpop.eup %5243  ;;  %5269 = vrcp.f32 %v3194_v0  ;;  %v3196_v59 = vadd.f32 1.0, %v5242_v53  ;;  %v3230_v53 = vmul.f32 %v6782_v7, %v6723_v4 }
 0x8fa   :  { %v5246_v9 = vpop.eup %5245  ;;  %5271 = vrcp.f32 %v3355_v33  ;;  %v3357_v30 = vadd.f32 1.0, %v5244_v42  ;;  %v3391_v33 = vmul.f32 %v6787_v49, %v6725_v17  ;;  %v6869_v17 = vmul.f32 %v6792_v8, %v6729_v18 }
 0x8fb   :  { %v5248_v51 = vpop.eup %5247  ;;  %5273 = vrcp.f32 %v3196_v59  ;;  %v3195_v6 = vadd.f32 1.0, %v5246_v9  ;;  %v3231_v59 = vmul.f32 %v6802_v11, %v6733_v57  ;;  %v6863_v4 = vmul.f32 3.0, %v3230_v53  ;;  %v7306_v53 = vld [vmem:[#allocation22_spill] sm:$0xff] }
 0x8fc   :  { %v5250_v10 = vpop.eup %5249  ;;  %5275 = vrcp.f32 %v3357_v30  ;;  %v3356_v29 = vadd.f32 1.0, %v5248_v51  ;;  %v3392_v30 = vmul.f32 %v6807_v21, %v6735_v56  ;;  %v3234_v51 = vmul.f32 %v6822_v40, %v6746_v24 }
 0x8fd   :  { %v5252_v3 = vpop.eup %5251  ;;  %5277 = vrcp.f32 %v3195_v6  ;;  %v3197_v46 = vadd.f32 1.0, %v5250_v10  ;;  %v3235_v10 = vmul.f32 %v6840_v38, %v6756_v5  ;;  %v6865_v7 = vmul.f32 2.0, %v3391_v33 }
 0x8fe   :  { %v5254_v45 = vpop.eup %5253  ;;  %5279 = vrcp.f32 %v3356_v29  ;;  %v3358_v23 = vadd.f32 1.0, %v5252_v3  ;;  %v3396_v57 = vmul.f32 %v6843_v28, %v6759_v32  ;;  %v6875_v24 = vmul.f32 %v6797_v15, %v6731_v2 }
 0x8ff   :  { %v5256_v16 = vpop.eup %5255  ;;  %5281 = vrcp.f32 %v3197_v46  ;;  %v6877_v49 = vmul.f32 3.0, %v3231_v59  ;;  %v3233_v5 = vmul.f32 %v6812_v14, %v6739_v48  ;;  %v3238_v11 = vmul.f32 %v5254_v45, %v6771_v58 }
 0x900   :  { %v5258_v31 = vpop.eup %5257  ;;  %5283 = vrcp.f32 %v3358_v23  ;;  %v6882_v40 = vmul.f32 2.0, %v3392_v30  ;;  %v3394_v18 = vmul.f32 %v6817_v12, %v6743_v44  ;;  %v6886_v8 = vmul.f32 3.0, %v3234_v51 }
 0x901   :  { %v5260_v0 = vpop.eup %5259  ;;  %v3395_v32 = vmul.f32 %v6827_v19, %v6748_v47  ;;  %v3236_v15 = vmul.f32 %v6832_v1, %v6751_v41  ;;  %v3397_v48 = vmul.f32 %v6837_v36, %v6753_v52  ;;  %v6894_v14 = vmul.f32 3.0, %v3235_v10 }
 0x902   :  { %v5262_v42 = vpop.eup %5261  ;;  %v3237_v58 = vmul.f32 %v6846_v61, %v6762_v62  ;;  %v6898_v28 = vmul.f32 2.0, %v3396_v57  ;;  %v3398_v44 = vmul.f32 %v6849_v35, %v6765_v26  ;;  %v3254_v41 = vmul.f32 3.0, %v3238_v11 }
 0x903   :  { %v5264_v9 = vpop.eup %5263  ;;  %v3399_v1 = vmul.f32 %v5256_v16, %v6773_v63  ;;  %v3239_v52 = vmul.f32 %v5262_v42, %v6780_v50  ;;  %v3240_v62 = vmul.f32 %v5258_v31, %v6775_v54  ;;  %v3413_v11 = vmul.f32 2.0, %v3397_v48 }
 0x904   :  { %v5266_v6 = vpop.eup %5265  ;;  %v3400_v36 = vmul.f32 %v5264_v9, %v6785_v22  ;;  %v3253_v10 = vmul.f32 3.0, %v3237_v58  ;;  %v3409_v58 = vmul.f32 2.0, %v6875_v24 }
 0x905   :  { %v5268_v29 = vpop.eup %5267  ;;  %v3241_v35 = vmul.f32 %v5266_v6, %v6790_v43  ;;  %v3415_v33 = vmul.f32 2.0, %v3399_v1  ;;  %v3256_v30 = vmul.f32 3.0, %v3240_v62  ;;  %v7309_v62 = vld [vmem:[#allocation20_spill] sm:$0xff] }
 0x906   :  { %v5270_v56 = vpop.eup %5269  ;;  %v3402_v63 = vmul.f32 %v5268_v29, %v6795_v25  ;;  %v3416_v31 = vmul.f32 2.0, %v3400_v36  ;;  %v3414_v29 = vmul.f32 2.0, %v3398_v44 }
 0x907   :  { %v5272_v21 = vpop.eup %5271  ;;  %v3242_v47 = vmul.f32 %v5270_v56, %v6800_v55  ;;  %v3257_v43 = vmul.f32 3.0, %v3241_v35  ;;  %v3252_v56 = vmul.f32 3.0, %v3236_v15 }
 0x908   :  { %v5274_v2 = vpop.eup %5273  ;;  %v3403_v12 = vmul.f32 %v5272_v21, %v6805_v37  ;;  %v3401_v37 = vmul.f32 %v5260_v0, %v6777_v20  ;;  %v3418_v59 = vmul.f32 2.0, %v3402_v63  ;;  %v3431_v21 = vsub.f32 %v3254_v41, %v3415_v33  ;;  %v3603_v41 = vld [vmem:[#allocation10 + $0x40] sm:$0xff]  ;;  %v7314_v33 = vld [vmem:[#allocation23_spill] sm:$0xff] }
 0x909   :  { %v5276_v38 = vpop.eup %5275  ;;  %v3244_v61 = vmul.f32 %v5274_v2, %v6810_v13  ;;  %v3258_v22 = vmul.f32 3.0, %v3242_v47  ;;  %v3255_v13 = vmul.f32 3.0, %v3239_v52  ;;  %v3410_v47 = vmul.f32 2.0, %v3394_v18 }
 0x90a   :  { %v5278_v19 = vpop.eup %5277  ;;  %v3405_v46 = vmul.f32 %v5276_v38, %v6815_v27  ;;  %v3419_v23 = vmul.f32 2.0, %v3403_v12  ;;  %v3417_v51 = vmul.f32 2.0, %v3401_v37  ;;  %v3249_v38 = vmul.f32 3.0, %v3233_v5 }
 0x90b   :  { %v5280_v3 = vpop.eup %5279  ;;  %v3243_v26 = vmul.f32 %v5278_v19, %v6820_v34  ;;  %v3260_v42 = vmul.f32 3.0, %v3244_v61  ;;  %v3432_v57 = vsub.f32 %v3255_v13, %v3416_v31  ;;  %v3434_v12 = vsub.f32 %v3257_v43, %v3418_v59  ;;  %v3962_v43 = vld [vmem:[#allocation9 + $0x280] sm:$0xff] }
 0x90c   :  { %v5282_v55 = vpop.eup %5281  ;;  %v3404_v50 = vmul.f32 %v5280_v3, %v6825_v39  ;;  %v3421_v20 = vmul.f32 2.0, %v3405_v46  ;;  %v3411_v39 = vmul.f32 2.0, %v3395_v32  ;;  %v3435_v6 = vsub.f32 %v3258_v22, %v3419_v23 }
 0x90d   :  { %v5284_v45 = vpop.eup %5283  ;;  %v3259_v16 = vmul.f32 3.0, %v3243_v26  ;;  %v3245_v54 = vmul.f32 %v5282_v55, %v6830_v60  ;;  %v3428_v32 = vsub.f32 %v6894_v14, %v6898_v28  ;;  %v3248_v19 = vmul.f32 3.0, %v6869_v17  ;;  %v3604_v26 = vld [vmem:[#allocation10 + $0x48] sm:$0xff] }
 0x90e   :  { %v3420_v27 = vmul.f32 2.0, %v3404_v50  ;;  %v3406_v34 = vmul.f32 %v5284_v45, %v7306_v53  ;;  %v3437_v2 = vsub.f32 %v3260_v42, %v3421_v20  ;;  %v3427_v44 = vsub.f32 %v6886_v8, %v3411_v39  ;;  %v6929_v8 = vld [vmem:[%s7194_s5] sm:$0xf]  ;;  %v7310_v45 = vld [vmem:[#allocation24_spill] sm:$0xff]  ;;  %v7315_v42 = vld [vmem:[#allocation19_spill] sm:$0xff]  ;;  %s4628_s5 = sld [smem:[#allocation2 + $0x281]] }
 0x90f   :  { %v3261_v0 = vmul.f32 3.0, %v3245_v54  ;;  %v3433_v1 = vsub.f32 %v3256_v30, %v3417_v51  ;;  %v3430_v15 = vsub.f32 %v3253_v10, %v3414_v29  ;;  %v3424_v5 = vsub.f32 %v6877_v49, %v6882_v40  ;;  %7307 = vst [vmem:[#allocation22_spill] sm:$0xff] %v6929_v8  ;;  %v7316_v20 = vld [vmem:[#allocation21_spill] sm:$0xff] }
 0x910   :  { %v3422_v25 = vmul.f32 2.0, %v3406_v34  ;;  %v3436_v9 = vsub.f32 %v3259_v16, %v3420_v27  ;;  %v3423_v18 = vsub.f32 %v6863_v4, %v6865_v7  ;;  %v3429_v48 = vsub.f32 %v3252_v56, %v3413_v11  ;;  %v7313_v34 = vld [vmem:[#allocation18_spill] sm:$0xff]  ;;  %v3802_v51 = vld [vmem:[#allocation7 + $0x288] sm:$0xff] }
 0x911   :  { %v3426_v17 = vsub.f32 %v3249_v38, %v3410_v47  ;;  %v3425_v24 = vsub.f32 %v3248_v19, %v3409_v58  ;;  %v7308_v4 = vmov 0.0   ;;  %v3587_v49 = vstv %s4579_s14  ;;  %v3805_v19 = vld [vmem:[#allocation7 + $0x2a0] sm:$0xff] }
 0x912   :  { %3463 = vmatprep.subr.mxu0 %v3436_v9  ;;  %v3438_v60 = vsub.f32 %v3261_v0, %v3422_v25  ;;  %v3584_v40 = vstv %s4578_s15  ;;  %v3605_v52 = vstv %s4580_s16  ;;  %v3801_v0 = vld [vmem:[#allocation7 + $0x280] sm:$0xff]  ;;  %v3803_v25 = vld [vmem:[#allocation7 + $0x290] sm:$0xff] }
 0x913   :  { %3464 = vmatpush1.msra.mxu0 %v3435_v6  ;;  %v3585_v61 = vmul.f32 %v3584_v40, %v7309_v62  ;;  %v3606_v35 = vmul.f32 %v3605_v52, %v3603_v41  ;;  %v3586_v22 = vmul.f32 %v3584_v40, %v7310_v45  ;;  %v3607_v16 = vmul.f32 %v3605_v52, %v3604_v26  ;;  %v3964_v9 = vld [vmem:[#allocation9 + $0x290] sm:$0xff]  ;;  %v3963_v6 = vld [vmem:[#allocation9 + $0x288] sm:$0xff]  ;;  %v3966_v58 = vld [vmem:[#allocation9 + $0x2a0] sm:$0xff] }
 0x914   :  { %3534 = vmatprep.subr.mxu1 %v3438_v60  ;;  %3465 = vmatprep.subr.mxu0 %v3432_v57  ;;  %v3804_v60 = vld [vmem:[#allocation7 + $0x298] sm:$0xff]  ;;  %v3967_v41 = vld [vmem:[#allocation9 + $0x2a8] sm:$0xff] }
 0x915   :  { %3535 = vmatpush1.msra.mxu1 %v3437_v2  ;;  %3466 = vmatpush1.msra.mxu0 %v3431_v21  ;;  %v3965_v2 = vld [vmem:[#allocation9 + $0x298] sm:$0xff] }
 0x916   :  { %3536 = vmatprep.subr.mxu1 %v3434_v12  ;;  %3467 = vmatprep.subr.mxu0 %v3428_v32 }
 0x917   :  { %3537 = vmatpush1.msra.mxu1 %v3433_v1  ;;  %3468 = vmatpush1.msra.mxu0 %v3427_v44 }
 0x918   :  { %3538 = vmatprep.subr.mxu1 %v3430_v15  ;;  %3469 = vmatprep.subr.mxu0 %v3424_v5  ;;  %v3807_v5 = vld [vmem:[#allocation7 + $0x2b0] sm:$0xff] }
 0x919   :  { %3539 = vmatpush1.msra.mxu1 %v3429_v48  ;;  %3470 = vmatpush1.msra.mxu0 %v3423_v18  ;;  %v3968_v18 = vld [vmem:[#allocation9 + $0x2b0] sm:$0xff] }
 0x91a   :  { %3540 = vmatprep.subr.mxu1 %v3426_v17  ;;  %4576 = vmatmul.mubr.msk.f32.vlgmr.msra.gmra.mxu0 %vm640_vm2, %v6929_v8 }
 0x91b   :  { %3541 = vmatpush1.msra.mxu1 %v3425_v24  ;;  %3686 = vmatprep.mubr.f32.mxu0 %v7308_v4 }
 0x91c   :  { %4577 = vmatmul.mubr.msk.f32.vlgmr.msra.gmra.mxu1 %vm640_vm2, %v6929_v8 }
 0x91d   :  { %3775 = vmatprep.mubr.f32.mxu1 %v7308_v4 }
 0x9da   :  { %v3505_v7 = vpop.f32.mrf.mxu0 }
 0x9db   :  { %v3588_v36 = vmul.f32 %v3587_v49, %v3505_v7 }
 0x9dc   :  { %v3576_v14 = vpop.f32.mrf.mxu1  ;;  %v3507_v28 = vpop.f32.mrf.mxu0 }
 0x9dd   :  { %v3589_v3 = vmul.f32 %v3587_v49, %v3507_v28  ;;  %v3590_v55 = vmul.f32 %v3587_v49, %v3576_v14 }
 0x9de   :  { %v3578_v46 = vpop.f32.mrf.mxu1 }
 0x9df   :  { %v3596_v37 = vcombine.low %v3588_v36, %v3589_v3  ;;  %v3591_v63 = vmul.f32 %v3587_v49, %v3578_v46  ;;  %v3806_v49 = vld [vmem:[#allocation7 + $0x2a8] sm:$0xff] }
 0x9e1   :  { %v3600_v50 = vsub.f32 %v3585_v61, %v3596_v37  ;;  %v3597_v23 = vcombine.low %v3590_v55, %v3591_v63  ;;  %v3808_v61 = vld [vmem:[#allocation7 + $0x2b8] sm:$0xff] }
 0x9e2   :  { %v3969_v55 = vld [vmem:[#allocation9 + $0x2b8] sm:$0xff] }
 0x9e3   :  { %v6939_v54 = vadd.f32 %v3606_v35, %v3600_v50  ;;  %v3601_v13 = vsub.f32 %v3586_v22, %v3597_v23 }
 0x9e5   :  { %7311 = vst [vmem:[#allocation20_spill] sm:$0xff] %v6939_v54  ;;  %v6941_v31 = vadd.f32 %v3607_v16, %v3601_v13  ;;  %v3612_v27 = vcombine.high %v6939_v54, %v6939_v54 }
 0x9e7   :  { %7312 = vst [vmem:[#allocation24_spill] sm:$0xff] %v6941_v31  ;;  %4581 = vmatprep.subr.msk.mxu0 %vm117_vm0, %v3612_v27  ;;  %v3613_v53 = vcombine.high %v6941_v31, %v6941_v31 }
 0x9e8   :  { %4582 = vmatpush1.msk.msra.mxu0 %vm117_vm0, %v6939_v54 }
 0x9e9   :  { %4587 = vmatprep.subr.msk.mxu1 %vm117_vm0, %v3613_v53  ;;  %4583 = vmatmul.mubr.msk.f32.vlgmr.msra.gmra.mxu0 %vm104_vm1, %v7313_v34 }
 0x9ea   :  { %4588 = vmatpush1.msk.msra.mxu1 %vm117_vm0, %v6941_v31  ;;  %3692 = vmatprep.mubr.f32.mxu0 %v7308_v4 }
 0x9eb   :  { %4589 = vmatmul.mubr.msk.f32.vlgmr.msra.gmra.mxu1 %vm104_vm1, %v7313_v34 }
 0x9ec   :  { %3781 = vmatprep.mubr.f32.mxu1 %v7308_v4 }
 0x9ed   :  { %4584 = vmatmul.mubr.msk.f32.gmra.mxu0 %vm104_vm1, %v7314_v33 }
 0x9ee   :  { %3698 = vmatprep.mubr.f32.mxu0 %v7308_v4 }
 0x9ef   :  { %4590 = vmatmul.mubr.msk.f32.gmra.mxu1 %vm104_vm1, %v7314_v33 }
 0x9f0   :  { %3787 = vmatprep.mubr.f32.mxu1 %v7308_v4 }
 0x9f1   :  { %4585 = vmatmul.mubr.msk.f32.gmra.mxu0 %vm104_vm1, %v7315_v42 }
 0x9f2   :  { %3704 = vmatprep.mubr.f32.mxu0 %v7308_v4 }
 0x9f3   :  { %4591 = vmatmul.mubr.msk.f32.gmra.mxu1 %vm104_vm1, %v7315_v42 }
 0x9f4   :  { %3793 = vmatprep.mubr.f32.mxu1 %v7308_v4 }
 0x9f5   :  { %4586 = vmatmul.mubr.msk.f32.gmra.mxu0 %vm104_vm1, %v7316_v20 }
 0x9f6   :  { %4202 = vmatprep.mubr.f32.mxu0 %v7308_v4 }
 0x9f7   :  { %4592 = vmatmul.mubr.msk.f32.gmra.mxu1 %vm104_vm1, %v7316_v20 }
 0x9f8   :  { %4273 = vmatprep.mubr.f32.mxu1 %v7308_v4 }
 0xaa9   :  { %v3688_v59 = vpop.f32.mrf.mxu0 }
 0xaaa   :  { %v6977_v39 = vadd.f32 %v3801_v0, %v3688_v59  ;;  %v6979_v30 = vadd.f32 %v3962_v43, %v3688_v59 }
 0xaab   :  { %v3777_v10 = vpop.f32.mrf.mxu1  ;;  %v3690_v29 = vpop.f32.mrf.mxu0 }
 0xaac   :  { %v4593_v57 = vmul.f32 -1.442695, %v6977_v39  ;;  %v4609_v56 = vmul.f32 -1.442695, %v6979_v30  ;;  %v6983_v11 = vadd.f32 %v3803_v25, %v3777_v10  ;;  %v6985_v21 = vadd.f32 %v3964_v9, %v3777_v10 }
 0xaad   :  { %v6987_v38 = vadd.f32 %v3802_v51, %v3690_v29  ;;  %v6989_v47 = vadd.f32 %v3963_v6, %v3690_v29  ;;  %v3779_v12 = vpop.f32.mrf.mxu1  ;;  %v3694_v32 = vpop.f32.mrf.mxu0 }
 0xaae   :  { %5285 = vpow2.f32 %v4593_v57  ;;  %v4595_v44 = vmul.f32 -1.442695, %v6983_v11  ;;  %v4611_v1 = vmul.f32 -1.442695, %v6985_v21  ;;  %v6993_v15 = vadd.f32 %v3804_v60, %v3779_v12 }
 0xaaf   :  { %5287 = vpow2.f32 %v4609_v56  ;;  %v4594_v48 = vmul.f32 -1.442695, %v6987_v38  ;;  %v4610_v17 = vmul.f32 -1.442695, %v6989_v47  ;;  %v6997_v24 = vadd.f32 %v3965_v2, %v3779_v12  ;;  %v3783_v4 = vpop.f32.mrf.mxu1  ;;  %v3696_v7 = vpop.f32.mrf.mxu0  ;;  %v3809_v12 = vld [vmem:[#allocation7 + $0x2c0] sm:$0xff] }
 0xab0   :  { %5289 = vpow2.f32 %v4595_v44  ;;  %v4596_v40 = vmul.f32 -1.442695, %v6993_v15  ;;  %v7000_v14 = vadd.f32 %v3805_v19, %v3694_v32  ;;  %v7002_v28 = vadd.f32 %v3966_v58, %v3694_v32  ;;  %v3970_v58 = vld [vmem:[#allocation9 + $0x2c0] sm:$0xff] }
 0xab1   :  { %5291 = vpow2.f32 %v4611_v1  ;;  %v4612_v52 = vmul.f32 -1.442695, %v6997_v24  ;;  %v7005_v36 = vadd.f32 %v3807_v5, %v3783_v4  ;;  %v7007_v3 = vadd.f32 %v3968_v18, %v3783_v4  ;;  %v3785_v62 = vpop.f32.mrf.mxu1  ;;  %v3700_v2 = vpop.f32.mrf.mxu0  ;;  %v3811_v18 = vld [vmem:[#allocation7 + $0x2d0] sm:$0xff] }
 0xab2   :  { %5293 = vpow2.f32 %v4594_v48  ;;  %v4597_v46 = vmul.f32 -1.442695, %v7000_v14  ;;  %v7010_v26 = vadd.f32 %v3806_v49, %v3696_v7  ;;  %v4613_v37 = vmul.f32 -1.442695, %v7002_v28 }
 0xab3   :  { %5295 = vpow2.f32 %v4610_v17  ;;  %v7013_v35 = vadd.f32 %v3967_v41, %v3696_v7  ;;  %v4599_v63 = vmul.f32 -1.442695, %v7005_v36  ;;  %v7016_v50 = vadd.f32 %v3808_v61, %v3785_v62  ;;  %v3789_v5 = vpop.f32.mrf.mxu1  ;;  %v3972_v7 = vld [vmem:[#allocation9 + $0x2d0] sm:$0xff] }
 0xab4   :  { %5297 = vpow2.f32 %v4596_v40  ;;  %v4615_v45 = vmul.f32 -1.442695, %v7007_v3  ;;  %v7019_v22 = vadd.f32 %v3969_v55, %v3785_v62  ;;  %v4598_v23 = vmul.f32 -1.442695, %v7010_v26  ;;  %v3810_v62 = vld [vmem:[#allocation7 + $0x2c8] sm:$0xff] }
 0xab5   :  { %5299 = vpow2.f32 %v4612_v52  ;;  %v4614_v16 = vmul.f32 -1.442695, %v7013_v35  ;;  %v4600_v13 = vmul.f32 -1.442695, %v7016_v50  ;;  %v7025_v4 = vadd.f32 %v3809_v12, %v3700_v2  ;;  %v3702_v52 = vpop.f32.mrf.mxu0  ;;  %v3815_v12 = vld [vmem:[#allocation7 + $0x2f0] sm:$0xff] }
 0xab6   :  { %5301 = vpow2.f32 %v4597_v46  ;;  %v4616_v27 = vmul.f32 -1.442695, %v7019_v22  ;;  %v7027_v41 = vadd.f32 %v3970_v58, %v3700_v2  ;;  %v7029_v55 = vadd.f32 %v3811_v18, %v3789_v5 }
 0xab7   :  { %5303 = vpow2.f32 %v4613_v37  ;;  %v3971_v37 = vld [vmem:[#allocation9 + $0x2c8] sm:$0xff] }
 0xab8   :  { %5305 = vpow2.f32 %v4599_v63 }
 0xab9   :  { %5307 = vpow2.f32 %v4615_v45 }
 0xaba   :  { %5309 = vpow2.f32 %v4598_v23  ;;  %v7031_v23 = vadd.f32 %v3972_v7, %v3789_v5 }
 0xabb   :  { %v5286_v53 = vpop.eup %5285  ;;  %5311 = vpow2.f32 %v4614_v16  ;;  %v3791_v16 = vpop.f32.mrf.mxu1 }
 0xabc   :  { %v5288_v34 = vpop.eup %5287  ;;  %v3881_v33 = vadd.f32 1.0, %v5286_v53  ;;  %5313 = vpow2.f32 %v4600_v13  ;;  %v3812_v13 = vld [vmem:[#allocation7 + $0x2d8] sm:$0xff] }
 0xabd   :  { %v5290_v42 = vpop.eup %5289  ;;  %v4042_v20 = vadd.f32 1.0, %v5288_v34  ;;  %5315 = vpow2.f32 %v4616_v27  ;;  %v4601_v34 = vmul.f32 -1.442695, %v7025_v4  ;;  %v3795_v2 = vpop.f32.mrf.mxu1 }
 0xabe   :  { %v5292_v0 = vpop.eup %5291  ;;  %5317 = vrcp.f32 %v3881_v33  ;;  %v3883_v43 = vadd.f32 1.0, %v5290_v42  ;;  %v7034_v33 = vadd.f32 %v3810_v62, %v3702_v52  ;;  %v3973_v42 = vld [vmem:[#allocation9 + $0x2d8] sm:$0xff] }
 0xabf   :  { %v5294_v59 = vpop.eup %5293  ;;  %5319 = vrcp.f32 %v4042_v20  ;;  %v4044_v25 = vadd.f32 1.0, %v5292_v0 }
 0xac0   :  { %v5296_v9 = vpop.eup %5295  ;;  %5321 = vrcp.f32 %v3883_v43  ;;  %v3882_v51 = vadd.f32 1.0, %v5294_v59  ;;  %v4617_v43 = vmul.f32 -1.442695, %v7027_v41  ;;  %v7039_v59 = vadd.f32 %v3971_v37, %v3702_v52  ;;  %v3975_v52 = vld [vmem:[#allocation9 + $0x2e8] sm:$0xff]  ;;  %v3797_v37 = vpop.f32.mrf.mxu1 }
 0xac1   :  { %v5298_v6 = vpop.eup %5297  ;;  %5323 = vrcp.f32 %v4044_v25  ;;  %v4043_v10 = vadd.f32 1.0, %v5296_v9  ;;  %v3706_v25 = vpop.f32.mrf.mxu0  ;;  %v3813_v9 = vld [vmem:[#allocation7 + $0x2e0] sm:$0xff] }
 0xac2   :  { %v5300_v29 = vpop.eup %5299  ;;  %5325 = vrcp.f32 %v3882_v51  ;;  %v3884_v60 = vadd.f32 1.0, %v5298_v6  ;;  %v4603_v6 = vmul.f32 -1.442695, %v7029_v55  ;;  %v7054_v58 = vadd.f32 %v3813_v9, %v3706_v25 }
 0xac3   :  { %v5302_v57 = vpop.eup %5301  ;;  %5327 = vrcp.f32 %v4043_v10  ;;  %v4045_v56 = vadd.f32 1.0, %v5300_v29  ;;  %v7044_v10 = vadd.f32 %v3812_v13, %v3791_v16  ;;  %v3974_v29 = vld [vmem:[#allocation9 + $0x2e0] sm:$0xff]  ;;  %v4618_v5 = vmul.f32 -1.442695, %v7039_v59 }
 0xac4   :  { %v5304_v32 = vpop.eup %5303  ;;  %5329 = vrcp.f32 %v3884_v60  ;;  %v3885_v19 = vadd.f32 1.0, %v5302_v57  ;;  %v4619_v57 = vmul.f32 -1.442695, %v7031_v23  ;;  %v7059_v18 = vadd.f32 %v3974_v29, %v3706_v25 }
 0xac5   :  { %v5306_v44 = vpop.eup %5305  ;;  %5331 = vrcp.f32 %v4045_v56  ;;  %v4046_v1 = vadd.f32 1.0, %v5304_v32  ;;  %v7049_v56 = vadd.f32 %v3973_v42, %v3791_v16  ;;  %v4605_v16 = vmul.f32 -1.442695, %v7054_v58 }
 0xac6   :  { %v5308_v48 = vpop.eup %5307  ;;  %5333 = vrcp.f32 %v3885_v19  ;;  %v3887_v17 = vadd.f32 1.0, %v5306_v44  ;;  %v4602_v19 = vmul.f32 -1.442695, %v7034_v33  ;;  %v3976_v44 = vld [vmem:[#allocation9 + $0x2f0] sm:$0xff] }
 0xac7   :  { %v5310_v49 = vpop.eup %5309  ;;  %5335 = vrcp.f32 %v4046_v1  ;;  %v4048_v40 = vadd.f32 1.0, %v5308_v48  ;;  %v3708_v48 = vpop.f32.mrf.mxu0 }
 0xac8   :  { %v5312_v61 = vpop.eup %5311  ;;  %5337 = vrcp.f32 %v3887_v17  ;;  %v3886_v46 = vadd.f32 1.0, %v5310_v49  ;;  %v3814_v17 = vld [vmem:[#allocation7 + $0x2e8] sm:$0xff]  ;;  %v4604_v49 = vmul.f32 -1.442695, %v7044_v10  ;;  %v7079_v42 = vadd.f32 %v3975_v52, %v3708_v48 }
 0xac9   :  { %v5314_v63 = vpop.eup %5313  ;;  %5339 = vrcp.f32 %v4048_v40  ;;  %v4047_v45 = vadd.f32 1.0, %v5312_v61  ;;  %v7064_v40 = vadd.f32 %v3815_v12, %v3795_v2  ;;  %v4620_v61 = vmul.f32 -1.442695, %v7049_v56 }
 0xaca   :  { %v5316_v27 = vpop.eup %5315  ;;  %5341 = vrcp.f32 %v3886_v46  ;;  %v3888_v53 = vadd.f32 1.0, %v5314_v63  ;;  %v7069_v46 = vadd.f32 %v3976_v44, %v3795_v2  ;;  %v3816_v63 = vld [vmem:[#allocation7 + $0x2f8] sm:$0xff]  ;;  %v7074_v13 = vadd.f32 %v3814_v17, %v3708_v48 }
 0xacb   :  { %v7036_v20 = vpop.eup %5317  ;;  %5343 = vrcp.f32 %v4047_v45  ;;  %v4049_v0 = vadd.f32 1.0, %v5316_v27  ;;  %v3977_v27 = vld [vmem:[#allocation9 + $0x2f8] sm:$0xff]  ;;  %v7084_v25 = vadd.f32 %v3816_v63, %v3797_v37 }
 0xacc   :  { %v7041_v51 = vpop.eup %5319  ;;  %5345 = vrcp.f32 %v3888_v53  ;;  %v7089_v29 = vadd.f32 %v3977_v27, %v3797_v37  ;;  %v4606_v2 = vmul.f32 -1.442695, %v7074_v13 }
 0xacd   :  { %v7046_v60 = vpop.eup %5321  ;;  %5347 = vrcp.f32 %v4049_v0 }
 0xace   :  { %v7051_v32 = vpop.eup %5323  ;;  %5349 = vpow2.f32 %v4601_v34  ;;  %v4621_v34 = vmul.f32 -1.442695, %v7059_v18  ;;  %7317 = vst [vmem:[#allocation18_spill] sm:$0xff] %v7089_v29  ;;  %v4624_v17 = vmul.f32 -1.442695, %v7089_v29 }
 0xacf   :  { %v7056_v1 = vpop.eup %5325  ;;  %5351 = vpow2.f32 %v4617_v43  ;;  %v4607_v43 = vmul.f32 -1.442695, %v7064_v40 }
 0xad0   :  { %v7061_v7 = vpop.eup %5327  ;;  %5353 = vpow2.f32 %v4603_v6  ;;  %v4623_v6 = vmul.f32 -1.442695, %v7069_v46 }
 0xad1   :  { %v7066_v62 = vpop.eup %5329  ;;  %5355 = vpow2.f32 %v4619_v57 }
 0xad2   :  { %v7071_v45 = vpop.eup %5331  ;;  %5357 = vpow2.f32 %v4602_v19  ;;  %v4622_v19 = vmul.f32 -1.442695, %v7079_v42 }
 0xad3   :  { %v7076_v53 = vpop.eup %5333  ;;  %5359 = vpow2.f32 %v4618_v5  ;;  %v4608_v5 = vmul.f32 -1.442695, %v7084_v25 }
 0xad4   :  { %v7081_v0 = vpop.eup %5335  ;;  %5361 = vpow2.f32 %v4604_v49 }
 0xad5   :  { %v7086_v9 = vpop.eup %5337  ;;  %5363 = vpow2.f32 %v4620_v61 }
 0xad6   :  { %v7091_v57 = vpop.eup %5339  ;;  %5365 = vpow2.f32 %v4605_v16 }
 0xad7   :  { %v7094_v12 = vpop.eup %5341  ;;  %5367 = vpow2.f32 %v4621_v34 }
 0xad8   :  { %v7097_v44 = vpop.eup %5343  ;;  %5369 = vpow2.f32 %v4607_v43 }
 0xad9   :  { %v7100_v48 = vpop.eup %5345  ;;  %5371 = vpow2.f32 %v4623_v6 }
 0xada   :  { %v7103_v49 = vpop.eup %5347  ;;  %5373 = vpow2.f32 %v4606_v2 }
 0xadb   :  { %v5350_v52 = vpop.eup %5349  ;;  %5375 = vpow2.f32 %v4622_v19 }
 0xadc   :  { %v5352_v61 = vpop.eup %5351  ;;  %v3889_v37 = vadd.f32 1.0, %v5350_v52  ;;  %5377 = vpow2.f32 %v4608_v5 }
 0xadd   :  { %v5354_v63 = vpop.eup %5353  ;;  %v4050_v16 = vadd.f32 1.0, %v5352_v61  ;;  %5379 = vpow2.f32 %v4624_v17 }
 0xade   :  { %v5356_v27 = vpop.eup %5355  ;;  %5381 = vrcp.f32 %v3889_v37  ;;  %v3891_v34 = vadd.f32 1.0, %v5354_v63 }
 0xadf   :  { %v5358_v43 = vpop.eup %5357  ;;  %5383 = vrcp.f32 %v4050_v16  ;;  %v4052_v31 = vadd.f32 1.0, %v5356_v27 }
 0xae0   :  { %v5360_v6 = vpop.eup %5359  ;;  %5385 = vrcp.f32 %v3891_v34  ;;  %v3890_v54 = vadd.f32 1.0, %v5358_v43 }
 0xae1   :  { %v5362_v8 = vpop.eup %5361  ;;  %5387 = vrcp.f32 %v4052_v31  ;;  %v4051_v2 = vadd.f32 1.0, %v5360_v6 }
 0xae2   :  { %v5364_v29 = vpop.eup %5363  ;;  %5389 = vrcp.f32 %v3890_v54  ;;  %v3892_v19 = vadd.f32 1.0, %v5362_v8 }
 0xae3   :  { %v5366_v52 = vpop.eup %5365  ;;  %5391 = vrcp.f32 %v4051_v2  ;;  %v4053_v5 = vadd.f32 1.0, %v5364_v29 }
 0xae4   :  { %v5368_v61 = vpop.eup %5367  ;;  %5393 = vrcp.f32 %v3892_v19  ;;  %v3893_v17 = vadd.f32 1.0, %v5366_v52 }
 0xae5   :  { %v5370_v37 = vpop.eup %5369  ;;  %5395 = vrcp.f32 %v4053_v5  ;;  %v4054_v63 = vadd.f32 1.0, %v5368_v61 }
 0xae6   :  { %v5372_v16 = vpop.eup %5371  ;;  %5397 = vrcp.f32 %v3893_v17  ;;  %v3895_v27 = vadd.f32 1.0, %v5370_v37  ;;  %v3929_v37 = vmul.f32 %v7036_v20, %v6977_v39 }
 0xae7   :  { %v5374_v34 = vpop.eup %5373  ;;  %5399 = vrcp.f32 %v4054_v63  ;;  %v4056_v43 = vadd.f32 1.0, %v5372_v16  ;;  %v4090_v63 = vmul.f32 %v7041_v51, %v6979_v30  ;;  %v7123_v30 = vmul.f32 %v7046_v60, %v6983_v11 }
 0xae8   :  { %v5376_v31 = vpop.eup %5375  ;;  %5401 = vrcp.f32 %v3895_v27  ;;  %v3894_v6 = vadd.f32 1.0, %v5374_v34  ;;  %v3930_v27 = vmul.f32 %v7056_v1, %v6987_v38  ;;  %v7117_v39 = vmul.f32 3.0, %v3929_v37  ;;  %v7318_v37 = vld [vmem:[#allocation18_spill] sm:$0xff] }
 0xae9   :  { %v5378_v54 = vpop.eup %5377  ;;  %5403 = vrcp.f32 %v4056_v43  ;;  %v4055_v8 = vadd.f32 1.0, %v5376_v31  ;;  %v4091_v43 = vmul.f32 %v7061_v7, %v6989_v47  ;;  %v3933_v31 = vmul.f32 %v7076_v53, %v7000_v14 }
 0xaea   :  { %v5380_v2 = vpop.eup %5379  ;;  %5405 = vrcp.f32 %v3894_v6  ;;  %v3896_v29 = vadd.f32 1.0, %v5378_v54  ;;  %v3934_v54 = vmul.f32 %v7094_v12, %v7010_v26  ;;  %v7119_v20 = vmul.f32 2.0, %v4090_v63 }
 0xaeb   :  { %v5382_v19 = vpop.eup %5381  ;;  %5407 = vrcp.f32 %v4055_v8  ;;  %v4057_v52 = vadd.f32 1.0, %v5380_v2  ;;  %v4095_v38 = vmul.f32 %v7097_v44, %v7013_v35  ;;  %v7129_v14 = vmul.f32 %v7051_v32, %v6985_v21 }
 0xaec   :  { %v5384_v5 = vpop.eup %5383  ;;  %5409 = vrcp.f32 %v3896_v29  ;;  %v7131_v51 = vmul.f32 3.0, %v3930_v27  ;;  %v3932_v26 = vmul.f32 %v7066_v62, %v6993_v15  ;;  %v3937_v1 = vmul.f32 %v5382_v19, %v7025_v4 }
 0xaed   :  { %v5386_v61 = vpop.eup %5385  ;;  %5411 = vrcp.f32 %v4057_v52  ;;  %v7136_v53 = vmul.f32 2.0, %v4091_v43  ;;  %v4093_v11 = vmul.f32 %v7071_v45, %v6997_v24  ;;  %v7140_v60 = vmul.f32 3.0, %v3933_v31 }
 0xaee   :  { %v5388_v17 = vpop.eup %5387  ;;  %v4094_v35 = vmul.f32 %v7081_v0, %v7002_v28  ;;  %v3935_v32 = vmul.f32 %v7086_v9, %v7005_v36  ;;  %v4096_v15 = vmul.f32 %v7091_v57, %v7007_v3  ;;  %v7148_v62 = vmul.f32 3.0, %v3934_v54 }
 0xaef   :  { %v5390_v16 = vpop.eup %5389  ;;  %v3936_v4 = vmul.f32 %v7100_v48, %v7016_v50  ;;  %v7152_v44 = vmul.f32 2.0, %v4095_v38  ;;  %v4097_v24 = vmul.f32 %v7103_v49, %v7019_v22  ;;  %v3953_v36 = vmul.f32 3.0, %v3937_v1 }
 0xaf0   :  { %v5392_v34 = vpop.eup %5391  ;;  %v4098_v9 = vmul.f32 %v5384_v5, %v7027_v41  ;;  %v3938_v3 = vmul.f32 %v5390_v16, %v7034_v33  ;;  %v3939_v50 = vmul.f32 %v5386_v61, %v7029_v55  ;;  %v4112_v1 = vmul.f32 2.0, %v4096_v15 }
 0xaf1   :  { %v5394_v6 = vpop.eup %5393  ;;  %v4099_v57 = vmul.f32 %v5392_v34, %v7039_v59  ;;  %v3952_v54 = vmul.f32 3.0, %v3936_v4  ;;  %v4108_v4 = vmul.f32 2.0, %v7129_v14 }
 0xaf2   :  { %v5396_v8 = vpop.eup %5395  ;;  %v3940_v49 = vmul.f32 %v5394_v6, %v7044_v10  ;;  %v4114_v63 = vmul.f32 2.0, %v4098_v9  ;;  %v3955_v43 = vmul.f32 3.0, %v3939_v50 }
 0xaf3   :  { %v5398_v47 = vpop.eup %5397  ;;  %v4101_v41 = vmul.f32 %v5396_v8, %v7049_v56  ;;  %v4115_v61 = vmul.f32 2.0, %v4099_v57  ;;  %v4113_v8 = vmul.f32 2.0, %v4097_v24 }
 0xaf4   :  { %v5400_v7 = vpop.eup %5399  ;;  %v3941_v28 = vmul.f32 %v5398_v47, %v7054_v58  ;;  %v3956_v10 = vmul.f32 3.0, %v3940_v49  ;;  %v3951_v47 = vmul.f32 3.0, %v3935_v32 }
 0xaf5   :  { %v5402_v21 = vpop.eup %5401  ;;  %v4102_v45 = vmul.f32 %v5400_v7, %v7059_v18  ;;  %v4100_v18 = vmul.f32 %v5388_v17, %v7031_v23  ;;  %v4117_v27 = vmul.f32 2.0, %v4101_v41  ;;  %v4130_v7 = vsub.f32 %v3953_v36, %v4114_v63 }
 0xaf6   :  { %v5404_v12 = vpop.eup %5403  ;;  %v3943_v48 = vmul.f32 %v5402_v21, %v7064_v40  ;;  %v3957_v59 = vmul.f32 3.0, %v3941_v28  ;;  %v3954_v40 = vmul.f32 3.0, %v3938_v3  ;;  %v4109_v28 = vmul.f32 2.0, %v4093_v11 }
 0xaf7   :  { %v5406_v0 = vpop.eup %5405  ;;  %v4104_v29 = vmul.f32 %v5404_v12, %v7069_v46  ;;  %v4118_v52 = vmul.f32 2.0, %v4102_v45  ;;  %v4116_v31 = vmul.f32 2.0, %v4100_v18  ;;  %v3948_v12 = vmul.f32 3.0, %v3932_v26 }
 0xaf8   :  { %v5408_v2 = vpop.eup %5407  ;;  %v3942_v22 = vmul.f32 %v5406_v0, %v7074_v13  ;;  %v3959_v16 = vmul.f32 3.0, %v3943_v48  ;;  %v4131_v38 = vsub.f32 %v3954_v40, %v4115_v61  ;;  %v4133_v45 = vsub.f32 %v3956_v10, %v4117_v27 }
 0xaf9   :  { %v5410_v58 = vpop.eup %5409  ;;  %v4103_v33 = vmul.f32 %v5408_v2, %v7079_v42  ;;  %v4120_v23 = vmul.f32 2.0, %v4104_v29  ;;  %v4110_v42 = vmul.f32 2.0, %v4094_v35  ;;  %v4134_v6 = vsub.f32 %v3957_v59, %v4118_v52  ;;  %v7320_v2 = vld [vmem:[#allocation20_spill] sm:$0xff]  ;;  %v4303_v29 = vld [vmem:[#allocation10 + $0x58] sm:$0xff] }
 0xafa   :  { %v5412_v19 = vpop.eup %5411  ;;  %v3958_v5 = vmul.f32 3.0, %v3942_v22  ;;  %v3944_v55 = vmul.f32 %v5410_v58, %v7084_v25  ;;  %v4127_v35 = vsub.f32 %v7148_v62, %v7152_v44  ;;  %v3947_v0 = vmul.f32 3.0, %v7123_v30  ;;  %v4302_v44 = vld [vmem:[#allocation10 + $0x50] sm:$0xff] }
 0xafb   :  { %v4119_v46 = vmul.f32 2.0, %v4103_v33  ;;  %v4105_v13 = vmul.f32 %v5412_v19, %v7318_v37  ;;  %v4136_v21 = vsub.f32 %v3959_v16, %v4120_v23  ;;  %v4126_v24 = vsub.f32 %v7140_v60, %v4110_v42  ;;  %v7319_v60 = vld [vmem:[#allocation22_spill] sm:$0xff]  ;;  %v7321_v33 = vld [vmem:[#allocation24_spill] sm:$0xff] }
 0xafc   :  { %v3960_v17 = vmul.f32 3.0, %v3944_v55  ;;  %v4132_v9 = vsub.f32 %v3955_v43, %v4116_v31  ;;  %v4129_v32 = vsub.f32 %v3952_v54, %v4113_v8  ;;  %v4123_v26 = vsub.f32 %v7131_v51, %v7136_v53 }
 0xafd   :  { %v4121_v56 = vmul.f32 2.0, %v4105_v13  ;;  %v4135_v34 = vsub.f32 %v3958_v5, %v4119_v46  ;;  %v4122_v11 = vsub.f32 %v7117_v39, %v7119_v20  ;;  %v4128_v15 = vsub.f32 %v3951_v47, %v4112_v1 }
 0xafe   :  { %v4125_v30 = vsub.f32 %v3948_v12, %v4109_v28  ;;  %v4124_v14 = vsub.f32 %v3947_v0, %v4108_v4  ;;  %v4286_v20 = vstv %s4628_s5  ;;  %v4283_v51 = vstv %s4627_s2 }
 0xaff   :  { %4162 = vmatprep.subr.mxu0 %v4135_v34  ;;  %v4137_v25 = vsub.f32 %v3960_v17, %v4121_v56  ;;  %v4304_v36 = vstv %s4629_s17  ;;  %v4284_v50 = vmul.f32 %v4283_v51, %v7320_v2  ;;  %v4285_v19 = vmul.f32 %v4283_v51, %v7321_v33 }
 0xb00   :  { %4163 = vmatpush1.msra.mxu0 %v4134_v6  ;;  %v4305_v49 = vmul.f32 %v4304_v36, %v4302_v44  ;;  %v4306_v52 = vmul.f32 %v4304_v36, %v4303_v29 }
 0xb01   :  { %4233 = vmatprep.subr.mxu1 %v4137_v25  ;;  %4164 = vmatprep.subr.mxu0 %v4131_v38 }
 0xb02   :  { %4234 = vmatpush1.msra.mxu1 %v4136_v21  ;;  %4165 = vmatpush1.msra.mxu0 %v4130_v7 }
 0xb03   :  { %4235 = vmatprep.subr.mxu1 %v4133_v45  ;;  %4166 = vmatprep.subr.mxu0 %v4127_v35 }
 0xb04   :  { %4236 = vmatpush1.msra.mxu1 %v4132_v9  ;;  %4167 = vmatpush1.msra.mxu0 %v4126_v24 }
 0xb05   :  { %4237 = vmatprep.subr.mxu1 %v4129_v32  ;;  %4168 = vmatprep.subr.mxu0 %v4123_v26 }
 0xb06   :  { %4238 = vmatpush1.msra.mxu1 %v4128_v15  ;;  %4169 = vmatpush1.msra.mxu0 %v4122_v11 }
 0xb07   :  { %4239 = vmatprep.subr.mxu1 %v4125_v30  ;;  %4625 = vmatmul.mubr.msk.f32.vlgmr.msra.gmra.mxu0 %vm640_vm2, %v7319_v60 }
 0xb08   :  { %4240 = vmatpush1.msra.mxu1 %v4124_v14 }
 0xb09   :  { %4626 = vmatmul.mubr.msk.f32.vlgmr.msra.gmra.mxu1 %vm640_vm2, %v7319_v60 }
 0xbc7   :  { %v4204_v39 = vpop.f32.mrf.mxu0 }
 0xbc8   :  { %v4287_v3 = vmul.f32 %v4286_v20, %v4204_v39 }
 0xbc9   :  { %v4275_v53 = vpop.f32.mrf.mxu1  ;;  %v4206_v62 = vpop.f32.mrf.mxu0 }
 0xbca   :  { %v4288_v57 = vmul.f32 %v4286_v20, %v4206_v62  ;;  %v4289_v22 = vmul.f32 %v4286_v20, %v4275_v53 }
 0xbcb   :  { %v4277_v48 = vpop.f32.mrf.mxu1 }
 0xbcc   :  { %v4295_v58 = vcombine.low %v4287_v3, %v4288_v57  ;;  %v4290_v18 = vmul.f32 %v4286_v20, %v4277_v48 }
 0xbce   :  { %v4299_v41 = vsub.f32 %v4284_v50, %v4295_v58  ;;  %v4296_v59 = vcombine.low %v4289_v22, %v4290_v18 }
 0xbd0   :  { %v4300_v5 = vsub.f32 %v4285_v19, %v4296_v59  ;;  %v4307_v55 = vadd.f32 %v4305_v49, %v4299_v41 }
 0xbd2   :  { %v4308_v40 = vadd.f32 %v4306_v52, %v4300_v5  ;;  %v4630_v61 = vclamps-f32 %v4307_v55, 1.0 }
 0xbd4   :  { %v4631_v46 = vclamps-f32 %v4308_v40, 1.0  ;;  %v4313_v37 = vmul.f32 0.5, %v4630_v61 }
 0xbd6   :  { %v4314_v13 = vmul.f32 0.5, %v4631_v46  ;;  %v4315_v63 = vadd.f32 0.5, %v4313_v37 }
 0xbd8   :  { %v4316_v16 = vadd.f32 0.5, %v4314_v13  ;;  %4317 = vst [vmem:[#allocation12] sm:$0xff] %v4315_v63 }
 0xbda   :  { %4318 = vst [vmem:[#allocation12 + $0x8] sm:$0xff] %v4316_v16 }
 0xbdb   :  { %5526 = shalt.err (!%p5523_p1)
}
 0xbdc   :  { %4328 = dma.vmem_to_hbm [thread:$0]  %s4326_s19, 256, %s7196_s7, [#allocation4]  }
 0xbdd   :  { %5543 = dma.done.wait [#allocation4], 256  }
 0xbde   :  { %5544 = vsyncadd [#allocation4], 4294967040 }
 0xbdf   :  { %4332 = vsyncpa [#allocation3], 1 }
 0xbe0   :  { %4333 = vsyncpa [#allocation8], 1 }
 0xbe1   :  { %4334 = vsyncpa [#allocation11], 1 }
 0xbe2   :  { %4335 = vsyncpa [#allocation4], 1 }
 0xbe3   :  { %4336 = vsyncpa [#allocation5], 1 }

</bundles_post_ra>
